<compile_context>
chip_gen: v6e
topology: v6e:2x2x1
jax: 0.10.0
libtpu: 0.0.40
codegen_flags: <defaults>
</compile_context>

<pallas_src>
import functools

import jax
import jax.numpy as jnp
import numpy as np
from jax import lax
from jax.experimental import pallas as pl
from jax.experimental.pallas import tpu as pltpu

NEG_SLOPE = 0.01   # nn.LeakyReLU default
EPS = 1e-5         # nn.InstanceNorm3d default


def _leaky(x):
    return jnp.maximum(x, NEG_SLOPE * x)


def _inorm(h):
    # h: (C, S) channels-first -- InstanceNorm over the spatial (lane) axis, biased variance.
    mean = jnp.mean(h, axis=-1, keepdims=True)
    var = jnp.mean((h - mean) ** 2, axis=-1, keepdims=True)
    return (h - mean) * lax.rsqrt(var + EPS)


# -----------------------------------------------------------------------------
# Fused kernel: up(x1) + x2  ->  DoubleConv      (one grid step per batch sample)
# -----------------------------------------------------------------------------
def _up_doubleconv_kernel(x1_ref, x2_ref, wup_ref, bup_ref, w1_ref, w2_ref,
                          w3_ref, m_ref, o_ref, *, D1, H1, W1, residual):
    Ch = x2_ref.shape[1]
    Co = w1_ref.shape[0]
    D2, H2, W2 = 2 * D1, 2 * H1, 2 * W1
    S2 = D2 * H2 * W2

    # ---- ConvTranspose3d(Cl, Ch, k=2, s=2): one bf16 MXU matmul yields all 8 taps ----
    x1b = x1_ref[0].astype(jnp.bfloat16)                                 # (Cl, S1)
    y = lax.dot_general(x1b, wup_ref[...],
                        (((0,), (0,)), ((), ())),
                        preferred_element_type=jnp.float32)              # (S1, 8*Ch)

    # ---- interleave the 8 (kd,kh,kw) taps into (D2,H2,W2,Ch) in VMEM ----
    # TODO(synk): replace the stack/reshape tree with strided stores / lane rolls.
    vs = []
    for kd in range(2):
        us = []
        for kh in range(2):
            k0 = kd * 4 + kh * 2
            t0 = y[:, (k0 + 0) * Ch:(k0 + 1) * Ch].reshape(D1, H1, W1, Ch)
            t1 = y[:, (k0 + 1) * Ch:(k0 + 2) * Ch].reshape(D1, H1, W1, Ch)
            us.append(jnp.stack([t0, t1], axis=3).reshape(D1, H1, W2, Ch))   # W interleave
        vs.append(jnp.stack(us, axis=2).reshape(D1, H2, W2, Ch))             # H interleave
    xup = jnp.stack(vs, axis=1).reshape(S2, Ch)                              # D interleave

    # ---- fusion 'add', channels-first: one small 2-D transpose, then everything is (C, S2) ----
    x = jnp.transpose(xup) + bup_ref[...] + x2_ref[0]                    # (Ch, S2) f32
    xb = x.astype(jnp.bfloat16)

    # ---- Conv3d 1x1 -> IN -> LReLU   (b1 dropped: cancelled by InstanceNorm) ----
    h = jnp.dot(w1_ref[...], xb, preferred_element_type=jnp.float32)     # (Co, S2)
    hb = _leaky(_inorm(h)).astype(jnp.bfloat16)

    # ---- grouped Conv3d 3x3x3 (pad=1, groups=8): 27 lane-shifted, masked bf16 taps ----
    acc = jnp.zeros((Co, S2), jnp.float32)
    t = 0
    for kd in (-1, 0, 1):
        for kh in (-1, 0, 1):
            for kw in (-1, 0, 1):
                off = kd * H2 * W2 + kh * W2 + kw
                if off == 0:
                    s = hb
                else:
                    # s[:, i] = hb[:, i + off]; out-of-range neighbours masked to 0.
                    s = jnp.roll(hb, -off, axis=1) * m_ref[t]            # (Co,S2)*(1,S2)
                acc = acc + jnp.dot(w2_ref[t], s,
                                    preferred_element_type=jnp.float32)  # block-diag (Co,Co)
                t += 1
    h2b = _leaky(_inorm(acc)).astype(jnp.bfloat16)

    # ---- Conv3d 1x1 -> IN (+ residual) -> LReLU   (b3 dropped) ----
    h3 = _inorm(jnp.dot(w3_ref[...], h2b, preferred_element_type=jnp.float32))
    out = _leaky(h3 + x) if residual else _leaky(h3)                     # (Co, S2)

    # ---- lane-dense channels-first store: (Co, S2) == NCDHW-flat ----
    o_ref[0] = out


# -----------------------------------------------------------------------------
# Helpers: VMEM budget, border masks
# -----------------------------------------------------------------------------
def _padded_bytes(shape, dtype):
    itemsize = np.dtype(dtype).itemsize
    if len(shape) < 2:
        return int(np.prod(shape, dtype=np.int64)) * itemsize
    sub = 8 * max(1, 4 // itemsize)
    lead = int(np.prod(shape[:-2], dtype=np.int64)) if len(shape) > 2 else 1
    r = -(-shape[-2] // sub) * sub
    c = -(-shape[-1] // 128) * 128
    return lead * r * c * itemsize


def _vmem_limit(block_bytes, temp_bytes):
    try:
        phys = pltpu.get_tpu_info().vmem_capacity_bytes
    except Exception:
        phys = 64 * 1024 * 1024
    cap = phys * 7 // 8          # headroom for Mosaic internal scratch (v7x: ~56 MiB)
    need = 2 * block_bytes + temp_bytes
    return int(min(max(need, 16 * 1024 * 1024), cap))


def _border_masks(D2, H2, W2):
    d = np.arange(D2)[:, None, None]
    h = np.arange(H2)[None, :, None]
    w = np.arange(W2)[None, None, :]
    ms = []
    for kd in (-1, 0, 1):
        for kh in (-1, 0, 1):
            for kw in (-1, 0, 1):
                m = ((d + kd >= 0) & (d + kd < D2) & (h + kh >= 0) & (h + kh < H2)
                     & (w + kw >= 0) & (w + kw < W2))
                ms.append(m.reshape(-1))
    return np.stack(ms).astype(np.float32).reshape(27, 1, D2 * H2 * W2)


# -----------------------------------------------------------------------------
# Wrapper: parameter prep + single fused pallas_call.  All I/O stays NCDHW-flat.
# -----------------------------------------------------------------------------
def init_params(key, low_c, high_c, out_c):
    ks = jax.random.split(key, 8)
    s = 0.1
    return {
        # ConvTranspose3d(low_c, high_c, 2, 2): torch weight layout (Cin, Cout, 2, 2, 2)
        'w_up': s * jax.random.normal(ks[0], (low_c, high_c, 2, 2, 2), jnp.float32),
        'b_up': s * jax.random.normal(ks[1], (high_c,), jnp.float32),
        # DoubleConv(high_c, out_c)
        'w1': s * jax.random.normal(ks[2], (out_c, high_c, 1, 1, 1), jnp.float32),
        'b1': s * jax.random.normal(ks[3], (out_c,), jnp.float32),
        'w2': s * jax.random.normal(ks[4], (out_c, out_c // 8, 3, 3, 3), jnp.float32),
        'b2': s * jax.random.normal(ks[5], (out_c,), jnp.float32),
        'w3': s * jax.random.normal(ks[6], (out_c, out_c, 1, 1, 1), jnp.float32),
        'b3': s * jax.random.normal(ks[7], (out_c,), jnp.float32),
    }


def up_forward(x1_ncdhw, x2_ncdhw, params):
    x1 = x1_ncdhw.astype(jnp.float32)
    x2 = x2_ncdhw.astype(jnp.float32)
    N, Cl, D1, H1, W1 = x1.shape
    _, Ch, D2, H2, W2 = x2.shape
    Co = params['b1'].shape[0]
    S1, S2 = D1 * H1 * W1, D2 * H2 * W2

    # NCDHW -> (N, C, S): pure reshapes, no HBM data movement, lane-dense DMAs.
    x1_cf = x1.reshape(N, Cl, S1)
    x2_cf = x2.reshape(N, Ch, S2)

    # ConvTranspose weights as one (Cl, 8*Ch) matrix (tap-major columns); bias as (Ch,1).
    w_up_mat = jnp.transpose(params['w_up'], (0, 2, 3, 4, 1)).reshape(Cl, 8 * Ch)
    w_up_mat = w_up_mat.astype(jnp.bfloat16)
    b_up_col = params['b_up'].reshape(Ch, 1)

    # 1x1 convs, channels-first left-multiply: (Co, Ch) / (Co, Co), bf16 for the MXU.
    w1 = params['w1'][:, :, 0, 0, 0].astype(jnp.bfloat16)
    w3 = params['w3'][:, :, 0, 0, 0].astype(jnp.bfloat16)

    # Grouped 3x3x3 conv: block-diagonal (Co, Co) weight per tap -> (27, Co, Co) bf16.
    G = 8
    cpg = Co // G
    w2g = params['w2'].reshape(G, cpg, cpg, 3, 3, 3)               # (g, o_l, i_l, kd, kh, kw)
    w2t = jnp.transpose(w2g, (3, 4, 5, 0, 1, 2)).reshape(27, G, cpg, cpg)
    eye_g = jnp.eye(G, dtype=jnp.float32)
    w2bd = jnp.einsum('tgoi,gh->tgohi', w2t, eye_g).reshape(27, Co, Co).astype(jnp.bfloat16)

    # Static 0/1 border masks for the 27 taps (exact in bf16).
    masks = jnp.asarray(_border_masks(D2, H2, W2), dtype=jnp.bfloat16)   # (27, 1, S2)

    block_bytes = sum(_padded_bytes(s, d) for s, d in [
        ((1, Cl, S1), jnp.float32), ((1, Ch, S2), jnp.float32),
        ((Cl, 8 * Ch), jnp.bfloat16), ((Ch, 1), jnp.float32),
        ((Co, Ch), jnp.bfloat16), ((27, Co, Co), jnp.bfloat16),
        ((Co, Co), jnp.bfloat16), ((27, 1, S2), jnp.bfloat16),
        ((1, Co, S2), jnp.float32)])
    temp_bytes = (24 * _padded_bytes((Co, S2), jnp.float32)
                  + 12 * _padded_bytes((S2, Ch), jnp.float32))

    kern = functools.partial(_up_doubleconv_kernel, D1=D1, H1=H1, W1=W1,
                             residual=(Ch == Co))
    out_cf = pl.pallas_call(
        kern,
        out_shape=jax.ShapeDtypeStruct((N, Co, S2), jnp.float32),
        grid=(N,),
        in_specs=[
            pl.BlockSpec((1, Cl, S1), lambda n: (n, 0, 0)),
            pl.BlockSpec((1, Ch, S2), lambda n: (n, 0, 0)),
            pl.BlockSpec((Cl, 8 * Ch), lambda n: (0, 0)),
            pl.BlockSpec((Ch, 1), lambda n: (0, 0)),
            pl.BlockSpec((Co, Ch), lambda n: (0, 0)),
            pl.BlockSpec((27, Co, Co), lambda n: (0, 0, 0)),
            pl.BlockSpec((Co, Co), lambda n: (0, 0)),
            pl.BlockSpec((27, 1, S2), lambda n: (0, 0, 0)),
        ],
        out_specs=pl.BlockSpec((1, Co, S2), lambda n: (n, 0, 0)),
        compiler_params=pltpu.CompilerParams(
            dimension_semantics=("parallel",),      # batch steps are independent
            vmem_limit_bytes=_vmem_limit(block_bytes, temp_bytes)),
    )(x1_cf, x2_cf, w_up_mat, b_up_col, w1, w2bd, w3, masks)

    return out_cf.reshape(N, Co, D2, H2, W2)        # free reshape back to NCDHW


# -----------------------------------------------------------------------------
# Pure-JAX reference (mirrors the PyTorch graph AND the kernel's precision policy:
# bf16 matmul operands, f32 accumulation) for verification.
# -----------------------------------------------------------------------------
def _inorm_cf(x):
    mean = jnp.mean(x, axis=(2, 3, 4), keepdims=True)
    var = jnp.mean((x - mean) ** 2, axis=(2, 3, 4), keepdims=True)
    return (x - mean) * lax.rsqrt(var + EPS)


def ref_up(x1, x2, p):
    bf = lambda a: a.astype(jnp.bfloat16)
    f32 = jnp.float32
    N, Cl, D1, H1, W1 = x1.shape
    Ch = p['b_up'].shape[0]
    Co = p['b1'].shape[0]
    D2, H2, W2 = 2 * D1, 2 * H1, 2 * W1

    # ConvTranspose3d(k=2, s=2)
    y = jnp.einsum('ncdhw,cokps->nodkhpws', bf(x1), bf(p['w_up']),
                   preferred_element_type=f32)
    y = y.reshape(N, Ch, D2, H2, W2) + p['b_up'][None, :, None, None, None]
    x = x2 + y

    # Conv1x1 -> IN -> LReLU
    h = jnp.einsum('ncdhw,oc->nodhw', bf(x), bf(p['w1'][:, :, 0, 0, 0]),
                   preferred_element_type=f32)
    h = _leaky(_inorm_cf(h + p['b1'][None, :, None, None, None]))

    # Conv3x3x3, groups=8, pad=1 -> IN -> LReLU
    G, cpg = 8, Co // 8
    hp = jnp.pad(h, ((0, 0), (0, 0), (1, 1), (1, 1), (1, 1)))
    hg = hp.reshape(N, G, cpg, D2 + 2, H2 + 2, W2 + 2)
    w2g = p['w2'].reshape(G, cpg, cpg, 3, 3, 3)
    acc = jnp.zeros((N, G, cpg, D2, H2, W2), f32)
    for kd in range(3):
        for kh in range(3):
            for kw in range(3):
                sl = hg[:, :, :, kd:kd + D2, kh:kh + H2, kw:kw + W2]
                acc = acc + jnp.einsum('ngidhw,goi->ngodhw', bf(sl),
                                       bf(w2g[:, :, :, kd, kh, kw]),
                                       preferred_element_type=f32)
    h2 = acc.reshape(N, Co, D2, H2, W2) + p['b2'][None, :, None, None, None]
    h2 = _leaky(_inorm_cf(h2))

    # Conv1x1 -> IN (+ residual) -> LReLU
    h3 = jnp.einsum('ncdhw,oc->nodhw', bf(h2), bf(p['w3'][:, :, 0, 0, 0]),
                    preferred_element_type=f32)
    h3 = _inorm_cf(h3 + p['b3'][None, :, None, None, None])
    return _leaky(h3 + x) if Ch == Co else _leaky(h3)


if __name__ == "__main__":
    key = jax.random.PRNGKey(0)
    k1, k2, kp = jax.random.split(key, 3)
    N = 2
    low_c, high_c, out_c = 32, 16, 16       # residual branch active (high_c == out_c)
    D1 = H1 = W1 = 4
    x1 = jax.random.normal(k1, (N, low_c, D1, H1, W1), jnp.float32)
    x2 = jax.random.normal(k2, (N, high_c, 2 * D1, 2 * H1, 2 * W1), jnp.float32)
    params = init_params(kp, low_c, high_c, out_c)

    out = jax.block_until_ready(jax.jit(up_forward)(x1, x2, params))
    assert out.shape == (N, out_c, 2 * D1, 2 * H1, 2 * W1)

    ref = jax.block_until_ready(ref_up(x1, x2, params))
    # Kernel and reference share the same precision policy (bf16 operands, f32 accumulation),
    # so remaining differences are only accumulation-order / bias-folding rounding (~1e-5).
    np.testing.assert_allclose(np.asarray(out), np.asarray(ref), rtol=1e-2, atol=1e-2)
    print("KERNEL_OK")
</pallas_src>

<mosaic_0001>
module attributes {stable_mosaic.version = 11 : i64} {
  func.func @_up_doubleconv_kernel(%arg0: i32, %arg1: memref<1x32x64xf32, #tpu.memory_space<vmem>>, %arg2: memref<1x16x512xf32, #tpu.memory_space<vmem>>, %arg3: memref<32x128xbf16, #tpu.memory_space<vmem>>, %arg4: memref<16x1xf32, #tpu.memory_space<vmem>>, %arg5: memref<16x16xbf16, #tpu.memory_space<vmem>>, %arg6: memref<27x16x16xbf16, #tpu.memory_space<vmem>>, %arg7: memref<16x16xbf16, #tpu.memory_space<vmem>>, %arg8: memref<27x1x512xbf16, #tpu.memory_space<vmem>>, %arg9: memref<1x16x512xf32, #tpu.memory_space<vmem>>) attributes {dimension_semantics = [#tpu.dimension_semantics<parallel>], iteration_bounds = array<i64: 2>, scalar_prefetch = 0 : i64, scratch_operands = 0 : i64, tpu.core_type = #tpu.core_type<tc>, window_params = [{transform_indices = @transform_0, window_bounds = array<i64: 1, 32, 64>}, {transform_indices = @transform_1, window_bounds = array<i64: 1, 16, 512>}, {pipeline_mode = #tpu.pipeline_mode<synchronous>, transform_indices = @transform_2, window_bounds = array<i64: 32, 128>}, {pipeline_mode = #tpu.pipeline_mode<synchronous>, transform_indices = @transform_3, window_bounds = array<i64: 16, 1>}, {pipeline_mode = #tpu.pipeline_mode<synchronous>, transform_indices = @transform_4, window_bounds = array<i64: 16, 16>}, {pipeline_mode = #tpu.pipeline_mode<synchronous>, transform_indices = @transform_5, window_bounds = array<i64: 27, 16, 16>}, {pipeline_mode = #tpu.pipeline_mode<synchronous>, transform_indices = @transform_6, window_bounds = array<i64: 16, 16>}, {pipeline_mode = #tpu.pipeline_mode<synchronous>, transform_indices = @transform_7, window_bounds = array<i64: 27, 1, 512>}, {transform_indices = @transform_8, window_bounds = array<i64: 1, 16, 512>}]} {
    %c0 = arith.constant 0 : index
    %c0_0 = arith.constant 0 : index
    %c0_1 = arith.constant 0 : index
    %0 = vector.load %arg1[%c0, %c0_0, %c0_1] : memref<1x32x64xf32, #tpu.memory_space<vmem>>, vector<1x32x64xf32>
    %1 = vector.shape_cast %0 : vector<1x32x64xf32> to vector<32x64xf32>
    %2 = arith.truncf %1 : vector<32x64xf32> to vector<32x64xbf16>
    %c0_2 = arith.constant 0 : index
    %c0_3 = arith.constant 0 : index
    %3 = vector.load %arg3[%c0_2, %c0_3] : memref<32x128xbf16, #tpu.memory_space<vmem>>, vector<32x128xbf16>
    %cst = arith.constant dense<0.000000e+00> : vector<64x128xf32>
    %4 = tpu.matmul %2, %3, %cst {dimension_numbers = #tpu.dot_dimension_numbers<[0], [0], [1], [1], [0, 1, 1, 1], [], []>} : vector<32x64xbf16>, vector<32x128xbf16>, vector<64x128xf32> -> vector<64x128xf32>
    %5 = vector.extract_strided_slice %4 {offsets = [0, 0], sizes = [64, 16], strides = [1, 1]} : vector<64x128xf32> to vector<64x16xf32>
    %6 = vector.shape_cast %5 : vector<64x16xf32> to vector<4x4x4x16xf32>
    %7 = vector.extract_strided_slice %4 {offsets = [0, 16], sizes = [64, 16], strides = [1, 1]} : vector<64x128xf32> to vector<64x16xf32>
    %8 = vector.shape_cast %7 : vector<64x16xf32> to vector<4x4x4x16xf32>
    %9 = vector.shape_cast %6 : vector<4x4x4x16xf32> to vector<4x4x4x1x16xf32>
    %10 = vector.shape_cast %8 : vector<4x4x4x16xf32> to vector<4x4x4x1x16xf32>
    %11 = tpu.concatenate %9, %10 in 3 : vector<4x4x4x1x16xf32>, vector<4x4x4x1x16xf32> -> vector<4x4x4x2x16xf32>
    %12 = vector.shape_cast %11 : vector<4x4x4x2x16xf32> to vector<4x4x8x16xf32>
    %13 = vector.extract_strided_slice %4 {offsets = [0, 32], sizes = [64, 16], strides = [1, 1]} : vector<64x128xf32> to vector<64x16xf32>
    %14 = vector.shape_cast %13 : vector<64x16xf32> to vector<4x4x4x16xf32>
    %15 = vector.extract_strided_slice %4 {offsets = [0, 48], sizes = [64, 16], strides = [1, 1]} : vector<64x128xf32> to vector<64x16xf32>
    %16 = vector.shape_cast %15 : vector<64x16xf32> to vector<4x4x4x16xf32>
    %17 = vector.shape_cast %14 : vector<4x4x4x16xf32> to vector<4x4x4x1x16xf32>
    %18 = vector.shape_cast %16 : vector<4x4x4x16xf32> to vector<4x4x4x1x16xf32>
    %19 = tpu.concatenate %17, %18 in 3 : vector<4x4x4x1x16xf32>, vector<4x4x4x1x16xf32> -> vector<4x4x4x2x16xf32>
    %20 = vector.shape_cast %19 : vector<4x4x4x2x16xf32> to vector<4x4x8x16xf32>
    %21 = vector.shape_cast %12 : vector<4x4x8x16xf32> to vector<4x4x1x8x16xf32>
    %22 = vector.shape_cast %20 : vector<4x4x8x16xf32> to vector<4x4x1x8x16xf32>
    %23 = tpu.concatenate %21, %22 in 2 : vector<4x4x1x8x16xf32>, vector<4x4x1x8x16xf32> -> vector<4x4x2x8x16xf32>
    %24 = vector.shape_cast %23 : vector<4x4x2x8x16xf32> to vector<4x8x8x16xf32>
    %25 = vector.extract_strided_slice %4 {offsets = [0, 64], sizes = [64, 16], strides = [1, 1]} : vector<64x128xf32> to vector<64x16xf32>
    %26 = vector.shape_cast %25 : vector<64x16xf32> to vector<4x4x4x16xf32>
    %27 = vector.extract_strided_slice %4 {offsets = [0, 80], sizes = [64, 16], strides = [1, 1]} : vector<64x128xf32> to vector<64x16xf32>
    %28 = vector.shape_cast %27 : vector<64x16xf32> to vector<4x4x4x16xf32>
    %29 = vector.shape_cast %26 : vector<4x4x4x16xf32> to vector<4x4x4x1x16xf32>
    %30 = vector.shape_cast %28 : vector<4x4x4x16xf32> to vector<4x4x4x1x16xf32>
    %31 = tpu.concatenate %29, %30 in 3 : vector<4x4x4x1x16xf32>, vector<4x4x4x1x16xf32> -> vector<4x4x4x2x16xf32>
    %32 = vector.shape_cast %31 : vector<4x4x4x2x16xf32> to vector<4x4x8x16xf32>
    %33 = vector.extract_strided_slice %4 {offsets = [0, 96], sizes = [64, 16], strides = [1, 1]} : vector<64x128xf32> to vector<64x16xf32>
    %34 = vector.shape_cast %33 : vector<64x16xf32> to vector<4x4x4x16xf32>
    %35 = vector.extract_strided_slice %4 {offsets = [0, 112], sizes = [64, 16], strides = [1, 1]} : vector<64x128xf32> to vector<64x16xf32>
    %36 = vector.shape_cast %35 : vector<64x16xf32> to vector<4x4x4x16xf32>
    %37 = vector.shape_cast %34 : vector<4x4x4x16xf32> to vector<4x4x4x1x16xf32>
    %38 = vector.shape_cast %36 : vector<4x4x4x16xf32> to vector<4x4x4x1x16xf32>
    %39 = tpu.concatenate %37, %38 in 3 : vector<4x4x4x1x16xf32>, vector<4x4x4x1x16xf32> -> vector<4x4x4x2x16xf32>
    %40 = vector.shape_cast %39 : vector<4x4x4x2x16xf32> to vector<4x4x8x16xf32>
    %41 = vector.shape_cast %32 : vector<4x4x8x16xf32> to vector<4x4x1x8x16xf32>
    %42 = vector.shape_cast %40 : vector<4x4x8x16xf32> to vector<4x4x1x8x16xf32>
    %43 = tpu.concatenate %41, %42 in 2 : vector<4x4x1x8x16xf32>, vector<4x4x1x8x16xf32> -> vector<4x4x2x8x16xf32>
    %44 = vector.shape_cast %43 : vector<4x4x2x8x16xf32> to vector<4x8x8x16xf32>
    %45 = vector.shape_cast %24 : vector<4x8x8x16xf32> to vector<4x1x8x8x16xf32>
    %46 = vector.shape_cast %44 : vector<4x8x8x16xf32> to vector<4x1x8x8x16xf32>
    %47 = tpu.concatenate %45, %46 in 1 : vector<4x1x8x8x16xf32>, vector<4x1x8x8x16xf32> -> vector<4x2x8x8x16xf32>
    %48 = vector.shape_cast %47 : vector<4x2x8x8x16xf32> to vector<512x16xf32>
    %49 = tpu.transpose %48, [1, 0] : vector<512x16xf32> -> vector<16x512xf32>
    %c0_4 = arith.constant 0 : index
    %c0_5 = arith.constant 0 : index
    %50 = vector.load %arg4[%c0_4, %c0_5] : memref<16x1xf32, #tpu.memory_space<vmem>>, vector<16x1xf32>
    %51 = vector.broadcast %50 : vector<16x1xf32> to vector<16x512xf32>
    %52 = arith.addf %49, %51 : vector<16x512xf32>
    %c0_6 = arith.constant 0 : index
    %c0_7 = arith.constant 0 : index
    %c0_8 = arith.constant 0 : index
    %53 = vector.load %arg2[%c0_6, %c0_7, %c0_8] : memref<1x16x512xf32, #tpu.memory_space<vmem>>, vector<1x16x512xf32>
    %54 = vector.shape_cast %53 : vector<1x16x512xf32> to vector<16x512xf32>
    %55 = arith.addf %52, %54 : vector<16x512xf32>
    %56 = arith.truncf %55 : vector<16x512xf32> to vector<16x512xbf16>
    %c0_9 = arith.constant 0 : index
    %c0_10 = arith.constant 0 : index
    %57 = vector.load %arg5[%c0_9, %c0_10] : memref<16x16xbf16, #tpu.memory_space<vmem>>, vector<16x16xbf16>
    %cst_11 = arith.constant dense<0.000000e+00> : vector<16x512xf32>
    %58 = tpu.matmul %57, %56, %cst_11 {dimension_numbers = #tpu.dot_dimension_numbers<[1], [0], [0], [1], [0, 0, 1, 1], [], []>} : vector<16x16xbf16>, vector<16x512xbf16>, vector<16x512xf32> -> vector<16x512xf32>
    %cst_12 = arith.constant dense<0.000000e+00> : vector<16xf32>
    %59 = vector.multi_reduction <add>, %58, %cst_12 [1] : vector<16x512xf32> to vector<16xf32>
    %60 = vector.shape_cast %59 : vector<16xf32> to vector<16x1xf32>
    %cst_13 = arith.constant 5.120000e+02 : f32
    %61 = vector.broadcast %cst_13 : f32 to vector<16x1xf32>
    %62 = arith.divf %60, %61 : vector<16x1xf32>
    %63 = vector.broadcast %62 : vector<16x1xf32> to vector<16x512xf32>
    %64 = arith.subf %58, %63 : vector<16x512xf32>
    %65 = arith.mulf %64, %64 : vector<16x512xf32>
    %cst_14 = arith.constant dense<0.000000e+00> : vector<16xf32>
    %66 = vector.multi_reduction <add>, %65, %cst_14 [1] : vector<16x512xf32> to vector<16xf32>
    %67 = vector.shape_cast %66 : vector<16xf32> to vector<16x1xf32>
    %cst_15 = arith.constant 5.120000e+02 : f32
    %68 = vector.broadcast %cst_15 : f32 to vector<16x1xf32>
    %69 = arith.divf %67, %68 : vector<16x1xf32>
    %70 = vector.broadcast %62 : vector<16x1xf32> to vector<16x512xf32>
    %71 = arith.subf %58, %70 : vector<16x512xf32>
    %cst_16 = arith.constant 9.99999974E-6 : f32
    %72 = vector.broadcast %cst_16 : f32 to vector<16x1xf32>
    %73 = arith.addf %69, %72 : vector<16x1xf32>
    %74 = math.rsqrt %73 : vector<16x1xf32>
    %75 = vector.broadcast %74 : vector<16x1xf32> to vector<16x512xf32>
    %76 = arith.mulf %71, %75 : vector<16x512xf32>
    %cst_17 = arith.constant 0.00999999977 : f32
    %77 = vector.broadcast %cst_17 : f32 to vector<16x512xf32>
    %78 = arith.mulf %77, %76 : vector<16x512xf32>
    %79 = arith.maximumf %76, %78 : vector<16x512xf32>
    %80 = arith.truncf %79 : vector<16x512xf32> to vector<16x512xbf16>
    %cst_18 = arith.constant 0.000000e+00 : f32
    %81 = vector.broadcast %cst_18 : f32 to vector<16x512xf32>
    %82 = vector.extract_strided_slice %80 {offsets = [0, 439], sizes = [16, 73], strides = [1, 1]} : vector<16x512xbf16> to vector<16x73xbf16>
    %83 = vector.extract_strided_slice %80 {offsets = [0, 0], sizes = [16, 439], strides = [1, 1]} : vector<16x512xbf16> to vector<16x439xbf16>
    %84 = tpu.concatenate %82, %83 in 1 : vector<16x73xbf16>, vector<16x439xbf16> -> vector<16x512xbf16>
    %c0_19 = arith.constant 0 : index
    %c0_20 = arith.constant 0 : index
    %c0_21 = arith.constant 0 : index
    %85 = vector.load %arg8[%c0_19, %c0_20, %c0_21] : memref<27x1x512xbf16, #tpu.memory_space<vmem>>, vector<1x1x512xbf16>
    %86 = vector.shape_cast %85 : vector<1x1x512xbf16> to vector<1x512xbf16>
    %87 = vector.broadcast %86 : vector<1x512xbf16> to vector<16x512xbf16>
    %88 = arith.mulf %84, %87 : vector<16x512xbf16>
    %c0_22 = arith.constant 0 : index
    %c0_23 = arith.constant 0 : index
    %c0_24 = arith.constant 0 : index
    %89 = vector.load %arg6[%c0_22, %c0_23, %c0_24] : memref<27x16x16xbf16, #tpu.memory_space<vmem>>, vector<1x16x16xbf16>
    %90 = vector.shape_cast %89 : vector<1x16x16xbf16> to vector<16x16xbf16>
    %cst_25 = arith.constant dense<0.000000e+00> : vector<16x512xf32>
    %91 = tpu.matmul %90, %88, %cst_25 {dimension_numbers = #tpu.dot_dimension_numbers<[1], [0], [0], [1], [0, 0, 1, 1], [], []>} : vector<16x16xbf16>, vector<16x512xbf16>, vector<16x512xf32> -> vector<16x512xf32>
    %92 = arith.addf %81, %91 : vector<16x512xf32>
    %93 = vector.extract_strided_slice %80 {offsets = [0, 440], sizes = [16, 72], strides = [1, 1]} : vector<16x512xbf16> to vector<16x72xbf16>
    %94 = vector.extract_strided_slice %80 {offsets = [0, 0], sizes = [16, 440], strides = [1, 1]} : vector<16x512xbf16> to vector<16x440xbf16>
    %95 = tpu.concatenate %93, %94 in 1 : vector<16x72xbf16>, vector<16x440xbf16> -> vector<16x512xbf16>
    %c1 = arith.constant 1 : index
    %c0_26 = arith.constant 0 : index
    %c0_27 = arith.constant 0 : index
    %96 = vector.load %arg8[%c1, %c0_26, %c0_27] : memref<27x1x512xbf16, #tpu.memory_space<vmem>>, vector<1x1x512xbf16>
    %97 = vector.shape_cast %96 : vector<1x1x512xbf16> to vector<1x512xbf16>
    %98 = vector.broadcast %97 : vector<1x512xbf16> to vector<16x512xbf16>
    %99 = arith.mulf %95, %98 : vector<16x512xbf16>
    %c1_28 = arith.constant 1 : index
    %c0_29 = arith.constant 0 : index
    %c0_30 = arith.constant 0 : index
    %100 = vector.load %arg6[%c1_28, %c0_29, %c0_30] : memref<27x16x16xbf16, #tpu.memory_space<vmem>>, vector<1x16x16xbf16>
    %101 = vector.shape_cast %100 : vector<1x16x16xbf16> to vector<16x16xbf16>
    %cst_31 = arith.constant dense<0.000000e+00> : vector<16x512xf32>
    %102 = tpu.matmul %101, %99, %cst_31 {dimension_numbers = #tpu.dot_dimension_numbers<[1], [0], [0], [1], [0, 0, 1, 1], [], []>} : vector<16x16xbf16>, vector<16x512xbf16>, vector<16x512xf32> -> vector<16x512xf32>
    %103 = arith.addf %92, %102 : vector<16x512xf32>
    %104 = vector.extract_strided_slice %80 {offsets = [0, 441], sizes = [16, 71], strides = [1, 1]} : vector<16x512xbf16> to vector<16x71xbf16>
    %105 = vector.extract_strided_slice %80 {offsets = [0, 0], sizes = [16, 441], strides = [1, 1]} : vector<16x512xbf16> to vector<16x441xbf16>
    %106 = tpu.concatenate %104, %105 in 1 : vector<16x71xbf16>, vector<16x441xbf16> -> vector<16x512xbf16>
    %c2 = arith.constant 2 : index
    %c0_32 = arith.constant 0 : index
    %c0_33 = arith.constant 0 : index
    %107 = vector.load %arg8[%c2, %c0_32, %c0_33] : memref<27x1x512xbf16, #tpu.memory_space<vmem>>, vector<1x1x512xbf16>
    %108 = vector.shape_cast %107 : vector<1x1x512xbf16> to vector<1x512xbf16>
    %109 = vector.broadcast %108 : vector<1x512xbf16> to vector<16x512xbf16>
    %110 = arith.mulf %106, %109 : vector<16x512xbf16>
    %c2_34 = arith.constant 2 : index
    %c0_35 = arith.constant 0 : index
    %c0_36 = arith.constant 0 : index
    %111 = vector.load %arg6[%c2_34, %c0_35, %c0_36] : memref<27x16x16xbf16, #tpu.memory_space<vmem>>, vector<1x16x16xbf16>
    %112 = vector.shape_cast %111 : vector<1x16x16xbf16> to vector<16x16xbf16>
    %cst_37 = arith.constant dense<0.000000e+00> : vector<16x512xf32>
    %113 = tpu.matmul %112, %110, %cst_37 {dimension_numbers = #tpu.dot_dimension_numbers<[1], [0], [0], [1], [0, 0, 1, 1], [], []>} : vector<16x16xbf16>, vector<16x512xbf16>, vector<16x512xf32> -> vector<16x512xf32>
    %114 = arith.addf %103, %113 : vector<16x512xf32>
    %115 = vector.extract_strided_slice %80 {offsets = [0, 447], sizes = [16, 65], strides = [1, 1]} : vector<16x512xbf16> to vector<16x65xbf16>
    %116 = vector.extract_strided_slice %80 {offsets = [0, 0], sizes = [16, 447], strides = [1, 1]} : vector<16x512xbf16> to vector<16x447xbf16>
    %117 = tpu.concatenate %115, %116 in 1 : vector<16x65xbf16>, vector<16x447xbf16> -> vector<16x512xbf16>
    %c3 = arith.constant 3 : index
    %c0_38 = arith.constant 0 : index
    %c0_39 = arith.constant 0 : index
    %118 = vector.load %arg8[%c3, %c0_38, %c0_39] : memref<27x1x512xbf16, #tpu.memory_space<vmem>>, vector<1x1x512xbf16>
    %119 = vector.shape_cast %118 : vector<1x1x512xbf16> to vector<1x512xbf16>
    %120 = vector.broadcast %119 : vector<1x512xbf16> to vector<16x512xbf16>
    %121 = arith.mulf %117, %120 : vector<16x512xbf16>
    %c3_40 = arith.constant 3 : index
    %c0_41 = arith.constant 0 : index
    %c0_42 = arith.constant 0 : index
    %122 = vector.load %arg6[%c3_40, %c0_41, %c0_42] : memref<27x16x16xbf16, #tpu.memory_space<vmem>>, vector<1x16x16xbf16>
    %123 = vector.shape_cast %122 : vector<1x16x16xbf16> to vector<16x16xbf16>
    %cst_43 = arith.constant dense<0.000000e+00> : vector<16x512xf32>
    %124 = tpu.matmul %123, %121, %cst_43 {dimension_numbers = #tpu.dot_dimension_numbers<[1], [0], [0], [1], [0, 0, 1, 1], [], []>} : vector<16x16xbf16>, vector<16x512xbf16>, vector<16x512xf32> -> vector<16x512xf32>
    %125 = arith.addf %114, %124 : vector<16x512xf32>
    %126 = vector.extract_strided_slice %80 {offsets = [0, 448], sizes = [16, 64], strides = [1, 1]} : vector<16x512xbf16> to vector<16x64xbf16>
    %127 = vector.extract_strided_slice %80 {offsets = [0, 0], sizes = [16, 448], strides = [1, 1]} : vector<16x512xbf16> to vector<16x448xbf16>
    %128 = tpu.concatenate %126, %127 in 1 : vector<16x64xbf16>, vector<16x448xbf16> -> vector<16x512xbf16>
    %c4 = arith.constant 4 : index
    %c0_44 = arith.constant 0 : index
    %c0_45 = arith.constant 0 : index
    %129 = vector.load %arg8[%c4, %c0_44, %c0_45] : memref<27x1x512xbf16, #tpu.memory_space<vmem>>, vector<1x1x512xbf16>
    %130 = vector.shape_cast %129 : vector<1x1x512xbf16> to vector<1x512xbf16>
    %131 = vector.broadcast %130 : vector<1x512xbf16> to vector<16x512xbf16>
    %132 = arith.mulf %128, %131 : vector<16x512xbf16>
    %c4_46 = arith.constant 4 : index
    %c0_47 = arith.constant 0 : index
    %c0_48 = arith.constant 0 : index
    %133 = vector.load %arg6[%c4_46, %c0_47, %c0_48] : memref<27x16x16xbf16, #tpu.memory_space<vmem>>, vector<1x16x16xbf16>
    %134 = vector.shape_cast %133 : vector<1x16x16xbf16> to vector<16x16xbf16>
    %cst_49 = arith.constant dense<0.000000e+00> : vector<16x512xf32>
    %135 = tpu.matmul %134, %132, %cst_49 {dimension_numbers = #tpu.dot_dimension_numbers<[1], [0], [0], [1], [0, 0, 1, 1], [], []>} : vector<16x16xbf16>, vector<16x512xbf16>, vector<16x512xf32> -> vector<16x512xf32>
    %136 = arith.addf %125, %135 : vector<16x512xf32>
    %137 = vector.extract_strided_slice %80 {offsets = [0, 449], sizes = [16, 63], strides = [1, 1]} : vector<16x512xbf16> to vector<16x63xbf16>
    %138 = vector.extract_strided_slice %80 {offsets = [0, 0], sizes = [16, 449], strides = [1, 1]} : vector<16x512xbf16> to vector<16x449xbf16>
    %139 = tpu.concatenate %137, %138 in 1 : vector<16x63xbf16>, vector<16x449xbf16> -> vector<16x512xbf16>
    %c5 = arith.constant 5 : index
    %c0_50 = arith.constant 0 : index
    %c0_51 = arith.constant 0 : index
    %140 = vector.load %arg8[%c5, %c0_50, %c0_51] : memref<27x1x512xbf16, #tpu.memory_space<vmem>>, vector<1x1x512xbf16>
    %141 = vector.shape_cast %140 : vector<1x1x512xbf16> to vector<1x512xbf16>
    %142 = vector.broadcast %141 : vector<1x512xbf16> to vector<16x512xbf16>
    %143 = arith.mulf %139, %142 : vector<16x512xbf16>
    %c5_52 = arith.constant 5 : index
    %c0_53 = arith.constant 0 : index
    %c0_54 = arith.constant 0 : index
    %144 = vector.load %arg6[%c5_52, %c0_53, %c0_54] : memref<27x16x16xbf16, #tpu.memory_space<vmem>>, vector<1x16x16xbf16>
    %145 = vector.shape_cast %144 : vector<1x16x16xbf16> to vector<16x16xbf16>
    %cst_55 = arith.constant dense<0.000000e+00> : vector<16x512xf32>
    %146 = tpu.matmul %145, %143, %cst_55 {dimension_numbers = #tpu.dot_dimension_numbers<[1], [0], [0], [1], [0, 0, 1, 1], [], []>} : vector<16x16xbf16>, vector<16x512xbf16>, vector<16x512xf32> -> vector<16x512xf32>
    %147 = arith.addf %136, %146 : vector<16x512xf32>
    %148 = vector.extract_strided_slice %80 {offsets = [0, 455], sizes = [16, 57], strides = [1, 1]} : vector<16x512xbf16> to vector<16x57xbf16>
    %149 = vector.extract_strided_slice %80 {offsets = [0, 0], sizes = [16, 455], strides = [1, 1]} : vector<16x512xbf16> to vector<16x455xbf16>
    %150 = tpu.concatenate %148, %149 in 1 : vector<16x57xbf16>, vector<16x455xbf16> -> vector<16x512xbf16>
    %c6 = arith.constant 6 : index
    %c0_56 = arith.constant 0 : index
    %c0_57 = arith.constant 0 : index
    %151 = vector.load %arg8[%c6, %c0_56, %c0_57] : memref<27x1x512xbf16, #tpu.memory_space<vmem>>, vector<1x1x512xbf16>
    %152 = vector.shape_cast %151 : vector<1x1x512xbf16> to vector<1x512xbf16>
    %153 = vector.broadcast %152 : vector<1x512xbf16> to vector<16x512xbf16>
    %154 = arith.mulf %150, %153 : vector<16x512xbf16>
    %c6_58 = arith.constant 6 : index
    %c0_59 = arith.constant 0 : index
    %c0_60 = arith.constant 0 : index
    %155 = vector.load %arg6[%c6_58, %c0_59, %c0_60] : memref<27x16x16xbf16, #tpu.memory_space<vmem>>, vector<1x16x16xbf16>
    %156 = vector.shape_cast %155 : vector<1x16x16xbf16> to vector<16x16xbf16>
    %cst_61 = arith.constant dense<0.000000e+00> : vector<16x512xf32>
    %157 = tpu.matmul %156, %154, %cst_61 {dimension_numbers = #tpu.dot_dimension_numbers<[1], [0], [0], [1], [0, 0, 1, 1], [], []>} : vector<16x16xbf16>, vector<16x512xbf16>, vector<16x512xf32> -> vector<16x512xf32>
    %158 = arith.addf %147, %157 : vector<16x512xf32>
    %159 = vector.extract_strided_slice %80 {offsets = [0, 456], sizes = [16, 56], strides = [1, 1]} : vector<16x512xbf16> to vector<16x56xbf16>
    %160 = vector.extract_strided_slice %80 {offsets = [0, 0], sizes = [16, 456], strides = [1, 1]} : vector<16x512xbf16> to vector<16x456xbf16>
    %161 = tpu.concatenate %159, %160 in 1 : vector<16x56xbf16>, vector<16x456xbf16> -> vector<16x512xbf16>
    %c7 = arith.constant 7 : index
    %c0_62 = arith.constant 0 : index
    %c0_63 = arith.constant 0 : index
    %162 = vector.load %arg8[%c7, %c0_62, %c0_63] : memref<27x1x512xbf16, #tpu.memory_space<vmem>>, vector<1x1x512xbf16>
    %163 = vector.shape_cast %162 : vector<1x1x512xbf16> to vector<1x512xbf16>
    %164 = vector.broadcast %163 : vector<1x512xbf16> to vector<16x512xbf16>
    %165 = arith.mulf %161, %164 : vector<16x512xbf16>
    %c7_64 = arith.constant 7 : index
    %c0_65 = arith.constant 0 : index
    %c0_66 = arith.constant 0 : index
    %166 = vector.load %arg6[%c7_64, %c0_65, %c0_66] : memref<27x16x16xbf16, #tpu.memory_space<vmem>>, vector<1x16x16xbf16>
    %167 = vector.shape_cast %166 : vector<1x16x16xbf16> to vector<16x16xbf16>
    %cst_67 = arith.constant dense<0.000000e+00> : vector<16x512xf32>
    %168 = tpu.matmul %167, %165, %cst_67 {dimension_numbers = #tpu.dot_dimension_numbers<[1], [0], [0], [1], [0, 0, 1, 1], [], []>} : vector<16x16xbf16>, vector<16x512xbf16>, vector<16x512xf32> -> vector<16x512xf32>
    %169 = arith.addf %158, %168 : vector<16x512xf32>
    %170 = vector.extract_strided_slice %80 {offsets = [0, 457], sizes = [16, 55], strides = [1, 1]} : vector<16x512xbf16> to vector<16x55xbf16>
    %171 = vector.extract_strided_slice %80 {offsets = [0, 0], sizes = [16, 457], strides = [1, 1]} : vector<16x512xbf16> to vector<16x457xbf16>
    %172 = tpu.concatenate %170, %171 in 1 : vector<16x55xbf16>, vector<16x457xbf16> -> vector<16x512xbf16>
    %c8 = arith.constant 8 : index
    %c0_68 = arith.constant 0 : index
    %c0_69 = arith.constant 0 : index
    %173 = vector.load %arg8[%c8, %c0_68, %c0_69] : memref<27x1x512xbf16, #tpu.memory_space<vmem>>, vector<1x1x512xbf16>
    %174 = vector.shape_cast %173 : vector<1x1x512xbf16> to vector<1x512xbf16>
    %175 = vector.broadcast %174 : vector<1x512xbf16> to vector<16x512xbf16>
    %176 = arith.mulf %172, %175 : vector<16x512xbf16>
    %c8_70 = arith.constant 8 : index
    %c0_71 = arith.constant 0 : index
    %c0_72 = arith.constant 0 : index
    %177 = vector.load %arg6[%c8_70, %c0_71, %c0_72] : memref<27x16x16xbf16, #tpu.memory_space<vmem>>, vector<1x16x16xbf16>
    %178 = vector.shape_cast %177 : vector<1x16x16xbf16> to vector<16x16xbf16>
    %cst_73 = arith.constant dense<0.000000e+00> : vector<16x512xf32>
    %179 = tpu.matmul %178, %176, %cst_73 {dimension_numbers = #tpu.dot_dimension_numbers<[1], [0], [0], [1], [0, 0, 1, 1], [], []>} : vector<16x16xbf16>, vector<16x512xbf16>, vector<16x512xf32> -> vector<16x512xf32>
    %180 = arith.addf %169, %179 : vector<16x512xf32>
    %181 = vector.extract_strided_slice %80 {offsets = [0, 503], sizes = [16, 9], strides = [1, 1]} : vector<16x512xbf16> to vector<16x9xbf16>
    %182 = vector.extract_strided_slice %80 {offsets = [0, 0], sizes = [16, 503], strides = [1, 1]} : vector<16x512xbf16> to vector<16x503xbf16>
    %183 = tpu.concatenate %181, %182 in 1 : vector<16x9xbf16>, vector<16x503xbf16> -> vector<16x512xbf16>
    %c9 = arith.constant 9 : index
    %c0_74 = arith.constant 0 : index
    %c0_75 = arith.constant 0 : index
    %184 = vector.load %arg8[%c9, %c0_74, %c0_75] : memref<27x1x512xbf16, #tpu.memory_space<vmem>>, vector<1x1x512xbf16>
    %185 = vector.shape_cast %184 : vector<1x1x512xbf16> to vector<1x512xbf16>
    %186 = vector.broadcast %185 : vector<1x512xbf16> to vector<16x512xbf16>
    %187 = arith.mulf %183, %186 : vector<16x512xbf16>
    %c9_76 = arith.constant 9 : index
    %c0_77 = arith.constant 0 : index
    %c0_78 = arith.constant 0 : index
    %188 = vector.load %arg6[%c9_76, %c0_77, %c0_78] : memref<27x16x16xbf16, #tpu.memory_space<vmem>>, vector<1x16x16xbf16>
    %189 = vector.shape_cast %188 : vector<1x16x16xbf16> to vector<16x16xbf16>
    %cst_79 = arith.constant dense<0.000000e+00> : vector<16x512xf32>
    %190 = tpu.matmul %189, %187, %cst_79 {dimension_numbers = #tpu.dot_dimension_numbers<[1], [0], [0], [1], [0, 0, 1, 1], [], []>} : vector<16x16xbf16>, vector<16x512xbf16>, vector<16x512xf32> -> vector<16x512xf32>
    %191 = arith.addf %180, %190 : vector<16x512xf32>
    %192 = vector.extract_strided_slice %80 {offsets = [0, 504], sizes = [16, 8], strides = [1, 1]} : vector<16x512xbf16> to vector<16x8xbf16>
    %193 = vector.extract_strided_slice %80 {offsets = [0, 0], sizes = [16, 504], strides = [1, 1]} : vector<16x512xbf16> to vector<16x504xbf16>
    %194 = tpu.concatenate %192, %193 in 1 : vector<16x8xbf16>, vector<16x504xbf16> -> vector<16x512xbf16>
    %c10 = arith.constant 10 : index
    %c0_80 = arith.constant 0 : index
    %c0_81 = arith.constant 0 : index
    %195 = vector.load %arg8[%c10, %c0_80, %c0_81] : memref<27x1x512xbf16, #tpu.memory_space<vmem>>, vector<1x1x512xbf16>
    %196 = vector.shape_cast %195 : vector<1x1x512xbf16> to vector<1x512xbf16>
    %197 = vector.broadcast %196 : vector<1x512xbf16> to vector<16x512xbf16>
    %198 = arith.mulf %194, %197 : vector<16x512xbf16>
    %c10_82 = arith.constant 10 : index
    %c0_83 = arith.constant 0 : index
    %c0_84 = arith.constant 0 : index
    %199 = vector.load %arg6[%c10_82, %c0_83, %c0_84] : memref<27x16x16xbf16, #tpu.memory_space<vmem>>, vector<1x16x16xbf16>
    %200 = vector.shape_cast %199 : vector<1x16x16xbf16> to vector<16x16xbf16>
    %cst_85 = arith.constant dense<0.000000e+00> : vector<16x512xf32>
    %201 = tpu.matmul %200, %198, %cst_85 {dimension_numbers = #tpu.dot_dimension_numbers<[1], [0], [0], [1], [0, 0, 1, 1], [], []>} : vector<16x16xbf16>, vector<16x512xbf16>, vector<16x512xf32> -> vector<16x512xf32>
    %202 = arith.addf %191, %201 : vector<16x512xf32>
    %203 = vector.extract_strided_slice %80 {offsets = [0, 505], sizes = [16, 7], strides = [1, 1]} : vector<16x512xbf16> to vector<16x7xbf16>
    %204 = vector.extract_strided_slice %80 {offsets = [0, 0], sizes = [16, 505], strides = [1, 1]} : vector<16x512xbf16> to vector<16x505xbf16>
    %205 = tpu.concatenate %203, %204 in 1 : vector<16x7xbf16>, vector<16x505xbf16> -> vector<16x512xbf16>
    %c11 = arith.constant 11 : index
    %c0_86 = arith.constant 0 : index
    %c0_87 = arith.constant 0 : index
    %206 = vector.load %arg8[%c11, %c0_86, %c0_87] : memref<27x1x512xbf16, #tpu.memory_space<vmem>>, vector<1x1x512xbf16>
    %207 = vector.shape_cast %206 : vector<1x1x512xbf16> to vector<1x512xbf16>
    %208 = vector.broadcast %207 : vector<1x512xbf16> to vector<16x512xbf16>
    %209 = arith.mulf %205, %208 : vector<16x512xbf16>
    %c11_88 = arith.constant 11 : index
    %c0_89 = arith.constant 0 : index
    %c0_90 = arith.constant 0 : index
    %210 = vector.load %arg6[%c11_88, %c0_89, %c0_90] : memref<27x16x16xbf16, #tpu.memory_space<vmem>>, vector<1x16x16xbf16>
    %211 = vector.shape_cast %210 : vector<1x16x16xbf16> to vector<16x16xbf16>
    %cst_91 = arith.constant dense<0.000000e+00> : vector<16x512xf32>
    %212 = tpu.matmul %211, %209, %cst_91 {dimension_numbers = #tpu.dot_dimension_numbers<[1], [0], [0], [1], [0, 0, 1, 1], [], []>} : vector<16x16xbf16>, vector<16x512xbf16>, vector<16x512xf32> -> vector<16x512xf32>
    %213 = arith.addf %202, %212 : vector<16x512xf32>
    %214 = vector.extract_strided_slice %80 {offsets = [0, 511], sizes = [16, 1], strides = [1, 1]} : vector<16x512xbf16> to vector<16x1xbf16>
    %215 = vector.extract_strided_slice %80 {offsets = [0, 0], sizes = [16, 511], strides = [1, 1]} : vector<16x512xbf16> to vector<16x511xbf16>
    %216 = tpu.concatenate %214, %215 in 1 : vector<16x1xbf16>, vector<16x511xbf16> -> vector<16x512xbf16>
    %c12 = arith.constant 12 : index
    %c0_92 = arith.constant 0 : index
    %c0_93 = arith.constant 0 : index
    %217 = vector.load %arg8[%c12, %c0_92, %c0_93] : memref<27x1x512xbf16, #tpu.memory_space<vmem>>, vector<1x1x512xbf16>
    %218 = vector.shape_cast %217 : vector<1x1x512xbf16> to vector<1x512xbf16>
    %219 = vector.broadcast %218 : vector<1x512xbf16> to vector<16x512xbf16>
    %220 = arith.mulf %216, %219 : vector<16x512xbf16>
    %c12_94 = arith.constant 12 : index
    %c0_95 = arith.constant 0 : index
    %c0_96 = arith.constant 0 : index
    %221 = vector.load %arg6[%c12_94, %c0_95, %c0_96] : memref<27x16x16xbf16, #tpu.memory_space<vmem>>, vector<1x16x16xbf16>
    %222 = vector.shape_cast %221 : vector<1x16x16xbf16> to vector<16x16xbf16>
    %cst_97 = arith.constant dense<0.000000e+00> : vector<16x512xf32>
    %223 = tpu.matmul %222, %220, %cst_97 {dimension_numbers = #tpu.dot_dimension_numbers<[1], [0], [0], [1], [0, 0, 1, 1], [], []>} : vector<16x16xbf16>, vector<16x512xbf16>, vector<16x512xf32> -> vector<16x512xf32>
    %224 = arith.addf %213, %223 : vector<16x512xf32>
    %c13 = arith.constant 13 : index
    %c0_98 = arith.constant 0 : index
    %c0_99 = arith.constant 0 : index
    %225 = vector.load %arg6[%c13, %c0_98, %c0_99] : memref<27x16x16xbf16, #tpu.memory_space<vmem>>, vector<1x16x16xbf16>
    %226 = vector.shape_cast %225 : vector<1x16x16xbf16> to vector<16x16xbf16>
    %cst_100 = arith.constant dense<0.000000e+00> : vector<16x512xf32>
    %227 = tpu.matmul %226, %80, %cst_100 {dimension_numbers = #tpu.dot_dimension_numbers<[1], [0], [0], [1], [0, 0, 1, 1], [], []>} : vector<16x16xbf16>, vector<16x512xbf16>, vector<16x512xf32> -> vector<16x512xf32>
    %228 = arith.addf %224, %227 : vector<16x512xf32>
    %229 = vector.extract_strided_slice %80 {offsets = [0, 1], sizes = [16, 511], strides = [1, 1]} : vector<16x512xbf16> to vector<16x511xbf16>
    %230 = vector.extract_strided_slice %80 {offsets = [0, 0], sizes = [16, 1], strides = [1, 1]} : vector<16x512xbf16> to vector<16x1xbf16>
    %231 = tpu.concatenate %229, %230 in 1 : vector<16x511xbf16>, vector<16x1xbf16> -> vector<16x512xbf16>
    %c14 = arith.constant 14 : index
    %c0_101 = arith.constant 0 : index
    %c0_102 = arith.constant 0 : index
    %232 = vector.load %arg8[%c14, %c0_101, %c0_102] : memref<27x1x512xbf16, #tpu.memory_space<vmem>>, vector<1x1x512xbf16>
    %233 = vector.shape_cast %232 : vector<1x1x512xbf16> to vector<1x512xbf16>
    %234 = vector.broadcast %233 : vector<1x512xbf16> to vector<16x512xbf16>
    %235 = arith.mulf %231, %234 : vector<16x512xbf16>
    %c14_103 = arith.constant 14 : index
    %c0_104 = arith.constant 0 : index
    %c0_105 = arith.constant 0 : index
    %236 = vector.load %arg6[%c14_103, %c0_104, %c0_105] : memref<27x16x16xbf16, #tpu.memory_space<vmem>>, vector<1x16x16xbf16>
    %237 = vector.shape_cast %236 : vector<1x16x16xbf16> to vector<16x16xbf16>
    %cst_106 = arith.constant dense<0.000000e+00> : vector<16x512xf32>
    %238 = tpu.matmul %237, %235, %cst_106 {dimension_numbers = #tpu.dot_dimension_numbers<[1], [0], [0], [1], [0, 0, 1, 1], [], []>} : vector<16x16xbf16>, vector<16x512xbf16>, vector<16x512xf32> -> vector<16x512xf32>
    %239 = arith.addf %228, %238 : vector<16x512xf32>
    %240 = vector.extract_strided_slice %80 {offsets = [0, 7], sizes = [16, 505], strides = [1, 1]} : vector<16x512xbf16> to vector<16x505xbf16>
    %241 = vector.extract_strided_slice %80 {offsets = [0, 0], sizes = [16, 7], strides = [1, 1]} : vector<16x512xbf16> to vector<16x7xbf16>
    %242 = tpu.concatenate %240, %241 in 1 : vector<16x505xbf16>, vector<16x7xbf16> -> vector<16x512xbf16>
    %c15 = arith.constant 15 : index
    %c0_107 = arith.constant 0 : index
    %c0_108 = arith.constant 0 : index
    %243 = vector.load %arg8[%c15, %c0_107, %c0_108] : memref<27x1x512xbf16, #tpu.memory_space<vmem>>, vector<1x1x512xbf16>
    %244 = vector.shape_cast %243 : vector<1x1x512xbf16> to vector<1x512xbf16>
    %245 = vector.broadcast %244 : vector<1x512xbf16> to vector<16x512xbf16>
    %246 = arith.mulf %242, %245 : vector<16x512xbf16>
    %c15_109 = arith.constant 15 : index
    %c0_110 = arith.constant 0 : index
    %c0_111 = arith.constant 0 : index
    %247 = vector.load %arg6[%c15_109, %c0_110, %c0_111] : memref<27x16x16xbf16, #tpu.memory_space<vmem>>, vector<1x16x16xbf16>
    %248 = vector.shape_cast %247 : vector<1x16x16xbf16> to vector<16x16xbf16>
    %cst_112 = arith.constant dense<0.000000e+00> : vector<16x512xf32>
    %249 = tpu.matmul %248, %246, %cst_112 {dimension_numbers = #tpu.dot_dimension_numbers<[1], [0], [0], [1], [0, 0, 1, 1], [], []>} : vector<16x16xbf16>, vector<16x512xbf16>, vector<16x512xf32> -> vector<16x512xf32>
    %250 = arith.addf %239, %249 : vector<16x512xf32>
    %251 = vector.extract_strided_slice %80 {offsets = [0, 8], sizes = [16, 504], strides = [1, 1]} : vector<16x512xbf16> to vector<16x504xbf16>
    %252 = vector.extract_strided_slice %80 {offsets = [0, 0], sizes = [16, 8], strides = [1, 1]} : vector<16x512xbf16> to vector<16x8xbf16>
    %253 = tpu.concatenate %251, %252 in 1 : vector<16x504xbf16>, vector<16x8xbf16> -> vector<16x512xbf16>
    %c16 = arith.constant 16 : index
    %c0_113 = arith.constant 0 : index
    %c0_114 = arith.constant 0 : index
    %254 = vector.load %arg8[%c16, %c0_113, %c0_114] : memref<27x1x512xbf16, #tpu.memory_space<vmem>>, vector<1x1x512xbf16>
    %255 = vector.shape_cast %254 : vector<1x1x512xbf16> to vector<1x512xbf16>
    %256 = vector.broadcast %255 : vector<1x512xbf16> to vector<16x512xbf16>
    %257 = arith.mulf %253, %256 : vector<16x512xbf16>
    %c16_115 = arith.constant 16 : index
    %c0_116 = arith.constant 0 : index
    %c0_117 = arith.constant 0 : index
    %258 = vector.load %arg6[%c16_115, %c0_116, %c0_117] : memref<27x16x16xbf16, #tpu.memory_space<vmem>>, vector<1x16x16xbf16>
    %259 = vector.shape_cast %258 : vector<1x16x16xbf16> to vector<16x16xbf16>
    %cst_118 = arith.constant dense<0.000000e+00> : vector<16x512xf32>
    %260 = tpu.matmul %259, %257, %cst_118 {dimension_numbers = #tpu.dot_dimension_numbers<[1], [0], [0], [1], [0, 0, 1, 1], [], []>} : vector<16x16xbf16>, vector<16x512xbf16>, vector<16x512xf32> -> vector<16x512xf32>
    %261 = arith.addf %250, %260 : vector<16x512xf32>
    %262 = vector.extract_strided_slice %80 {offsets = [0, 9], sizes = [16, 503], strides = [1, 1]} : vector<16x512xbf16> to vector<16x503xbf16>
    %263 = vector.extract_strided_slice %80 {offsets = [0, 0], sizes = [16, 9], strides = [1, 1]} : vector<16x512xbf16> to vector<16x9xbf16>
    %264 = tpu.concatenate %262, %263 in 1 : vector<16x503xbf16>, vector<16x9xbf16> -> vector<16x512xbf16>
    %c17 = arith.constant 17 : index
    %c0_119 = arith.constant 0 : index
    %c0_120 = arith.constant 0 : index
    %265 = vector.load %arg8[%c17, %c0_119, %c0_120] : memref<27x1x512xbf16, #tpu.memory_space<vmem>>, vector<1x1x512xbf16>
    %266 = vector.shape_cast %265 : vector<1x1x512xbf16> to vector<1x512xbf16>
    %267 = vector.broadcast %266 : vector<1x512xbf16> to vector<16x512xbf16>
    %268 = arith.mulf %264, %267 : vector<16x512xbf16>
    %c17_121 = arith.constant 17 : index
    %c0_122 = arith.constant 0 : index
    %c0_123 = arith.constant 0 : index
    %269 = vector.load %arg6[%c17_121, %c0_122, %c0_123] : memref<27x16x16xbf16, #tpu.memory_space<vmem>>, vector<1x16x16xbf16>
    %270 = vector.shape_cast %269 : vector<1x16x16xbf16> to vector<16x16xbf16>
    %cst_124 = arith.constant dense<0.000000e+00> : vector<16x512xf32>
    %271 = tpu.matmul %270, %268, %cst_124 {dimension_numbers = #tpu.dot_dimension_numbers<[1], [0], [0], [1], [0, 0, 1, 1], [], []>} : vector<16x16xbf16>, vector<16x512xbf16>, vector<16x512xf32> -> vector<16x512xf32>
    %272 = arith.addf %261, %271 : vector<16x512xf32>
    %273 = vector.extract_strided_slice %80 {offsets = [0, 55], sizes = [16, 457], strides = [1, 1]} : vector<16x512xbf16> to vector<16x457xbf16>
    %274 = vector.extract_strided_slice %80 {offsets = [0, 0], sizes = [16, 55], strides = [1, 1]} : vector<16x512xbf16> to vector<16x55xbf16>
    %275 = tpu.concatenate %273, %274 in 1 : vector<16x457xbf16>, vector<16x55xbf16> -> vector<16x512xbf16>
    %c18 = arith.constant 18 : index
    %c0_125 = arith.constant 0 : index
    %c0_126 = arith.constant 0 : index
    %276 = vector.load %arg8[%c18, %c0_125, %c0_126] : memref<27x1x512xbf16, #tpu.memory_space<vmem>>, vector<1x1x512xbf16>
    %277 = vector.shape_cast %276 : vector<1x1x512xbf16> to vector<1x512xbf16>
    %278 = vector.broadcast %277 : vector<1x512xbf16> to vector<16x512xbf16>
    %279 = arith.mulf %275, %278 : vector<16x512xbf16>
    %c18_127 = arith.constant 18 : index
    %c0_128 = arith.constant 0 : index
    %c0_129 = arith.constant 0 : index
    %280 = vector.load %arg6[%c18_127, %c0_128, %c0_129] : memref<27x16x16xbf16, #tpu.memory_space<vmem>>, vector<1x16x16xbf16>
    %281 = vector.shape_cast %280 : vector<1x16x16xbf16> to vector<16x16xbf16>
    %cst_130 = arith.constant dense<0.000000e+00> : vector<16x512xf32>
    %282 = tpu.matmul %281, %279, %cst_130 {dimension_numbers = #tpu.dot_dimension_numbers<[1], [0], [0], [1], [0, 0, 1, 1], [], []>} : vector<16x16xbf16>, vector<16x512xbf16>, vector<16x512xf32> -> vector<16x512xf32>
    %283 = arith.addf %272, %282 : vector<16x512xf32>
    %284 = vector.extract_strided_slice %80 {offsets = [0, 56], sizes = [16, 456], strides = [1, 1]} : vector<16x512xbf16> to vector<16x456xbf16>
    %285 = vector.extract_strided_slice %80 {offsets = [0, 0], sizes = [16, 56], strides = [1, 1]} : vector<16x512xbf16> to vector<16x56xbf16>
    %286 = tpu.concatenate %284, %285 in 1 : vector<16x456xbf16>, vector<16x56xbf16> -> vector<16x512xbf16>
    %c19 = arith.constant 19 : index
    %c0_131 = arith.constant 0 : index
    %c0_132 = arith.constant 0 : index
    %287 = vector.load %arg8[%c19, %c0_131, %c0_132] : memref<27x1x512xbf16, #tpu.memory_space<vmem>>, vector<1x1x512xbf16>
    %288 = vector.shape_cast %287 : vector<1x1x512xbf16> to vector<1x512xbf16>
    %289 = vector.broadcast %288 : vector<1x512xbf16> to vector<16x512xbf16>
    %290 = arith.mulf %286, %289 : vector<16x512xbf16>
    %c19_133 = arith.constant 19 : index
    %c0_134 = arith.constant 0 : index
    %c0_135 = arith.constant 0 : index
    %291 = vector.load %arg6[%c19_133, %c0_134, %c0_135] : memref<27x16x16xbf16, #tpu.memory_space<vmem>>, vector<1x16x16xbf16>
    %292 = vector.shape_cast %291 : vector<1x16x16xbf16> to vector<16x16xbf16>
    %cst_136 = arith.constant dense<0.000000e+00> : vector<16x512xf32>
    %293 = tpu.matmul %292, %290, %cst_136 {dimension_numbers = #tpu.dot_dimension_numbers<[1], [0], [0], [1], [0, 0, 1, 1], [], []>} : vector<16x16xbf16>, vector<16x512xbf16>, vector<16x512xf32> -> vector<16x512xf32>
    %294 = arith.addf %283, %293 : vector<16x512xf32>
    %295 = vector.extract_strided_slice %80 {offsets = [0, 57], sizes = [16, 455], strides = [1, 1]} : vector<16x512xbf16> to vector<16x455xbf16>
    %296 = vector.extract_strided_slice %80 {offsets = [0, 0], sizes = [16, 57], strides = [1, 1]} : vector<16x512xbf16> to vector<16x57xbf16>
    %297 = tpu.concatenate %295, %296 in 1 : vector<16x455xbf16>, vector<16x57xbf16> -> vector<16x512xbf16>
    %c20 = arith.constant 20 : index
    %c0_137 = arith.constant 0 : index
    %c0_138 = arith.constant 0 : index
    %298 = vector.load %arg8[%c20, %c0_137, %c0_138] : memref<27x1x512xbf16, #tpu.memory_space<vmem>>, vector<1x1x512xbf16>
    %299 = vector.shape_cast %298 : vector<1x1x512xbf16> to vector<1x512xbf16>
    %300 = vector.broadcast %299 : vector<1x512xbf16> to vector<16x512xbf16>
    %301 = arith.mulf %297, %300 : vector<16x512xbf16>
    %c20_139 = arith.constant 20 : index
    %c0_140 = arith.constant 0 : index
    %c0_141 = arith.constant 0 : index
    %302 = vector.load %arg6[%c20_139, %c0_140, %c0_141] : memref<27x16x16xbf16, #tpu.memory_space<vmem>>, vector<1x16x16xbf16>
    %303 = vector.shape_cast %302 : vector<1x16x16xbf16> to vector<16x16xbf16>
    %cst_142 = arith.constant dense<0.000000e+00> : vector<16x512xf32>
    %304 = tpu.matmul %303, %301, %cst_142 {dimension_numbers = #tpu.dot_dimension_numbers<[1], [0], [0], [1], [0, 0, 1, 1], [], []>} : vector<16x16xbf16>, vector<16x512xbf16>, vector<16x512xf32> -> vector<16x512xf32>
    %305 = arith.addf %294, %304 : vector<16x512xf32>
    %306 = vector.extract_strided_slice %80 {offsets = [0, 63], sizes = [16, 449], strides = [1, 1]} : vector<16x512xbf16> to vector<16x449xbf16>
    %307 = vector.extract_strided_slice %80 {offsets = [0, 0], sizes = [16, 63], strides = [1, 1]} : vector<16x512xbf16> to vector<16x63xbf16>
    %308 = tpu.concatenate %306, %307 in 1 : vector<16x449xbf16>, vector<16x63xbf16> -> vector<16x512xbf16>
    %c21 = arith.constant 21 : index
    %c0_143 = arith.constant 0 : index
    %c0_144 = arith.constant 0 : index
    %309 = vector.load %arg8[%c21, %c0_143, %c0_144] : memref<27x1x512xbf16, #tpu.memory_space<vmem>>, vector<1x1x512xbf16>
    %310 = vector.shape_cast %309 : vector<1x1x512xbf16> to vector<1x512xbf16>
    %311 = vector.broadcast %310 : vector<1x512xbf16> to vector<16x512xbf16>
    %312 = arith.mulf %308, %311 : vector<16x512xbf16>
    %c21_145 = arith.constant 21 : index
    %c0_146 = arith.constant 0 : index
    %c0_147 = arith.constant 0 : index
    %313 = vector.load %arg6[%c21_145, %c0_146, %c0_147] : memref<27x16x16xbf16, #tpu.memory_space<vmem>>, vector<1x16x16xbf16>
    %314 = vector.shape_cast %313 : vector<1x16x16xbf16> to vector<16x16xbf16>
    %cst_148 = arith.constant dense<0.000000e+00> : vector<16x512xf32>
    %315 = tpu.matmul %314, %312, %cst_148 {dimension_numbers = #tpu.dot_dimension_numbers<[1], [0], [0], [1], [0, 0, 1, 1], [], []>} : vector<16x16xbf16>, vector<16x512xbf16>, vector<16x512xf32> -> vector<16x512xf32>
    %316 = arith.addf %305, %315 : vector<16x512xf32>
    %317 = vector.extract_strided_slice %80 {offsets = [0, 64], sizes = [16, 448], strides = [1, 1]} : vector<16x512xbf16> to vector<16x448xbf16>
    %318 = vector.extract_strided_slice %80 {offsets = [0, 0], sizes = [16, 64], strides = [1, 1]} : vector<16x512xbf16> to vector<16x64xbf16>
    %319 = tpu.concatenate %317, %318 in 1 : vector<16x448xbf16>, vector<16x64xbf16> -> vector<16x512xbf16>
    %c22 = arith.constant 22 : index
    %c0_149 = arith.constant 0 : index
    %c0_150 = arith.constant 0 : index
    %320 = vector.load %arg8[%c22, %c0_149, %c0_150] : memref<27x1x512xbf16, #tpu.memory_space<vmem>>, vector<1x1x512xbf16>
    %321 = vector.shape_cast %320 : vector<1x1x512xbf16> to vector<1x512xbf16>
    %322 = vector.broadcast %321 : vector<1x512xbf16> to vector<16x512xbf16>
    %323 = arith.mulf %319, %322 : vector<16x512xbf16>
    %c22_151 = arith.constant 22 : index
    %c0_152 = arith.constant 0 : index
    %c0_153 = arith.constant 0 : index
    %324 = vector.load %arg6[%c22_151, %c0_152, %c0_153] : memref<27x16x16xbf16, #tpu.memory_space<vmem>>, vector<1x16x16xbf16>
    %325 = vector.shape_cast %324 : vector<1x16x16xbf16> to vector<16x16xbf16>
    %cst_154 = arith.constant dense<0.000000e+00> : vector<16x512xf32>
    %326 = tpu.matmul %325, %323, %cst_154 {dimension_numbers = #tpu.dot_dimension_numbers<[1], [0], [0], [1], [0, 0, 1, 1], [], []>} : vector<16x16xbf16>, vector<16x512xbf16>, vector<16x512xf32> -> vector<16x512xf32>
    %327 = arith.addf %316, %326 : vector<16x512xf32>
    %328 = vector.extract_strided_slice %80 {offsets = [0, 65], sizes = [16, 447], strides = [1, 1]} : vector<16x512xbf16> to vector<16x447xbf16>
    %329 = vector.extract_strided_slice %80 {offsets = [0, 0], sizes = [16, 65], strides = [1, 1]} : vector<16x512xbf16> to vector<16x65xbf16>
    %330 = tpu.concatenate %328, %329 in 1 : vector<16x447xbf16>, vector<16x65xbf16> -> vector<16x512xbf16>
    %c23 = arith.constant 23 : index
    %c0_155 = arith.constant 0 : index
    %c0_156 = arith.constant 0 : index
    %331 = vector.load %arg8[%c23, %c0_155, %c0_156] : memref<27x1x512xbf16, #tpu.memory_space<vmem>>, vector<1x1x512xbf16>
    %332 = vector.shape_cast %331 : vector<1x1x512xbf16> to vector<1x512xbf16>
    %333 = vector.broadcast %332 : vector<1x512xbf16> to vector<16x512xbf16>
    %334 = arith.mulf %330, %333 : vector<16x512xbf16>
    %c23_157 = arith.constant 23 : index
    %c0_158 = arith.constant 0 : index
    %c0_159 = arith.constant 0 : index
    %335 = vector.load %arg6[%c23_157, %c0_158, %c0_159] : memref<27x16x16xbf16, #tpu.memory_space<vmem>>, vector<1x16x16xbf16>
    %336 = vector.shape_cast %335 : vector<1x16x16xbf16> to vector<16x16xbf16>
    %cst_160 = arith.constant dense<0.000000e+00> : vector<16x512xf32>
    %337 = tpu.matmul %336, %334, %cst_160 {dimension_numbers = #tpu.dot_dimension_numbers<[1], [0], [0], [1], [0, 0, 1, 1], [], []>} : vector<16x16xbf16>, vector<16x512xbf16>, vector<16x512xf32> -> vector<16x512xf32>
    %338 = arith.addf %327, %337 : vector<16x512xf32>
    %339 = vector.extract_strided_slice %80 {offsets = [0, 71], sizes = [16, 441], strides = [1, 1]} : vector<16x512xbf16> to vector<16x441xbf16>
    %340 = vector.extract_strided_slice %80 {offsets = [0, 0], sizes = [16, 71], strides = [1, 1]} : vector<16x512xbf16> to vector<16x71xbf16>
    %341 = tpu.concatenate %339, %340 in 1 : vector<16x441xbf16>, vector<16x71xbf16> -> vector<16x512xbf16>
    %c24 = arith.constant 24 : index
    %c0_161 = arith.constant 0 : index
    %c0_162 = arith.constant 0 : index
    %342 = vector.load %arg8[%c24, %c0_161, %c0_162] : memref<27x1x512xbf16, #tpu.memory_space<vmem>>, vector<1x1x512xbf16>
    %343 = vector.shape_cast %342 : vector<1x1x512xbf16> to vector<1x512xbf16>
    %344 = vector.broadcast %343 : vector<1x512xbf16> to vector<16x512xbf16>
    %345 = arith.mulf %341, %344 : vector<16x512xbf16>
    %c24_163 = arith.constant 24 : index
    %c0_164 = arith.constant 0 : index
    %c0_165 = arith.constant 0 : index
    %346 = vector.load %arg6[%c24_163, %c0_164, %c0_165] : memref<27x16x16xbf16, #tpu.memory_space<vmem>>, vector<1x16x16xbf16>
    %347 = vector.shape_cast %346 : vector<1x16x16xbf16> to vector<16x16xbf16>
    %cst_166 = arith.constant dense<0.000000e+00> : vector<16x512xf32>
    %348 = tpu.matmul %347, %345, %cst_166 {dimension_numbers = #tpu.dot_dimension_numbers<[1], [0], [0], [1], [0, 0, 1, 1], [], []>} : vector<16x16xbf16>, vector<16x512xbf16>, vector<16x512xf32> -> vector<16x512xf32>
    %349 = arith.addf %338, %348 : vector<16x512xf32>
    %350 = vector.extract_strided_slice %80 {offsets = [0, 72], sizes = [16, 440], strides = [1, 1]} : vector<16x512xbf16> to vector<16x440xbf16>
    %351 = vector.extract_strided_slice %80 {offsets = [0, 0], sizes = [16, 72], strides = [1, 1]} : vector<16x512xbf16> to vector<16x72xbf16>
    %352 = tpu.concatenate %350, %351 in 1 : vector<16x440xbf16>, vector<16x72xbf16> -> vector<16x512xbf16>
    %c25 = arith.constant 25 : index
    %c0_167 = arith.constant 0 : index
    %c0_168 = arith.constant 0 : index
    %353 = vector.load %arg8[%c25, %c0_167, %c0_168] : memref<27x1x512xbf16, #tpu.memory_space<vmem>>, vector<1x1x512xbf16>
    %354 = vector.shape_cast %353 : vector<1x1x512xbf16> to vector<1x512xbf16>
    %355 = vector.broadcast %354 : vector<1x512xbf16> to vector<16x512xbf16>
    %356 = arith.mulf %352, %355 : vector<16x512xbf16>
    %c25_169 = arith.constant 25 : index
    %c0_170 = arith.constant 0 : index
    %c0_171 = arith.constant 0 : index
    %357 = vector.load %arg6[%c25_169, %c0_170, %c0_171] : memref<27x16x16xbf16, #tpu.memory_space<vmem>>, vector<1x16x16xbf16>
    %358 = vector.shape_cast %357 : vector<1x16x16xbf16> to vector<16x16xbf16>
    %cst_172 = arith.constant dense<0.000000e+00> : vector<16x512xf32>
    %359 = tpu.matmul %358, %356, %cst_172 {dimension_numbers = #tpu.dot_dimension_numbers<[1], [0], [0], [1], [0, 0, 1, 1], [], []>} : vector<16x16xbf16>, vector<16x512xbf16>, vector<16x512xf32> -> vector<16x512xf32>
    %360 = arith.addf %349, %359 : vector<16x512xf32>
    %361 = vector.extract_strided_slice %80 {offsets = [0, 73], sizes = [16, 439], strides = [1, 1]} : vector<16x512xbf16> to vector<16x439xbf16>
    %362 = vector.extract_strided_slice %80 {offsets = [0, 0], sizes = [16, 73], strides = [1, 1]} : vector<16x512xbf16> to vector<16x73xbf16>
    %363 = tpu.concatenate %361, %362 in 1 : vector<16x439xbf16>, vector<16x73xbf16> -> vector<16x512xbf16>
    %c26 = arith.constant 26 : index
    %c0_173 = arith.constant 0 : index
    %c0_174 = arith.constant 0 : index
    %364 = vector.load %arg8[%c26, %c0_173, %c0_174] : memref<27x1x512xbf16, #tpu.memory_space<vmem>>, vector<1x1x512xbf16>
    %365 = vector.shape_cast %364 : vector<1x1x512xbf16> to vector<1x512xbf16>
    %366 = vector.broadcast %365 : vector<1x512xbf16> to vector<16x512xbf16>
    %367 = arith.mulf %363, %366 : vector<16x512xbf16>
    %c26_175 = arith.constant 26 : index
    %c0_176 = arith.constant 0 : index
    %c0_177 = arith.constant 0 : index
    %368 = vector.load %arg6[%c26_175, %c0_176, %c0_177] : memref<27x16x16xbf16, #tpu.memory_space<vmem>>, vector<1x16x16xbf16>
    %369 = vector.shape_cast %368 : vector<1x16x16xbf16> to vector<16x16xbf16>
    %cst_178 = arith.constant dense<0.000000e+00> : vector<16x512xf32>
    %370 = tpu.matmul %369, %367, %cst_178 {dimension_numbers = #tpu.dot_dimension_numbers<[1], [0], [0], [1], [0, 0, 1, 1], [], []>} : vector<16x16xbf16>, vector<16x512xbf16>, vector<16x512xf32> -> vector<16x512xf32>
    %371 = arith.addf %360, %370 : vector<16x512xf32>
    %cst_179 = arith.constant dense<0.000000e+00> : vector<16xf32>
    %372 = vector.multi_reduction <add>, %371, %cst_179 [1] : vector<16x512xf32> to vector<16xf32>
    %373 = vector.shape_cast %372 : vector<16xf32> to vector<16x1xf32>
    %cst_180 = arith.constant 5.120000e+02 : f32
    %374 = vector.broadcast %cst_180 : f32 to vector<16x1xf32>
    %375 = arith.divf %373, %374 : vector<16x1xf32>
    %376 = vector.broadcast %375 : vector<16x1xf32> to vector<16x512xf32>
    %377 = arith.subf %371, %376 : vector<16x512xf32>
    %378 = arith.mulf %377, %377 : vector<16x512xf32>
    %cst_181 = arith.constant dense<0.000000e+00> : vector<16xf32>
    %379 = vector.multi_reduction <add>, %378, %cst_181 [1] : vector<16x512xf32> to vector<16xf32>
    %380 = vector.shape_cast %379 : vector<16xf32> to vector<16x1xf32>
    %cst_182 = arith.constant 5.120000e+02 : f32
    %381 = vector.broadcast %cst_182 : f32 to vector<16x1xf32>
    %382 = arith.divf %380, %381 : vector<16x1xf32>
    %383 = vector.broadcast %375 : vector<16x1xf32> to vector<16x512xf32>
    %384 = arith.subf %371, %383 : vector<16x512xf32>
    %cst_183 = arith.constant 9.99999974E-6 : f32
    %385 = vector.broadcast %cst_183 : f32 to vector<16x1xf32>
    %386 = arith.addf %382, %385 : vector<16x1xf32>
    %387 = math.rsqrt %386 : vector<16x1xf32>
    %388 = vector.broadcast %387 : vector<16x1xf32> to vector<16x512xf32>
    %389 = arith.mulf %384, %388 : vector<16x512xf32>
    %cst_184 = arith.constant 0.00999999977 : f32
    %390 = vector.broadcast %cst_184 : f32 to vector<16x512xf32>
    %391 = arith.mulf %390, %389 : vector<16x512xf32>
    %392 = arith.maximumf %389, %391 : vector<16x512xf32>
    %393 = arith.truncf %392 : vector<16x512xf32> to vector<16x512xbf16>
    %c0_185 = arith.constant 0 : index
    %c0_186 = arith.constant 0 : index
    %394 = vector.load %arg7[%c0_185, %c0_186] : memref<16x16xbf16, #tpu.memory_space<vmem>>, vector<16x16xbf16>
    %cst_187 = arith.constant dense<0.000000e+00> : vector<16x512xf32>
    %395 = tpu.matmul %394, %393, %cst_187 {dimension_numbers = #tpu.dot_dimension_numbers<[1], [0], [0], [1], [0, 0, 1, 1], [], []>} : vector<16x16xbf16>, vector<16x512xbf16>, vector<16x512xf32> -> vector<16x512xf32>
    %cst_188 = arith.constant dense<0.000000e+00> : vector<16xf32>
    %396 = vector.multi_reduction <add>, %395, %cst_188 [1] : vector<16x512xf32> to vector<16xf32>
    %397 = vector.shape_cast %396 : vector<16xf32> to vector<16x1xf32>
    %cst_189 = arith.constant 5.120000e+02 : f32
    %398 = vector.broadcast %cst_189 : f32 to vector<16x1xf32>
    %399 = arith.divf %397, %398 : vector<16x1xf32>
    %400 = vector.broadcast %399 : vector<16x1xf32> to vector<16x512xf32>
    %401 = arith.subf %395, %400 : vector<16x512xf32>
    %402 = arith.mulf %401, %401 : vector<16x512xf32>
    %cst_190 = arith.constant dense<0.000000e+00> : vector<16xf32>
    %403 = vector.multi_reduction <add>, %402, %cst_190 [1] : vector<16x512xf32> to vector<16xf32>
    %404 = vector.shape_cast %403 : vector<16xf32> to vector<16x1xf32>
    %cst_191 = arith.constant 5.120000e+02 : f32
    %405 = vector.broadcast %cst_191 : f32 to vector<16x1xf32>
    %406 = arith.divf %404, %405 : vector<16x1xf32>
    %407 = vector.broadcast %399 : vector<16x1xf32> to vector<16x512xf32>
    %408 = arith.subf %395, %407 : vector<16x512xf32>
    %cst_192 = arith.constant 9.99999974E-6 : f32
    %409 = vector.broadcast %cst_192 : f32 to vector<16x1xf32>
    %410 = arith.addf %406, %409 : vector<16x1xf32>
    %411 = math.rsqrt %410 : vector<16x1xf32>
    %412 = vector.broadcast %411 : vector<16x1xf32> to vector<16x512xf32>
    %413 = arith.mulf %408, %412 : vector<16x512xf32>
    %414 = arith.addf %413, %55 : vector<16x512xf32>
    %cst_193 = arith.constant 0.00999999977 : f32
    %415 = vector.broadcast %cst_193 : f32 to vector<16x512xf32>
    %416 = arith.mulf %415, %414 : vector<16x512xf32>
    %417 = arith.maximumf %414, %416 : vector<16x512xf32>
    %c0_194 = arith.constant 0 : index
    %c0_195 = arith.constant 0 : index
    %c0_196 = arith.constant 0 : index
    %418 = vector.load %arg9[%c0_194, %c0_195, %c0_196] : memref<1x16x512xf32, #tpu.memory_space<vmem>>, vector<1x16x512xf32>
    %419 = vector.shape_cast %418 : vector<1x16x512xf32> to vector<16x512xf32>
    %420 = vector.shape_cast %417 : vector<16x512xf32> to vector<1x16x512xf32>
    tpu.vector_store %arg9[%c0_194, %c0_195, %c0_196], %420 {strides = array<i32>} : memref<1x16x512xf32, #tpu.memory_space<vmem>>, vector<1x16x512xf32>,
    return
  }
  func.func @transform_0(%arg0: i32) -> (i32, i32, i32) {
    %c0_i32 = arith.constant 0 : i32
    %c0_i32_0 = arith.constant 0 : i32
    %c0_i32_1 = arith.constant 0 : i32
    return %arg0, %c0_i32, %c0_i32_0 : i32, i32, i32
  }
  func.func @transform_1(%arg0: i32) -> (i32, i32, i32) {
    %c0_i32 = arith.constant 0 : i32
    %c0_i32_0 = arith.constant 0 : i32
    %c0_i32_1 = arith.constant 0 : i32
    return %arg0, %c0_i32, %c0_i32_0 : i32, i32, i32
  }
  func.func @transform_2(%arg0: i32) -> (i32, i32) {
    %c0_i32 = arith.constant 0 : i32
    %c0_i32_0 = arith.constant 0 : i32
    %c0_i32_1 = arith.constant 0 : i32
    return %c0_i32, %c0_i32_0 : i32, i32
  }
  func.func @transform_3(%arg0: i32) -> (i32, i32) {
    %c0_i32 = arith.constant 0 : i32
    %c0_i32_0 = arith.constant 0 : i32
    %c0_i32_1 = arith.constant 0 : i32
    return %c0_i32, %c0_i32_0 : i32, i32
  }
  func.func @transform_4(%arg0: i32) -> (i32, i32) {
    %c0_i32 = arith.constant 0 : i32
    %c0_i32_0 = arith.constant 0 : i32
    %c0_i32_1 = arith.constant 0 : i32
    return %c0_i32, %c0_i32_0 : i32, i32
  }
  func.func @transform_5(%arg0: i32) -> (i32, i32, i32) {
    %c0_i32 = arith.constant 0 : i32
    %c0_i32_0 = arith.constant 0 : i32
    %c0_i32_1 = arith.constant 0 : i32
    %c0_i32_2 = arith.constant 0 : i32
    return %c0_i32, %c0_i32_0, %c0_i32_1 : i32, i32, i32
  }
  func.func @transform_6(%arg0: i32) -> (i32, i32) {
    %c0_i32 = arith.constant 0 : i32
    %c0_i32_0 = arith.constant 0 : i32
    %c0_i32_1 = arith.constant 0 : i32
    return %c0_i32, %c0_i32_0 : i32, i32
  }
  func.func @transform_7(%arg0: i32) -> (i32, i32, i32) {
    %c0_i32 = arith.constant 0 : i32
    %c0_i32_0 = arith.constant 0 : i32
    %c0_i32_1 = arith.constant 0 : i32
    %c0_i32_2 = arith.constant 0 : i32
    return %c0_i32, %c0_i32_0, %c0_i32_1 : i32, i32, i32
  }
  func.func @transform_8(%arg0: i32) -> (i32, i32, i32) {
    %c0_i32 = arith.constant 0 : i32
    %c0_i32_0 = arith.constant 0 : i32
    %c0_i32_1 = arith.constant 0 : i32
    return %arg0, %c0_i32, %c0_i32_0 : i32, i32, i32
  }
}

</mosaic_0001>

<bundles_post_ra>
// kernel: up_forward.1
= control target key start
LH: loop header
LB: loop body
LE: loop exit
PB: predicated region body
PF: predicated region fallthrough
CT: control target
= control target key end

     0   :  { %s8752_s27 = smov 0   ;;  %s11757_s0 = inlined_call_operand.vmem [shape: f32[2,32,64], index: 0, kind: input, shape index: {}]   ;;  %s11758_s1 = inlined_call_operand.vmem [shape: f32[2,16,512], index: 1, kind: input, shape index: {}]   ;;  %s11759_s2 = inlined_call_operand.vmem [shape: bf16[32,128], index: 2, kind: input, shape index: {}]   ;;  %s11760_s3 = inlined_call_operand.vmem [shape: f32[16,1], index: 3, kind: input, shape index: {}]   ;;  %s11761_s4 = inlined_call_operand.vmem [shape: bf16[16,16], index: 4, kind: input, shape index: {}]   ;;  %s11762_s5 = inlined_call_operand.vmem [shape: bf16[27,16,16], index: 5, kind: input, shape index: {}]   ;;  %s11763_s6 = inlined_call_operand.vmem [shape: bf16[16,16], index: 6, kind: input, shape index: {}]   ;;  %s11764_s7 = inlined_call_operand.vmem [shape: bf16[27,1,512], index: 7, kind: input, shape index: {}]   ;;  %s11765_s8 = inlined_call_operand.vmem [shape: f32[2,16,512], index: 8, kind: output, shape index: {}]  }
   0x1 LB: > { %s8372_s28 = sadd.s32 4294967295, %s8683_s27   ;;  %p8376_p0 = scmp.ge.s32.totalorder %s8683_s27, 1  ;;  %s8683_s27 = sphi %s8752_s27, %s18_s27  }
   0x2   : > { %p272_p1 = scmp.lt.s32.totalorder %s8683_s27, 3 }
   0x4   : > { %p273_p2 = pnand %p8376_p0, %p272_p1 }
   0x6   : > { %276 = sbr.rel (%p273_p2) target bundleno = 3007 (0xbbf), region = 52 }
   0xb   : > { %v3148_v0 = vld [vmem:[%s11760_s3] sm:$0xff]  ;;  %v8634_v1 = vld [vmem:[%s11759_s2 + $0x8] sm:$0xff]   ;;  %v11766_v2 = vmov 0   ;;  %p311_p3 = scmp.lt.s32.totalorder %s8372_s28, 1  ;;  %vm365_vm0 = vcmask 261120   ;;  %v455_v18 = vlaneseq  ;;  %s8687_s19 = smov 112  }
   0xc   : > { %8632 = vset.pattern.permute.xlu0 %v11766_v2  ;;  %8633 = vset.pattern.permute.xlu1 %v11766_v2  ;;  %v8635_v3 = vld [vmem:[%s11759_s2] sm:$0xff]   ;;  %v3149_v4 = vld [vmem:[%s11760_s3 + $0x8] sm:$0xff]  ;;  %v8686_v16 = vmov 1966171168   ;;  %vm1355_vm1 = vcmask 1040384   ;;  %s8689_s20 = smov 96  }
   0xd   : > { %3152 = vperm.xlu0 %8632, %v3148_v0   ;;  %8590 = vmatprep.subr.bf16.mxu0 %v8634_v1  ;;  %s12268_s28 = smov (!%p311_p3, %s8372_s28), 1  ;;  %v453_v17 = vunpack.c.l.s4 %v8686_v16  ;;  %v8784_v20 = vshrl.u32 %v455_v18, 7  ;;  %s8690_s21 = smov 64   ;;  %vm3195_vm2 = vcmask 130048   ;;  %vm3450_vm3 = vcmask 588800  }
   0xe   : > { %8591 = vmatpush3.bf16.msra.mxu0 %v8634_v1  ;;  %3231 = vmatprep.mubr.bf16.mxu1 %v11766_v2  ;;  %s8581_s13 = sshll.u32 %s12268_s28, 5  ;;  %s8582_s22 = sshll.u32 %s12268_s28, 6  ;;  %vm3370_vm4 = vcmask 596992   ;;  %vm3720_vm5 = vcmask 580608   ;;  %vm3904_vm6 = vcmask 531456   ;;  %vm4088_vm7 = vcmask 523264  }
   0xf   : > { %8592 = vmatprep.subr.bf16.mxu0 %v8635_v3  ;;  %3157 = vperm.xlu1 %8633, %v3149_v4   ;;  %s315_s18 = scalar_lea.vmem %s11757_s0, %s8581_s13  ;;  %v454_v19 = vunpack.c.0.s8 %v453_v17  ;;  %v8794_v27 = vsub.s32 0, %v8784_v20  ;;  %s10721_s25 = scalar_lea.vmem %s11758_s1, %s8582_s22  ;;  %vm4272_vm8 = vcmask 515072   ;;  %vm4456_vm9 = vcmask 465920  }
  0x10   : > { %v327_v5 = vld [vmem:[%s315_s18] sm:$0xff]  ;;  %v328_v6 = vld [vmem:[%s315_s18 + $0x8] sm:$0xff]  ;;  %v329_v8 = vld [vmem:[%s315_s18 + $0x10] sm:$0xff]  ;;  %s8691_s30 = smov 72   ;;  %s8692_s9 = smov 73   ;;  %vm4640_vm10 = vcmask 457728  }
  0x11   : > { %v331_v7 = vpack.c.bf16 %v328_v6, %v327_v5  ;;  %v330_v9 = vld [vmem:[%s315_s18 + $0x18] sm:$0xff]  ;;  %v8787_v21 = vsub.s32 %v454_v19, %v8784_v20  ;;  %11885 = vst [vmem:[#allocation4_spill] sm:$0xff] %v8794_v27  ;;  %s8693_s10 = smov 71   ;;  %s8694_s11 = smov 65   ;;  %vm4824_vm11 = vcmask 449536   ;;  %vm5008_vm12 = vcmask 72704  }
  0x12   : > { %8593 = vmatpush3.bf16.msra.mxu0 %v8635_v3  ;;  %v332_v10 = vpack.c.bf16 %v330_v9, %v329_v8  ;;  %s8695_s12 = smov 63   ;;  %s8696_s13 = smov 57   ;;  %vm5192_vm13 = vcmask 64512   ;;  %vm5376_vm14 = vcmask 56320   ;;  %vm5560_vm15 = vcmask 7168  }
  0x13   : > { %11884 = vst [vmem:[#allocation3_spill] sm:$0xff] %v8787_v21  ;;  %s8697_s14 = smov 56   ;;  %s8698_s15 = smov 55  }
  0x14   : > { %s8699_s16 = smov 9   ;;  %s8700_s17 = smov 8  }
  0x15   : > { %s8701_s18 = smov 7   ;;  %s8703_s23 = smov 127  }
  0x16   : > { %s8704_s24 = smov 121   ;;  %s8705_s29 = smov 120  }
  0x2b   : > { %337 = vxpose.xlu0.c.b16.start [1/2] (short) (narrow) %v331_v7, 64 }
  0x2f   : > { %338 = vxpose.xlu0.c.b16.end [2/2] (short) (narrow) %v332_v10, 64 }
  0x88   : > { %v8781_v11 = vpop.permute.xlu0 %3152 }
  0x89   : > { %11883 = vst [vmem:[#allocation2_spill] sm:$0xff] %v8781_v11 }
  0x8d   : > { %v345_v12 = vpop.trf.xlu0 }
  0x8e   : > { %8594 = vmatprep.mubr.msk.bf16.mxu0 %vm365_vm0, %v345_v12 }
  0x91   : > { %v346_v13 = vpop.trf.xlu0 }
  0x92   : > { %8595 = vmatmul.mubr.msk.bf16.vlgmr.msra.gmra.mxu0 %vm365_vm0, %v346_v13 }
  0x95   : > { %v347_v14 = vpop.trf.xlu0 }
  0x96   : > { %8598 = vmatprep.mubr.msk.bf16.mxu0 %vm365_vm0, %v347_v14 }
  0x99   : > { %v348_v15 = vpop.trf.xlu0 }
  0x9a   : > { %8599 = vmatmul.mubr.msk.bf16.gmra.mxu0 %vm365_vm0, %v348_v15  ;;  %vm5849_vm0 = vcmask 1039360  }
  0x9b   : > { %3607 = vmatprep.mubr.bf16.mxu0 %v11766_v2 }
 0x152   : > { %v8596_v22 = vpop.f32.mrf.mxu0 }
 0x153   : > { %v556_v23 = vrot.slane %v8596_v22, %v8787_v21  ;;  %v549_v24 = vcombine.high %v8596_v22, %v8596_v22 }
 0x154   : > { %v412_v28 = vpop.f32.mrf.mxu0 }
 0x155   : > { %v564_v25 = vcombine.high %v556_v23, %v556_v23  ;;  %v8791_v26 = vrot.slane %v556_v23, %v8787_v21  ;;  %v563_v29 = vrot.slane %v549_v24, %v8787_v21  ;;  %v458_v31 = vrot.slane %v412_v28, %v8787_v21 }
 0x156   : > { %v451_v35 = vcombine.high %v412_v28, %v412_v28  ;;  %v8597_v43 = vpop.f32.mrf.mxu0 }
 0x157   : > { %v8798_v30 = vrot.slane %v564_v25, %v8787_v21  ;;  %v974_v32 = vrot.slane %v8791_v26, %v8794_v27  ;;  %v8805_v33 = vcombine.high %v8791_v26, %v8791_v26  ;;  %v8809_v34 = vrot.slane %v563_v29, %v8787_v21 }
 0x158   : > { %v8814_v37 = vrot.slane %v458_v31, %v8787_v21  ;;  %v465_v39 = vrot.slane %v451_v35, %v8787_v21  ;;  %v466_v42 = vcombine.high %v458_v31, %v458_v31  ;;  %v605_v47 = vrot.slane %v8597_v43, %v8787_v21  ;;  %v415_v59 = vpop.f32.mrf.mxu0 }
 0x159   : > { %1195 = vrot.lane.b32.xlu1 %v974_v32, %s8687_s19  ;;  %v982_v36 = vrot.slane %v8805_v33, %v8794_v27  ;;  %v978_v38 = vrot.slane %v8798_v30, %v8794_v27  ;;  %v990_v40 = vrot.slane %v8809_v34, %v8794_v27  ;;  %v8825_v41 = vcombine.high %v8809_v34, %v8809_v34 }
 0x15a   : > { %v910_v44 = vrot.slane %v8814_v37, %v8794_v27  ;;  %v8831_v45 = vcombine.high %v8798_v30, %v8798_v30  ;;  %v8836_v46 = vrot.slane %v465_v39, %v8787_v21  ;;  %v8842_v49 = vrot.slane %v466_v42, %v8787_v21  ;;  %v8600_v4 = vpop.f32.mrf.mxu0 }
 0x15b   : > { %1199 = vrot.lane.b32.xlu0 %v982_v36, %s8687_s19  ;;  %v998_v48 = vrot.slane %v8825_v41, %v8794_v27  ;;  %v8849_v51 = vrot.slane %v605_v47, %v8787_v21  ;;  %v565_v53 = vcombine.high %v563_v29, %v563_v29  ;;  %v8857_v55 = vcombine.high %v8814_v37, %v8814_v37 }
 0x15c   : > { %v986_v50 = vrot.slane %v8831_v45, %v8794_v27  ;;  %v926_v52 = vrot.slane %v8836_v46, %v8794_v27  ;;  %v914_v54 = vrot.slane %v8842_v49, %v8794_v27  ;;  %v8865_v57 = vcombine.high %v8836_v46, %v8836_v46 }
 0x15d   : > { %1197 = vrot.lane.b32.xlu1 %v978_v38, %s8687_s19  ;;  %v1006_v56 = vrot.slane %v8849_v51, %v8794_v27  ;;  %v8868_v58 = vrot.slane %v565_v53, %v8787_v21  ;;  %v918_v60 = vrot.slane %v8857_v55, %v8794_v27  ;;  %v598_v61 = vcombine.high %v8597_v43, %v8597_v43 }
 0x15e   : > { %v507_v62 = vrot.slane %v415_v59, %v8787_v21  ;;  %v934_v63 = vrot.slane %v8865_v57, %v8794_v27  ;;  %v8879_v0 = vcombine.high %v8849_v51, %v8849_v51  ;;  %v8885_v3 = vcombine.high %v8842_v49, %v8842_v49 }
 0x15f   : > { %1203 = vrot.lane.b32.xlu0 %v990_v40, %s8687_s19  ;;  %v994_v1 = vrot.slane %v8868_v58, %v8794_v27  ;;  %v612_v5 = vrot.slane %v598_v61, %v8787_v21  ;;  %v467_v8 = vcombine.high %v465_v39, %v465_v39  ;;  %v8899_v10 = vcombine.high %v8868_v58, %v8868_v58 }
 0x160   : > { %v8891_v6 = vrot.slane %v507_v62, %v8787_v21  ;;  %v1014_v7 = vrot.slane %v8879_v0, %v8794_v27  ;;  %v922_v9 = vrot.slane %v8885_v3, %v8794_v27  ;;  %v752_v12 = vrot.slane %v8600_v4, %v8787_v21 }
 0x161   : > { %1163 = vrot.lane.b32.xlu1 %v910_v44, %s8687_s19  ;;  %v8905_v13 = vrot.slane %v612_v5, %v8787_v21  ;;  %v8910_v15 = vrot.slane %v467_v8, %v8787_v21  ;;  %v613_v16 = vcombine.high %v605_v47, %v605_v47  ;;  %v1002_v17 = vrot.slane %v8899_v10, %v8794_v27 }
 0x162   : > { %v942_v14 = vrot.slane %v8891_v6, %v8794_v27  ;;  %v8916_v18 = vrot.slane %v752_v12, %v8787_v21  ;;  %v500_v25 = vcombine.high %v415_v59, %v415_v59  ;;  %v8932_v28 = vcombine.high %v8891_v6, %v8891_v6 }
 0x163   : > { %1207 = vrot.lane.b32.xlu0 %v998_v48, %s8687_s19  ;;  %v1022_v19 = vrot.slane %v8905_v13, %v8794_v27  ;;  %v8922_v22 = vrot.slane %v613_v16, %v8787_v21  ;;  %v930_v23 = vrot.slane %v8910_v15, %v8794_v27  ;;  %v8938_v31 = vcombine.high %v8910_v15, %v8910_v15  ;;  %v428_v48 = vpop.f32.mrf.mxu0 }
 0x164   : > { %v1102_v24 = vrot.slane %v8916_v18, %v8794_v27  ;;  %v514_v32 = vrot.slane %v500_v25, %v8787_v21  ;;  %v950_v35 = vrot.slane %v8932_v28, %v8794_v27  ;;  %v8947_v36 = vcombine.high %v8905_v13, %v8905_v13 }
 0x165   : > { %1201 = vrot.lane.b32.xlu1 %v986_v50, %s8687_s19  ;;  %v1010_v29 = vrot.slane %v8922_v22, %v8794_v27  ;;  %v515_v38 = vcombine.high %v507_v62, %v507_v62  ;;  %v938_v39 = vrot.slane %v8938_v31, %v8794_v27  ;;  %v8953_v40 = vcombine.high %v8922_v22, %v8922_v22 }
 0x166   : > { %v8958_v42 = vrot.slane %v514_v32, %v8787_v21  ;;  %v1030_v43 = vrot.slane %v8947_v36, %v8794_v27  ;;  %v614_v44 = vcombine.high %v612_v5, %v612_v5  ;;  %v8971_v53 = vcombine.high %v8916_v18, %v8916_v18 }
 0x167   : > { %1171 = vrot.lane.b32.xlu0 %v926_v52, %s8687_s19  ;;  %v8963_v47 = vrot.slane %v515_v38, %v8787_v21  ;;  %v1018_v50 = vrot.slane %v8953_v40, %v8794_v27  ;;  %v654_v52 = vrot.slane %v428_v48, %v8787_v21 }
 0x168   : > { %v958_v59 = vrot.slane %v8958_v42, %v8794_v27  ;;  %v9013_v16 = vcombine.high %v8958_v42, %v8958_v42 }
 0x169   : > { %1165 = vrot.lane.b32.xlu1 %v914_v54, %s8687_s19  ;;  %v760_v54 = vcombine.high %v752_v12, %v752_v12  ;;  %v946_v61 = vrot.slane %v8963_v47, %v8794_v27  ;;  %v8982_v62 = vrot.slane %v654_v52, %v8787_v21  ;;  %v9005_v12 = vcombine.high %v8963_v47, %v8963_v47 }
 0x16a   : > { %v966_v25 = vrot.slane %v9013_v16, %v8794_v27 }
 0x16b   : > { %1211 = vrot.lane.b32.xlu0 %v1006_v56, %s8687_s19  ;;  %v745_v56 = vcombine.high %v8600_v4, %v8600_v4 }
 0x16d   : > { %1167 = vrot.lane.b32.xlu1 %v918_v60, %s8687_s19  ;;  %v8977_v60 = vrot.slane %v614_v44, %v8787_v21  ;;  %v759_v4 = vrot.slane %v745_v56, %v8787_v21  ;;  %v662_v44 = vcombine.high %v654_v52, %v654_v52 }
 0x16f   : > { %1175 = vrot.lane.b32.xlu0 %v934_v63, %s8687_s19  ;;  %v1110_v63 = vrot.slane %v8971_v53, %v8794_v27  ;;  %v1026_v5 = vrot.slane %v8977_v60, %v8794_v27 }
 0x171   : > { %1205 = vrot.lane.b32.xlu1 %v994_v1, %s8687_s19  ;;  %v8988_v1 = vrot.slane %v760_v54, %v8787_v21  ;;  %v8601_v54 = vpop.f32.mrf.mxu0 }
 0x173   : > { %1215 = vrot.lane.b32.xlu0 %v1014_v7, %s8687_s19  ;;  %v1038_v7 = vrot.slane %v8982_v62, %v8794_v27  ;;  %v1106_v8 = vrot.slane %v8988_v1, %v8794_v27 }
 0x175   : > { %1169 = vrot.lane.b32.xlu1 %v922_v9, %s8687_s19  ;;  %v9001_v9 = vrot.slane %v759_v4, %v8787_v21 }
 0x177   : > { %1179 = vrot.lane.b32.xlu0 %v942_v14, %s8687_s19  ;;  %v1118_v14 = vrot.slane %v9001_v9, %v8794_v27 }
 0x179   : > { %1209 = vrot.lane.b32.xlu1 %v1002_v17, %s8687_s19  ;;  %v516_v17 = vcombine.high %v514_v32, %v514_v32 }
 0x17b   : > { %1219 = vrot.lane.b32.xlu0 %v1022_v19, %s8687_s19  ;;  %v954_v19 = vrot.slane %v9005_v12, %v8794_v27 }
 0x17d   : > { %1173 = vrot.lane.b32.xlu1 %v930_v23, %s8687_s19  ;;  %v9019_v23 = vcombine.high %v8977_v60, %v8977_v60 }
 0x17f   : > { %1259 = vrot.lane.b32.xlu0 %v1102_v24, %s8687_s19  ;;  %v647_v24 = vcombine.high %v428_v48, %v428_v48  ;;  %v1034_v32 = vrot.slane %v9019_v23, %v8794_v27 }
 0x181   : > { %1213 = vrot.lane.b32.xlu1 %v1010_v29, %s8687_s19  ;;  %v9027_v29 = vcombine.high %v8982_v62, %v8982_v62  ;;  %v661_v38 = vrot.slane %v647_v24, %v8787_v21  ;;  %v431_v24 = vpop.f32.mrf.mxu0 }
 0x183   : > { %1183 = vrot.lane.b32.xlu0 %v950_v35, %s8687_s19  ;;  %v9032_v35 = vrot.slane %v516_v17, %v8787_v21  ;;  %v9052_v56 = vrot.slane %v661_v38, %v8787_v21 }
 0x185   : > { %1177 = vrot.lane.b32.xlu1 %v938_v39, %s8687_s19  ;;  %v1046_v39 = vrot.slane %v9027_v29, %v8794_v27  ;;  %v962_v48 = vrot.slane %v9032_v35, %v8794_v27 }
 0x187   : > { %1223 = vrot.lane.b32.xlu0 %v1030_v43, %s8687_s19  ;;  %v9041_v43 = vcombine.high %v9001_v9, %v9001_v9 }
 0x189   : > { %1217 = vrot.lane.b32.xlu1 %v1018_v50, %s8687_s19  ;;  %v9047_v50 = vcombine.high %v8988_v1, %v8988_v1  ;;  %v1126_v52 = vrot.slane %v9041_v43, %v8794_v27 }
 0x18b   : > { %1187 = vrot.lane.b32.xlu0 %v958_v59, %s8687_s19  ;;  %v801_v59 = vrot.slane %v8601_v54, %v8787_v21 }
 0x18d   : > { %1181 = vrot.lane.b32.xlu1 %v946_v61, %s8687_s19  ;;  %v761_v61 = vcombine.high %v759_v4, %v759_v4 }
 0x18f   : > { %1263 = vrot.lane.b32.xlu0 %v1110_v63, %s8687_s19  ;;  %v9058_v63 = vrot.slane %v662_v44, %v8787_v21  ;;  %v703_v44 = vrot.slane %v431_v24, %v8787_v21 }
 0x191   : > { %1221 = vrot.lane.b32.xlu1 %v1026_v5, %s8687_s19  ;;  %v1114_v5 = vrot.slane %v9047_v50, %v8794_v27  ;;  %v1042_v4 = vrot.slane %v9058_v63, %v8794_v27 }
 0x193   : > { %1227 = vrot.lane.b32.xlu0 %v1038_v7, %s8687_s19  ;;  %v9065_v7 = vrot.slane %v801_v59, %v8787_v21 }
 0x195   : > { %1261 = vrot.lane.b32.xlu1 %v1106_v8, %s8687_s19  ;;  %v1054_v8 = vrot.slane %v9052_v56, %v8794_v27  ;;  %v1134_v17 = vrot.slane %v9065_v7, %v8794_v27 }
 0x197   : > { %1267 = vrot.lane.b32.xlu0 %v1118_v14, %s8687_s19  ;;  %v9070_v14 = vrot.slane %v761_v61, %v8787_v21 }
 0x199   : > { %1185 = vrot.lane.b32.xlu1 %v954_v19, %s8687_s19  ;;  %v9080_v19 = vcombine.high %v9052_v56, %v9052_v56  ;;  %v9115_v2 = vcombine.high %v9070_v14, %v9070_v14 }
 0x19b   : > { %1191 = vrot.lane.b32.xlu0 %v966_v25, %s8687_s19  ;;  %11886 = vst [vmem:[#allocation5_spill] sm:$0xff] %v9080_v19  ;;  %v1122_v25 = vrot.slane %v9070_v14, %v8794_v27  ;;  %v1130_v11 = vrot.slane %v9115_v2, %v8794_v27 }
 0x19d   : > { %1225 = vrot.lane.b32.xlu1 %v1034_v32, %s8687_s19  ;;  %v9086_v32 = vcombine.high %v9032_v35, %v9032_v35 }
 0x19f   : > { %1231 = vrot.lane.b32.xlu0 %v1046_v39, %s8687_s19  ;;  %v794_v39 = vcombine.high %v8601_v54, %v8601_v54  ;;  %v970_v61 = vrot.slane %v9086_v32, %v8794_v27 }
 0x1a1   : > { %1189 = vrot.lane.b32.xlu1 %v962_v48, %s8687_s19  ;;  %v1062_v48 = vrot.slane %v9080_v19, %v8794_v27  ;;  %v808_v54 = vrot.slane %v794_v39, %v8787_v21 }
 0x1a3   : > { %1271 = vrot.lane.b32.xlu0 %v1126_v52, %s8687_s19  ;;  %v9095_v52 = vcombine.high %v9065_v7, %v9065_v7  ;;  %v9120_v39 = vrot.slane %v808_v54, %v8787_v21 }
 0x1a5   : > { %1265 = vrot.lane.b32.xlu1 %v1114_v5, %s8687_s19  ;;  %11887 = vst [vmem:[#allocation6_spill] sm:$0xff] %v9095_v52  ;;  %v9101_v5 = vcombine.high %v9058_v63, %v9058_v63  ;;  %11889 = vst [vmem:[#allocation8_spill] sm:$0xff] %v9120_v39 }
 0x1a7   : > { %1235 = vrot.lane.b32.xlu0 %v1054_v8, %s8687_s19  ;;  %v9107_v8 = vrot.slane %v703_v44, %v8787_v21 }
 0x1a9   : > { %1229 = vrot.lane.b32.xlu1 %v1042_v4, %s8687_s19  ;;  %11888 = vst [vmem:[#allocation7_spill] sm:$0xff] %v9107_v8  ;;  %v1142_v4 = vrot.slane %v9095_v52, %v8794_v27  ;;  %v9135_v52 = vcombine.high %v9107_v8, %v9107_v8 }
 0x1ab   : > { %1275 = vrot.lane.b32.xlu0 %v1134_v17, %s8687_s19  ;;  %v663_v17 = vcombine.high %v661_v38, %v661_v38  ;;  %v809_v38 = vcombine.high %v801_v59, %v801_v59  ;;  %11891 = vst [vmem:[#allocation10_spill] sm:$0xff] %v9135_v52 }
 0x1ad   : > { %1269 = vrot.lane.b32.xlu1 %v1122_v25, %s8687_s19  ;;  %v1050_v25 = vrot.slane %v9101_v5, %v8794_v27  ;;  %v9138_v19 = vrot.slane %v809_v38, %v8787_v21 }
 0x1af   : > { %1239 = vrot.lane.b32.xlu0 %v1062_v48, %s8687_s19  ;;  %v1070_v48 = vrot.slane %v9107_v8, %v8794_v27  ;;  %11892 = vst [vmem:[#allocation11_spill] sm:$0xff] %v9138_v19 }
 0x1b1   : > { %1193 = vrot.lane.b32.xlu1 %v970_v61, %s8687_s19  ;;  %v9125_v61 = vrot.slane %v663_v17, %v8787_v21  ;;  %v9149_v17 = vcombine.high %v9120_v39, %v9120_v39 }
 0x1b3   : > { %1279 = vrot.lane.b32.xlu0 %v1142_v4, %s8687_s19  ;;  %11890 = vst [vmem:[#allocation9_spill] sm:$0xff] %v9125_v61  ;;  %v696_v4 = vcombine.high %v431_v24, %v431_v24  ;;  %v1058_v59 = vrot.slane %v9125_v61, %v8794_v27  ;;  %v1078_v24 = vrot.slane %v9135_v52, %v8794_v27  ;;  %11893 = vst [vmem:[#allocation12_spill] sm:$0xff] %v9149_v17 }
 0x1b4   : > { %v9155_v38 = vcombine.high %v9125_v61, %v9125_v61 }
 0x1b5   : > { %1233 = vrot.lane.b32.xlu1 %v1050_v25, %s8687_s19  ;;  %v1150_v25 = vrot.slane %v9120_v39, %v8794_v27  ;;  %v9168_v39 = vcombine.high %v9138_v19, %v9138_v19 }
 0x1b6   : > { %11894 = vst [vmem:[#allocation13_spill] sm:$0xff] %v9155_v38  ;;  %v1066_v52 = vrot.slane %v9155_v38, %v8794_v27 }
 0x1b7   : > { %1243 = vrot.lane.b32.xlu0 %v1070_v48, %s8687_s19  ;;  %v1138_v48 = vrot.slane %v9138_v19, %v8794_v27  ;;  %11896 = vst [vmem:[#allocation15_spill] sm:$0xff] %v9168_v39  ;;  %v1146_v8 = vrot.slane %v9168_v39, %v8794_v27 }
 0x1b9   : > { %1273 = vrot.lane.b32.xlu1 %v1130_v11, %s8687_s19  ;;  %v710_v11 = vrot.slane %v696_v4, %v8787_v21 }
 0x1bb   : > { %1283 = vrot.lane.b32.xlu0 %v1150_v25, %s8687_s19  ;;  %v9160_v4 = vrot.slane %v710_v11, %v8787_v21  ;;  %v1158_v25 = vrot.slane %v9149_v17, %v8794_v27 }
 0x1bd   : > { %1237 = vrot.lane.b32.xlu1 %v1058_v59, %s8687_s19  ;;  %11895 = vst [vmem:[#allocation14_spill] sm:$0xff] %v9160_v4  ;;  %v711_v59 = vcombine.high %v703_v44, %v703_v44  ;;  %v9178_v17 = vcombine.high %v9160_v4, %v9160_v4  ;;  %v810_v44 = vcombine.high %v808_v54, %v808_v54 }
 0x1bf   : > { %1247 = vrot.lane.b32.xlu0 %v1078_v24, %s8687_s19  ;;  %v9172_v24 = vpop.permute.xlu1 %3157  ;;  %11898 = vst [vmem:[#allocation17_spill] sm:$0xff] %v9178_v17  ;;  %v9181_v38 = vrot.slane %v711_v59, %v8787_v21 }
 0x1c0   : > { %11897 = vst [vmem:[#allocation16_spill] sm:$0xff] %v9172_v24 }
 0x1c1   : > { %1277 = vrot.lane.b32.xlu1 %v1138_v48, %s8687_s19  ;;  %v1086_v48 = vrot.slane %v9160_v4, %v8794_v27  ;;  %11899 = vst [vmem:[#allocation18_spill] sm:$0xff] %v9181_v38  ;;  %v1074_v54 = vrot.slane %v9181_v38, %v8794_v27  ;;  %v8688_v4 = vmov 1983009808  }
 0x1c3   : > { %1287 = vrot.lane.b32.xlu0 %v1158_v25, %s8687_s19  ;;  %v9190_v25 = vrot.slane %v810_v44, %v8787_v21 }
 0x1c5   : > { %1241 = vrot.lane.b32.xlu1 %v1066_v52, %s8687_s19  ;;  %v1094_v52 = vrot.slane %v9178_v17, %v8794_v27  ;;  %v1154_v44 = vrot.slane %v9190_v25, %v8794_v27  ;;  %v9202_v17 = vcombine.high %v9181_v38, %v9181_v38  ;;  %v9212_v38 = vcombine.high %v9190_v25, %v9190_v25 }
 0x1c7   : > { %1251 = vrot.lane.b32.xlu0 %v1086_v48, %s8687_s19  ;;  %v1871_v48 = vunpack.c.l.s4 %v8688_v4  ;;  %11900 = vst [vmem:[#allocation19_spill] sm:$0xff] %v9202_v17 }
 0x1c9   : > { %1281 = vrot.lane.b32.xlu1 %v1146_v8, %s8687_s19  ;;  %v1872_v61 = vunpack.c.0.s8 %v1871_v48 }
 0x1cb   : > { %v1196_v24 = vpop.permute.xlu1 %1195  ;;  %1255 = vrot.lane.b32.xlu0 %v1094_v52, %s8687_s19 }
 0x1cc   : > { %v1372_v8 = vsel %vm1355_vm1, %v8791_v26, %v1196_v24  ;;  %v1082_v24 = vrot.slane %v9202_v17, %v8794_v27  ;;  %v1162_v17 = vrot.slane %v9212_v38, %v8794_v27 }
 0x1cd   : > { %1245 = vrot.lane.b32.xlu1 %v1074_v54, %s8687_s19  ;;  %v1200_v59 = vpop.permute.xlu0 %1199  ;;  %v712_v54 = vcombine.high %v710_v11, %v710_v11  ;;  %v9220_v11 = vsub.s32 %v1872_v61, %v8784_v20 }
 0x1cf   : > { %v1198_v39 = vpop.permute.xlu1 %1197  ;;  %1516 = vrot.lane.b32.xlu0 %v1372_v8, %s8689_s20 }
 0x1d0   : > { %v1373_v52 = vsel %vm1355_vm1, %v8798_v30, %v1198_v39  ;;  %v9217_v39 = vrot.slane %v712_v54, %v8787_v21 }
 0x1d1   : > { %1285 = vrot.lane.b32.xlu1 %v1154_v44, %s8687_s19  ;;  %v2140_v4 = vcombine.low %v1372_v8, %v1373_v52  ;;  %v1204_v19 = vpop.permute.xlu0 %1203  ;;  %v1374_v44 = vsel %vm1355_vm1, %v8805_v33, %v1200_v59 }
 0x1d2   : > { %11901 = vst [vmem:[#allocation20_spill] sm:$0xff] %v9217_v39  ;;  %v1090_v20 = vrot.slane %v9217_v39, %v8794_v27  ;;  %v9239_v59 = vcombine.high %v9217_v39, %v9217_v39 }
 0x1d3   : > { %v1164_v26 = vpop.permute.xlu1 %1163  ;;  %1676 = vrot.lane.b32.xlu0 %v1372_v8, %s8690_s21  ;;  %v9242_v21 = vrot.slane %v2140_v4, %v9220_v11  ;;  %v1376_v4 = vsel %vm1355_vm1, %v8809_v34, %v1204_v19 }
 0x1d4   : > { %v1356_v33 = vsel %vm1355_vm1, %v8814_v37, %v1164_v26 }
 0x1d5   : > { %1249 = vrot.lane.b32.xlu1 %v1082_v24, %s8687_s19  ;;  %v1208_v30 = vpop.permute.xlu0 %1207  ;;  %11902 = vst [vmem:[#allocation21_spill] sm:$0xff] %v9242_v21 }
 0x1d7   : > { %v1202_v48 = vpop.permute.xlu1 %1201  ;;  %1520 = vrot.lane.b32.xlu0 %v1374_v44, %s8689_s20 }
 0x1d8   : > { %v9229_v8 = vsel %vm1355_vm1, %v8831_v45, %v1202_v48 }
 0x1d9   : > { %1289 = vrot.lane.b32.xlu1 %v1162_v17, %s8687_s19  ;;  %v2141_v54 = vcombine.low %v1374_v44, %v9229_v8  ;;  %v1172_v24 = vpop.permute.xlu0 %1171 }
 0x1db   : > { %v1166_v61 = vpop.permute.xlu1 %1165  ;;  %v9245_v45 = vrot.slane %v2141_v54, %v9220_v11  ;;  %1484 = vrot.lane.b32.xlu0 %v1356_v33, %s8689_s20  ;;  %v1098_v54 = vrot.slane %v9239_v59, %v8794_v27 }
 0x1dc   : > { %v9250_v17 = vsel %vm1355_vm1, %v8842_v49, %v1166_v61 }
 0x1dd   : > { %11903 = vst [vmem:[#allocation22_spill] sm:$0xff] %v9245_v45  ;;  %1253 = vrot.lane.b32.xlu1 %v1090_v20, %s8687_s19  ;;  %v1868_v37 = vcombine.low %v1356_v33, %v9250_v17  ;;  %v1212_v48 = vpop.permute.xlu0 %1211 }
 0x1df   : > { %v1168_v39 = vpop.permute.xlu1 %1167  ;;  %1524 = vrot.lane.b32.xlu0 %v1376_v4, %s8689_s20 }
 0x1e0   : > { %v1358_v34 = vsel %vm1355_vm1, %v8857_v55, %v1168_v39  ;;  %v1378_v55 = vsel %vm1355_vm1, %v8825_v41, %v1208_v30  ;;  %v1360_v41 = vsel %vm1355_vm1, %v8836_v46, %v1172_v24  ;;  %v1380_v46 = vsel %vm1355_vm1, %v8849_v51, %v1212_v48 }
 0x1e1   : > { %1257 = vrot.lane.b32.xlu1 %v1098_v54, %s8687_s19  ;;  %v1176_v49 = vpop.permute.xlu0 %1175  ;;  %s8702_s19 = smov 1  }
 0x1e3   : > { %v1206_v61 = vpop.permute.xlu1 %1205  ;;  %1680 = vrot.lane.b32.xlu0 %v1374_v44, %s8690_s21 }
 0x1e4   : > { %v1377_v20 = vsel %vm1355_vm1, %v8868_v58, %v1206_v61  ;;  %v9276_v61 = vrot.slane %v1868_v37, %v9220_v11 }
 0x1e5   : > { %1518 = vrot.lane.b32.xlu1 %v1373_v52, %s8689_s20  ;;  %v2174_v26 = vcombine.low %v1376_v4, %v1377_v20  ;;  %v1216_v45 = vpop.permute.xlu0 %1215 }
 0x1e7   : > { %v1170_v21 = vpop.permute.xlu1 %1169  ;;  %1612 = vrot.lane.b32.xlu0 %v1356_v33, %s8690_s21  ;;  %v9294_v37 = vrot.slane %v2174_v26, %v9220_v11  ;;  %v9324_v26 = vsel %vm1355_vm1, %v8865_v57, %v1176_v49 }
 0x1e8   : > { %v9271_v19 = vsel %vm1355_vm1, %v8885_v3, %v1170_v21 }
 0x1e9   : > { %1678 = vrot.lane.b32.xlu1 %v1373_v52, %s8690_s21  ;;  %v1869_v44 = vcombine.low %v1358_v34, %v9271_v19  ;;  %v1180_v54 = vpop.permute.xlu0 %1179  ;;  %11904 = vst [vmem:[#allocation23_spill] sm:$0xff] %v9294_v37 }
 0x1eb   : > { %v1210_v58 = vpop.permute.xlu1 %1209  ;;  %v9279_v27 = vrot.slane %v1869_v44, %v9220_v11  ;;  %1692 = vrot.lane.b32.xlu0 %v1376_v4, %s8690_s21 }
 0x1ec   : > { %v9286_v21 = vsel %vm1355_vm1, %v8899_v10, %v1210_v58 }
 0x1ed   : > { %1522 = vrot.lane.b32.xlu1 %v9229_v8, %s8689_s20  ;;  %v2175_v52 = vcombine.low %v1378_v55, %v9286_v21  ;;  %v1220_v39 = vpop.permute.xlu0 %1219 }
 0x1ef   : > { %v1174_v33 = vpop.permute.xlu1 %1173  ;;  %v9297_v4 = vrot.slane %v2175_v52, %v9220_v11  ;;  %1488 = vrot.lane.b32.xlu0 %v1358_v34, %s8689_s20 }
 0x1f0   : > { %v9304_v10 = vsel %vm1355_vm1, %v8910_v15, %v1174_v33 }
 0x1f1   : > { %11905 = vst [vmem:[#allocation24_spill] sm:$0xff] %v9297_v4  ;;  %1486 = vrot.lane.b32.xlu1 %v9250_v17, %s8689_s20  ;;  %v1902_v30 = vcombine.low %v1360_v41, %v9304_v10  ;;  %v9311_v44 = vpop.permute.xlu0 %1259  ;;  %v1384_v4 = vsel %vm1355_vm1, %v8905_v13, %v1220_v39 }
 0x1f3   : > { %v1214_v58 = vpop.permute.xlu1 %1213  ;;  %1528 = vrot.lane.b32.xlu0 %v1378_v55, %s8689_s20  ;;  %v9339_v57 = vrot.slane %v1902_v30, %v9220_v11 }
 0x1f4   : > { %v9318_v15 = vsel %vm1355_vm1, %v8922_v22, %v1214_v58 }
 0x1f5   : > { %1526 = vrot.lane.b32.xlu1 %v1377_v20, %s8689_s20  ;;  %v2208_v24 = vcombine.low %v1380_v46, %v9318_v15  ;;  %v1184_v52 = vpop.permute.xlu0 %1183 }
 0x1f7   : > { %v1178_v33 = vpop.permute.xlu1 %1177  ;;  %1492 = vrot.lane.b32.xlu0 %v1360_v41, %s8689_s20 }
 0x1f8   : > { %v9328_v3 = vsel %vm1355_vm1, %v8938_v31, %v1178_v33  ;;  %v9343_v31 = vsel %vm1355_vm1, %v8879_v0, %v1216_v45 }
 0x1f9   : > { %v1903_v51 = vcombine.low %v9324_v26, %v9328_v3  ;;  %1682 = vrot.lane.b32.xlu1 %v9229_v8, %s8690_s21  ;;  %v1224_v22 = vpop.permute.xlu0 %1223 }
 0x1fb   : > { %v9336_v48 = vrot.slane %v1903_v51, %v9220_v11  ;;  %v1218_v58 = vpop.permute.xlu1 %1217  ;;  %1532 = vrot.lane.b32.xlu0 %v1380_v46, %s8689_s20  ;;  %v1364_v51 = vsel %vm1355_vm1, %v8891_v6, %v1180_v54  ;;  %v9398_v54 = vsel %vm1355_vm1, %v8932_v28, %v1184_v52 }
 0x1fc   : > { %v9347_v49 = vsel %vm1355_vm1, %v8953_v40, %v1218_v58  ;;  %v9362_v40 = vrot.slane %v2208_v24, %v9220_v11 }
 0x1fd   : > { %11906 = vst [vmem:[#allocation25_spill] sm:$0xff] %v9336_v48  ;;  %v2209_v8 = vcombine.low %v9343_v31, %v9347_v49  ;;  %1614 = vrot.lane.b32.xlu1 %v9250_v17, %s8690_s21  ;;  %v9356_v33 = vpop.permute.xlu0 %1187 }
 0x1fe   : > { %11908 = vst [vmem:[#allocation27_spill] sm:$0xff] %v9362_v40  ;;  %v9527_v37 = vsel %vm1355_vm1, %v8958_v42, %v9356_v33 }
 0x1ff   : > { %v9359_v0 = vrot.slane %v2209_v8, %v9220_v11  ;;  %v1182_v45 = vpop.permute.xlu1 %1181  ;;  %1616 = vrot.lane.b32.xlu0 %v1358_v34, %s8690_s21  ;;  %11914 = vst [vmem:[#allocation33_spill] sm:$0xff] %v9527_v37 }
 0x200   : > { %v9368_v58 = vsel %vm1355_vm1, %v8963_v47, %v1182_v45 }
 0x201   : > { %11907 = vst [vmem:[#allocation26_spill] sm:$0xff] %v9359_v0  ;;  %v1936_v17 = vcombine.low %v1364_v51, %v9368_v58  ;;  %1694 = vrot.lane.b32.xlu1 %v1377_v20, %s8690_s21  ;;  %v9375_v30 = vpop.permute.xlu0 %1263 }
 0x203   : > { %v1222_v24 = vpop.permute.xlu1 %1221  ;;  %1696 = vrot.lane.b32.xlu0 %v1378_v55, %s8690_s21  ;;  %v9412_v45 = vrot.slane %v1936_v17, %v9220_v11 }
 0x204   : > { %v9381_v6 = vsel %vm1355_vm1, %v8977_v60, %v1222_v24 }
 0x205   : > { %v2242_v47 = vcombine.low %v1384_v4, %v9381_v6  ;;  %1490 = vrot.lane.b32.xlu1 %v9271_v19, %s8689_s20  ;;  %v9387_v20 = vpop.permute.xlu0 %1227  ;;  %11909 = vst [vmem:[#allocation28_spill] sm:$0xff] %v9412_v45 }
 0x207   : > { %v9389_v34 = vpop.permute.xlu1 %1261  ;;  %1628 = vrot.lane.b32.xlu0 %v1360_v41, %s8690_s21 }
 0x208   : > { %v9550_v33 = vsel %vm1355_vm1, %v8988_v1, %v9389_v34 }
 0x209   : > { %1530 = vrot.lane.b32.xlu1 %v9286_v21, %s8689_s20  ;;  %v9394_v13 = vpop.permute.xlu0 %1267  ;;  %11915 = vst [vmem:[#allocation34_spill] sm:$0xff] %v9550_v33 }
 0x20b   : > { %v1186_v60 = vpop.permute.xlu1 %1185  ;;  %1708 = vrot.lane.b32.xlu0 %v1380_v46, %s8690_s21 }
 0x20c   : > { %v9402_v55 = vsel %vm1355_vm1, %v9005_v12, %v1186_v60  ;;  %v9419_v12 = vsel %vm1355_vm1, %v8947_v36, %v1224_v22  ;;  %v9436_v36 = vrot.slane %v2242_v47, %v9220_v11 }
 0x20d   : > { %v1937_v39 = vcombine.low %v9398_v54, %v9402_v55  ;;  %1494 = vrot.lane.b32.xlu1 %v9304_v10, %s8689_s20  ;;  %v9409_v41 = vpop.permute.xlu0 %1191 }
 0x20e   : > { %11911 = vst [vmem:[#allocation30_spill] sm:$0xff] %v9436_v36  ;;  %v9498_v36 = vsel %vm1355_vm1, %v8916_v18, %v9311_v44 }
 0x20f   : > { %v9415_v28 = vrot.slane %v1937_v39, %v9220_v11  ;;  %v1226_v52 = vpop.permute.xlu1 %1225  ;;  %1496 = vrot.lane.b32.xlu0 %v9324_v26, %s8689_s20  ;;  %11913 = vst [vmem:[#allocation32_spill] sm:$0xff] %v9498_v36 }
 0x210   : > { %v9423_v46 = vsel %vm1355_vm1, %v9019_v23, %v1226_v52 }
 0x211   : > { %11910 = vst [vmem:[#allocation29_spill] sm:$0xff] %v9415_v28  ;;  %v2243_v17 = vcombine.low %v9419_v12, %v9423_v46  ;;  %1534 = vrot.lane.b32.xlu1 %v9318_v15, %s8689_s20  ;;  %v9433_v60 = vpop.permute.xlu0 %1231 }
 0x213   : > { %v9439_v23 = vrot.slane %v2243_v17, %v9220_v11  ;;  %v9441_v22 = vpop.permute.xlu1 %1189  ;;  %1536 = vrot.lane.b32.xlu0 %v9343_v31, %s8689_s20 }
 0x215   : > { %11912 = vst [vmem:[#allocation31_spill] sm:$0xff] %v9439_v23  ;;  %1618 = vrot.lane.b32.xlu1 %v9271_v19, %s8690_s21  ;;  %v9449_v52 = vpop.permute.xlu0 %1271 }
 0x217   : > { %v9451_v8 = vpop.permute.xlu1 %1265  ;;  %1500 = vrot.lane.b32.xlu0 %v1364_v51, %s8689_s20 }
 0x219   : > { %1698 = vrot.lane.b32.xlu1 %v9286_v21, %s8690_s21  ;;  %v9456_v47 = vpop.permute.xlu0 %1235 }
 0x21b   : > { %v9458_v17 = vpop.permute.xlu1 %1229  ;;  %1540 = vrot.lane.b32.xlu0 %v1384_v4, %s8689_s20 }
 0x21d   : > { %1630 = vrot.lane.b32.xlu1 %v9304_v10, %s8690_s21  ;;  %v9463_v19 = vpop.permute.xlu0 %1275 }
 0x21f   : > { %v9465_v39 = vpop.permute.xlu1 %1269  ;;  %1632 = vrot.lane.b32.xlu0 %v9324_v26, %s8690_s21 }
 0x221   : > { %1710 = vrot.lane.b32.xlu1 %v9318_v15, %s8690_s21  ;;  %v9471_v21 = vpop.permute.xlu0 %1239 }
 0x223   : > { %v9473_v24 = vpop.permute.xlu1 %1193  ;;  %1712 = vrot.lane.b32.xlu0 %v9343_v31, %s8690_s21 }
 0x225   : > { %1498 = vrot.lane.b32.xlu1 %v9328_v3, %s8689_s20  ;;  %v9479_v10 = vpop.permute.xlu0 %1279 }
 0x227   : > { %v9481_v23 = vpop.permute.xlu1 %1233  ;;  %1644 = vrot.lane.b32.xlu0 %v1364_v51, %s8690_s21 }
 0x229   : > { %1538 = vrot.lane.b32.xlu1 %v9347_v49, %s8689_s20  ;;  %v9486_v26 = vpop.permute.xlu0 %1243 }
 0x22b   : > { %v9488_v15 = vpop.permute.xlu1 %1273  ;;  %1724 = vrot.lane.b32.xlu0 %v1384_v4, %s8690_s21 }
 0x22d   : > { %1502 = vrot.lane.b32.xlu1 %v9368_v58, %s8689_s20  ;;  %v9493_v31 = vpop.permute.xlu0 %1283 }
 0x22f   : > { %v9500_v51 = vpop.permute.xlu1 %1237  ;;  %1580 = vrot.lane.b32.xlu0 %v9498_v36, %s8689_s20 }
 0x231   : > { %1542 = vrot.lane.b32.xlu1 %v9381_v6, %s8689_s20  ;;  %v9506_v0 = vpop.permute.xlu0 %1247 }
 0x233   : > { %v9508_v4 = vpop.permute.xlu1 %1277  ;;  %1504 = vrot.lane.b32.xlu0 %v9398_v54, %s8689_s20 }
 0x235   : > { %1634 = vrot.lane.b32.xlu1 %v9328_v3, %s8690_s21  ;;  %v9514_v18 = vpop.permute.xlu0 %1287 }
 0x237   : > { %v9516_v44 = vpop.permute.xlu1 %1241  ;;  %1544 = vrot.lane.b32.xlu0 %v9419_v12, %s8689_s20 }
 0x239   : > { %1714 = vrot.lane.b32.xlu1 %v9347_v49, %s8690_s21  ;;  %v9522_v40 = vpop.permute.xlu0 %1251 }
 0x23b   : > { %v9529_v28 = vpop.permute.xlu1 %1281  ;;  %1508 = vrot.lane.b32.xlu0 %v9527_v37, %s8689_s20 }
 0x23d   : > { %1646 = vrot.lane.b32.xlu1 %v9368_v58, %s8690_s21  ;;  %v9535_v3 = vpop.permute.xlu0 %1255 }
 0x23f   : > { %v9537_v45 = vpop.permute.xlu1 %1245  ;;  %1804 = vrot.lane.b32.xlu0 %v9498_v36, %s8690_s21 }
 0x241   : > { %1726 = vrot.lane.b32.xlu1 %v9381_v6, %s8690_s21  ;;  %v9543_v42 = vpop.permute.xlu0 %1516 }
 0x243   : > { %v9545_v49 = vpop.permute.xlu1 %1285  ;;  %1648 = vrot.lane.b32.xlu0 %v9398_v54, %s8690_s21  ;;  %v9577_v54 = vsel %vm1355_vm1, %v8971_v53, %v9375_v30  ;;  %v9595_v53 = vsel %vm1355_vm1, %v8982_v62, %v9387_v20  ;;  %v9621_v20 = vsel %vm1355_vm1, %v9013_v16, %v9409_v41  ;;  %v9644_v41 = vsel %vm1355_vm1, %v9047_v50, %v9451_v8 }
 0x244   : > { %11917 = vst [vmem:[#allocation36_spill] sm:$0xff] %v9577_v54  ;;  %11919 = vst [vmem:[#allocation38_spill] sm:$0xff] %v9595_v53 }
 0x245   : > { %1582 = vrot.lane.b32.xlu1 %v9550_v33, %s8689_s20  ;;  %v9556_v58 = vpop.permute.xlu0 %1676  ;;  %11924 = vst [vmem:[#allocation43_spill] sm:$0xff] %v9644_v41 }
 0x246   : > { %11916 = vst [vmem:[#allocation35_spill] sm:$0xff] %v9556_v58  ;;  %v9584_v58 = vsel %vm1355_vm1, %v9032_v35, %v9441_v22  ;;  %v9608_v22 = vsel %vm1355_vm1, %v9001_v9, %v9394_v13 }
 0x247   : > { %v9558_v36 = vpop.permute.xlu1 %1249  ;;  %1728 = vrot.lane.b32.xlu0 %v9419_v12, %s8690_s21  ;;  %11921 = vst [vmem:[#allocation40_spill] sm:$0xff] %v9608_v22 }
 0x249   : > { %1506 = vrot.lane.b32.xlu1 %v9402_v55, %s8689_s20  ;;  %v9564_v6 = vpop.permute.xlu0 %1520 }
 0x24b   : > { %v9566_v1 = vpop.permute.xlu1 %1289  ;;  %1660 = vrot.lane.b32.xlu0 %v9527_v37, %s8690_s21 }
 0x24d   : > { %1546 = vrot.lane.b32.xlu1 %v9423_v46, %s8689_s20  ;;  %v9572_v34 = vpop.permute.xlu0 %1484 }
 0x24f   : > { %v9579_v12 = vpop.permute.xlu1 %1253  ;;  %1584 = vrot.lane.b32.xlu0 %v9577_v54, %s8689_s20 }
 0x251   : > { %1510 = vrot.lane.b32.xlu1 %v9584_v58, %s8689_s20  ;;  %v9590_v37 = vpop.permute.xlu0 %1524 }
 0x252   : > { %11918 = vst [vmem:[#allocation37_spill] sm:$0xff] %v9590_v37 }
 0x253   : > { %v9597_v30 = vpop.permute.xlu1 %1257  ;;  %1548 = vrot.lane.b32.xlu0 %v9595_v53, %s8689_s20 }
 0x255   : > { %1806 = vrot.lane.b32.xlu1 %v9550_v33, %s8690_s21  ;;  %v9603_v35 = vpop.permute.xlu0 %1680 }
 0x256   : > { %11920 = vst [vmem:[#allocation39_spill] sm:$0xff] %v9603_v35 }
 0x257   : > { %v9610_v48 = vpop.permute.xlu1 %1518  ;;  %1588 = vrot.lane.b32.xlu0 %v9608_v22, %s8689_s20 }
 0x259   : > { %1650 = vrot.lane.b32.xlu1 %v9402_v55, %s8690_s21  ;;  %v9616_v62 = vpop.permute.xlu0 %1612 }
 0x25b   : > { %v9623_v33 = vpop.permute.xlu1 %1678  ;;  %1512 = vrot.lane.b32.xlu0 %v9621_v20, %s8689_s20 }
 0x25c   : > { %11922 = vst [vmem:[#allocation41_spill] sm:$0xff] %v9623_v33 }
 0x25d   : > { %1730 = vrot.lane.b32.xlu1 %v9423_v46, %s8690_s21  ;;  %v9629_v9 = vpop.permute.xlu0 %1692 }
 0x25e   : > { %11923 = vst [vmem:[#allocation42_spill] sm:$0xff] %v9629_v9 }
 0x25f   : > { %v9631_v13 = vpop.permute.xlu1 %1522  ;;  %1808 = vrot.lane.b32.xlu0 %v9577_v54, %s8690_s21  ;;  %v9657_v54 = vsel %vm1355_vm1, %v9058_v63, %v9458_v17  ;;  %v9681_v17 = vsel %vm1355_vm1, %v9027_v29, %v9433_v60  ;;  %v9699_v29 = vsel %vm1355_vm1, %v9041_v43, %v9449_v52  ;;  %v9725_v52 = vsel %vm1355_vm1, %v9065_v7, %v9463_v19 }
 0x260   : > { %11925 = vst [vmem:[#allocation44_spill] sm:$0xff] %v9657_v54  ;;  %11929 = vst [vmem:[#allocation48_spill] sm:$0xff] %v9681_v17 }
 0x261   : > { %1662 = vrot.lane.b32.xlu1 %v9584_v58, %s8690_s21  ;;  %v9637_v16 = vpop.permute.xlu0 %1488  ;;  %11930 = vst [vmem:[#allocation49_spill] sm:$0xff] %v9699_v29  ;;  %11935 = vst [vmem:[#allocation54_spill] sm:$0xff] %v9725_v52 }
 0x263   : > { %v9639_v55 = vpop.permute.xlu1 %1486  ;;  %1740 = vrot.lane.b32.xlu0 %v9595_v53, %s8690_s21  ;;  %v9670_v53 = vsel %vm1355_vm1, %v9070_v14, %v9465_v39  ;;  %v9688_v14 = vsel %vm1355_vm1, %v9086_v32, %v9473_v24  ;;  %v9712_v24 = vsel %vm1355_vm1, %v9052_v56, %v9456_v47 }
 0x264   : > { %11927 = vst [vmem:[#allocation46_spill] sm:$0xff] %v9670_v53  ;;  %11933 = vst [vmem:[#allocation52_spill] sm:$0xff] %v9712_v24 }
 0x265   : > { %1586 = vrot.lane.b32.xlu1 %v9644_v41, %s8689_s20  ;;  %v9650_v46 = vpop.permute.xlu0 %1528 }
 0x267   : > { %v9652_v9 = vpop.permute.xlu1 %1526  ;;  %1820 = vrot.lane.b32.xlu0 %v9608_v22, %s8690_s21 }
 0x269   : > { %1550 = vrot.lane.b32.xlu1 %v9657_v54, %s8689_s20  ;;  %v9663_v50 = vpop.permute.xlu0 %1492 }
 0x26b   : > { %v9665_v8 = vpop.permute.xlu1 %1682  ;;  %1664 = vrot.lane.b32.xlu0 %v9621_v20, %s8690_s21 }
 0x26c   : > { %11926 = vst [vmem:[#allocation45_spill] sm:$0xff] %v9665_v8 }
 0x26d   : > { %1590 = vrot.lane.b32.xlu1 %v9670_v53, %s8689_s20  ;;  %v9676_v63 = vpop.permute.xlu0 %1532 }
 0x26e   : > { %11928 = vst [vmem:[#allocation47_spill] sm:$0xff] %v9676_v63 }
 0x26f   : > { %v9683_v22 = vpop.permute.xlu1 %1614  ;;  %1552 = vrot.lane.b32.xlu0 %v9681_v17, %s8689_s20 }
 0x271   : > { %1514 = vrot.lane.b32.xlu1 %v9688_v14, %s8689_s20  ;;  %v9694_v39 = vpop.permute.xlu0 %1616 }
 0x273   : > { %v9701_v60 = vpop.permute.xlu1 %1694  ;;  %1592 = vrot.lane.b32.xlu0 %v9699_v29, %s8689_s20 }
 0x274   : > { %11931 = vst [vmem:[#allocation50_spill] sm:$0xff] %v9701_v60 }
 0x275   : > { %1810 = vrot.lane.b32.xlu1 %v9644_v41, %s8690_s21  ;;  %v9707_v32 = vpop.permute.xlu0 %1696 }
 0x276   : > { %11932 = vst [vmem:[#allocation51_spill] sm:$0xff] %v9707_v32 }
 0x277   : > { %v9714_v33 = vpop.permute.xlu1 %1490  ;;  %1556 = vrot.lane.b32.xlu0 %v9712_v24, %s8689_s20 }
 0x279   : > { %1742 = vrot.lane.b32.xlu1 %v9657_v54, %s8690_s21  ;;  %v9720_v43 = vpop.permute.xlu0 %1628  ;;  %v9748_v54 = vsel %vm1355_vm1, %v9101_v5, %v9481_v23 }
 0x27a   : > { %11934 = vst [vmem:[#allocation53_spill] sm:$0xff] %v9720_v43  ;;  %11938 = vst [vmem:[#allocation57_spill] sm:$0xff] %v9748_v54 }
 0x27b   : > { %v9727_v60 = vpop.permute.xlu1 %1530  ;;  %1596 = vrot.lane.b32.xlu0 %v9725_v52, %s8689_s20 }
 0x27d   : > { %1822 = vrot.lane.b32.xlu1 %v9670_v53, %s8690_s21  ;;  %v9733_v56 = vpop.permute.xlu0 %1708  ;;  %v9761_v53 = vsel %vm1355_vm1, %v9115_v2, %v9488_v15  ;;  %v11945_v15 = vld [vmem:[#allocation5_spill] sm:$0xff] }
 0x27e   : > { %11936 = vst [vmem:[#allocation55_spill] sm:$0xff] %v9733_v56  ;;  %11940 = vst [vmem:[#allocation59_spill] sm:$0xff] %v9761_v53 }
 0x27f   : > { %v9735_v47 = vpop.permute.xlu1 %1494  ;;  %1744 = vrot.lane.b32.xlu0 %v9681_v17, %s8690_s21 }
 0x281   : > { %1666 = vrot.lane.b32.xlu1 %v9688_v14, %s8690_s21  ;;  %v9741_v7 = vpop.permute.xlu0 %1496 }
 0x283   : > { %v9743_v19 = vpop.permute.xlu1 %1534  ;;  %1824 = vrot.lane.b32.xlu0 %v9699_v29, %s8690_s21  ;;  %v11942_v29 = vld [vmem:[#allocation9_spill] sm:$0xff] }
 0x284   : > { %11937 = vst [vmem:[#allocation56_spill] sm:$0xff] %v9743_v19  ;;  %v9774_v32 = vsel %vm1355_vm1, %v11942_v29, %v9500_v51 }
 0x285   : > { %1554 = vrot.lane.b32.xlu1 %v9748_v54, %s8689_s20  ;;  %v9754_v56 = vpop.permute.xlu0 %1536  ;;  %11943 = vst [vmem:[#allocation9_spill] sm:$0xff] %v9774_v32 }
 0x286   : > { %11939 = vst [vmem:[#allocation58_spill] sm:$0xff] %v9754_v56 }
 0x287   : > { %v9756_v17 = vpop.permute.xlu1 %1618  ;;  %1756 = vrot.lane.b32.xlu0 %v9712_v24, %s8690_s21  ;;  %v9785_v24 = vsel %vm1355_vm1, %v11945_v15, %v9471_v21 }
 0x288   : > { %11946 = vst [vmem:[#allocation5_spill] sm:$0xff] %v9785_v24 }
 0x289   : > { %1594 = vrot.lane.b32.xlu1 %v9761_v53, %s8689_s20  ;;  %v9767_v5 = vpop.permute.xlu0 %1500 }
 0x28b   : > { %v9769_v23 = vpop.permute.xlu1 %1698  ;;  %1836 = vrot.lane.b32.xlu0 %v9725_v52, %s8690_s21  ;;  %v11949_v52 = vld [vmem:[#allocation6_spill] sm:$0xff] }
 0x28c   : > { %11941 = vst [vmem:[#allocation60_spill] sm:$0xff] %v9769_v23  ;;  %v11947_v23 = vld [vmem:[#allocation11_spill] sm:$0xff]  ;;  %v9803_v21 = vsel %vm1355_vm1, %v11949_v52, %v9479_v10  ;;  %v11956_v52 = vld [vmem:[#allocation8_spill] sm:$0xff] }
 0x28d   : > { %1558 = vrot.lane.b32.xlu1 %v9774_v32, %s8689_s20  ;;  %v9780_v2 = vpop.permute.xlu0 %1540  ;;  %v9792_v51 = vsel %vm1355_vm1, %v11947_v23, %v9508_v4  ;;  %11950 = vst [vmem:[#allocation6_spill] sm:$0xff] %v9803_v21  ;;  %v11953_v23 = vld [vmem:[#allocation7_spill] sm:$0xff] }
 0x28e   : > { %11944 = vst [vmem:[#allocation61_spill] sm:$0xff] %v9780_v2  ;;  %11948 = vst [vmem:[#allocation11_spill] sm:$0xff] %v9792_v51  ;;  %v9816_v35 = vsel %vm1355_vm1, %v11953_v23, %v9486_v26 }
 0x28f   : > { %v9787_v41 = vpop.permute.xlu1 %1630  ;;  %1560 = vrot.lane.b32.xlu0 %v9785_v24, %s8689_s20  ;;  %11954 = vst [vmem:[#allocation7_spill] sm:$0xff] %v9816_v35 }
 0x291   : > { %1598 = vrot.lane.b32.xlu1 %v9792_v51, %s8689_s20  ;;  %v9798_v29 = vpop.permute.xlu0 %1632 }
 0x293   : > { %v9805_v15 = vpop.permute.xlu1 %1710  ;;  %1600 = vrot.lane.b32.xlu0 %v9803_v21, %s8689_s20 }
 0x294   : > { %11951 = vst [vmem:[#allocation62_spill] sm:$0xff] %v9805_v15 }
 0x295   : > { %1746 = vrot.lane.b32.xlu1 %v9748_v54, %s8690_s21  ;;  %v9811_v4 = vpop.permute.xlu0 %1712  ;;  %v9829_v54 = vsel %vm1355_vm1, %v11956_v52, %v9493_v31 }
 0x296   : > { %11952 = vst [vmem:[#allocation63_spill] sm:$0xff] %v9811_v4  ;;  %11957 = vst [vmem:[#allocation8_spill] sm:$0xff] %v9829_v54  ;;  %v11961_v4 = vld [vmem:[#allocation13_spill] sm:$0xff] }
 0x297   : > { %v9818_v8 = vpop.permute.xlu1 %1498  ;;  %1564 = vrot.lane.b32.xlu0 %v9816_v35, %s8689_s20 }
 0x299   : > { %1826 = vrot.lane.b32.xlu1 %v9761_v53, %s8690_s21  ;;  %v9824_v10 = vpop.permute.xlu0 %1644  ;;  %v9852_v53 = vsel %vm1355_vm1, %v11961_v4, %v9516_v44 }
 0x29a   : > { %11955 = vst [vmem:[#allocation64_spill] sm:$0xff] %v9824_v10  ;;  %11962 = vst [vmem:[#allocation13_spill] sm:$0xff] %v9852_v53 }
 0x29b   : > { %v9831_v15 = vpop.permute.xlu1 %1538  ;;  %1604 = vrot.lane.b32.xlu0 %v9829_v54, %s8689_s20 }
 0x29c   : > { %11958 = vst [vmem:[#allocation65_spill] sm:$0xff] %v9831_v15 }
 0x29d   : > { %1758 = vrot.lane.b32.xlu1 %v9774_v32, %s8690_s21  ;;  %v9837_v26 = vpop.permute.xlu0 %1724 }
 0x29e   : > { %11959 = vst [vmem:[#allocation66_spill] sm:$0xff] %v9837_v26  ;;  %v11963_v26 = vld [vmem:[#allocation15_spill] sm:$0xff] }
 0x29f   : > { %v9839_v23 = vpop.permute.xlu1 %1502  ;;  %1760 = vrot.lane.b32.xlu0 %v9785_v24, %s8690_s21 }
 0x2a1   : > { %1838 = vrot.lane.b32.xlu1 %v9792_v51, %s8690_s21  ;;  %v9845_v31 = vpop.permute.xlu0 %1580  ;;  %v9865_v51 = vsel %vm1355_vm1, %v11963_v26, %v9529_v28  ;;  %v11969_v26 = vld [vmem:[#allocation10_spill] sm:$0xff] }
 0x2a2   : > { %11960 = vst [vmem:[#allocation67_spill] sm:$0xff] %v9845_v31  ;;  %11964 = vst [vmem:[#allocation15_spill] sm:$0xff] %v9865_v51 }
 0x2a3   : > { %v9847_v52 = vpop.permute.xlu1 %1542  ;;  %1840 = vrot.lane.b32.xlu0 %v9803_v21, %s8690_s21  ;;  %v11967_v21 = vld [vmem:[#allocation18_spill] sm:$0xff] }
 0x2a4   : > { %v9878_v10 = vsel %vm1355_vm1, %v11967_v21, %v9537_v45  ;;  %v9896_v45 = vsel %vm1355_vm1, %v9190_v25, %v9545_v49  ;;  %v11978_v49 = vld [vmem:[#allocation14_spill] sm:$0xff] }
 0x2a5   : > { %1562 = vrot.lane.b32.xlu1 %v9852_v53, %s8689_s20  ;;  %v9858_v32 = vpop.permute.xlu0 %1504  ;;  %11968 = vst [vmem:[#allocation18_spill] sm:$0xff] %v9878_v10  ;;  %11972 = vst [vmem:[#allocation71_spill] sm:$0xff] %v9896_v45 }
 0x2a7   : > { %v9860_v24 = vpop.permute.xlu1 %1634  ;;  %1772 = vrot.lane.b32.xlu0 %v9816_v35, %s8690_s21  ;;  %v9889_v35 = vsel %vm1355_vm1, %v11969_v26, %v9506_v0 }
 0x2a8   : > { %11970 = vst [vmem:[#allocation10_spill] sm:$0xff] %v9889_v35 }
 0x2a9   : > { %1602 = vrot.lane.b32.xlu1 %v9865_v51, %s8689_s20  ;;  %v9871_v44 = vpop.permute.xlu0 %1544 }
 0x2aa   : > { %11965 = vst [vmem:[#allocation68_spill] sm:$0xff] %v9871_v44 }
 0x2ab   : > { %v9873_v4 = vpop.permute.xlu1 %1714  ;;  %1852 = vrot.lane.b32.xlu0 %v9829_v54, %s8690_s21  ;;  %v11974_v54 = vld [vmem:[#allocation12_spill] sm:$0xff] }
 0x2ac   : > { %11966 = vst [vmem:[#allocation69_spill] sm:$0xff] %v9873_v4  ;;  %v9907_v0 = vsel %vm1355_vm1, %v11974_v54, %v9514_v18  ;;  %v9920_v4 = vsel %vm1355_vm1, %v11978_v49, %v9522_v40 }
 0x2ad   : > { %1566 = vrot.lane.b32.xlu1 %v9878_v10, %s8689_s20  ;;  %v9884_v28 = vpop.permute.xlu0 %1508  ;;  %11975 = vst [vmem:[#allocation12_spill] sm:$0xff] %v9907_v0  ;;  %11979 = vst [vmem:[#allocation14_spill] sm:$0xff] %v9920_v4 }
 0x2af   : > { %v9891_v43 = vpop.permute.xlu1 %1646  ;;  %1568 = vrot.lane.b32.xlu0 %v9889_v35, %s8689_s20 }
 0x2b0   : > { %11971 = vst [vmem:[#allocation70_spill] sm:$0xff] %v9891_v43 }
 0x2b1   : > { %1606 = vrot.lane.b32.xlu1 %v9896_v45, %s8689_s20  ;;  %v9902_v21 = vpop.permute.xlu0 %1804 }
 0x2b2   : > { %11973 = vst [vmem:[#allocation72_spill] sm:$0xff] %v9902_v21 }
 0x2b3   : > { %v9909_v26 = vpop.permute.xlu1 %1726  ;;  %1608 = vrot.lane.b32.xlu0 %v9907_v0, %s8689_s20 }
 0x2b4   : > { %11976 = vst [vmem:[#allocation73_spill] sm:$0xff] %v9909_v26 }
 0x2b5   : > { %1762 = vrot.lane.b32.xlu1 %v9852_v53, %s8690_s21  ;;  %v9915_v25 = vpop.permute.xlu0 %1648 }
 0x2b6   : > { %11977 = vst [vmem:[#allocation74_spill] sm:$0xff] %v9915_v25 }
 0x2b7   : > { %v9922_v21 = vpop.permute.xlu1 %1582  ;;  %1572 = vrot.lane.b32.xlu0 %v9920_v4, %s8689_s20 }
 0x2b9   : > { %1842 = vrot.lane.b32.xlu1 %v9865_v51, %s8690_s21  ;;  %v9928_v18 = vpop.permute.xlu0 %1728 }
 0x2ba   : > { %11980 = vst [vmem:[#allocation75_spill] sm:$0xff] %v9928_v18  ;;  %v11983_v18 = vld [vmem:[#allocation19_spill] sm:$0xff] }
 0x2bb   : > { %v9930_v54 = vpop.permute.xlu1 %1506  ;;  %1776 = vrot.lane.b32.xlu0 %v9889_v35, %s8690_s21  ;;  %v9951_v35 = vsel %vm1355_vm1, %v11983_v18, %v9558_v36  ;;  %v9969_v36 = vsel %vm1355_vm1, %v9212_v38, %v9566_v1 }
 0x2bc   : > { %11984 = vst [vmem:[#allocation19_spill] sm:$0xff] %v9951_v35  ;;  %11989 = vst [vmem:[#allocation80_spill] sm:$0xff] %v9969_v36 }
 0x2bd   : > { %1774 = vrot.lane.b32.xlu1 %v9878_v10, %s8690_s21  ;;  %v9936_v40 = vpop.permute.xlu0 %1660 }
 0x2be   : > { %11981 = vst [vmem:[#allocation76_spill] sm:$0xff] %v9936_v40 }
 0x2bf   : > { %v9938_v49 = vpop.permute.xlu1 %1546  ;;  %1856 = vrot.lane.b32.xlu0 %v9907_v0, %s8690_s21  ;;  %v11986_v0 = vld [vmem:[#allocation17_spill] sm:$0xff] }
 0x2c1   : > { %1854 = vrot.lane.b32.xlu1 %v9896_v45, %s8690_s21  ;;  %v9944_v53 = vpop.permute.xlu0 %1584  ;;  %v9962_v45 = vsel %vm1355_vm1, %v11986_v0, %v9535_v3  ;;  %v11992_v3 = vld [vmem:[#allocation20_spill] sm:$0xff] }
 0x2c2   : > { %11982 = vst [vmem:[#allocation77_spill] sm:$0xff] %v9944_v53  ;;  %11987 = vst [vmem:[#allocation17_spill] sm:$0xff] %v9962_v45  ;;  %v9982_v0 = vsel %vm1355_vm1, %v11992_v3, %v9579_v12 }
 0x2c3   : > { %v9946_v26 = vpop.permute.xlu1 %1510  ;;  %1788 = vrot.lane.b32.xlu0 %v9920_v4, %s8690_s21  ;;  %11993 = vst [vmem:[#allocation20_spill] sm:$0xff] %v9982_v0 }
 0x2c5   : > { %1570 = vrot.lane.b32.xlu1 %v9951_v35, %s8689_s20  ;;  %v9957_v10 = vpop.permute.xlu0 %1548 }
 0x2c6   : > { %11985 = vst [vmem:[#allocation78_spill] sm:$0xff] %v9957_v10 }
 0x2c7   : > { %v9964_v51 = vpop.permute.xlu1 %1806  ;;  %1576 = vrot.lane.b32.xlu0 %v9962_v45, %s8689_s20 }
 0x2c8   : > { %11988 = vst [vmem:[#allocation79_spill] sm:$0xff] %v9964_v51 }
 0x2c9   : > { %1610 = vrot.lane.b32.xlu1 %v9969_v36, %s8689_s20  ;;  %v9975_v18 = vpop.permute.xlu0 %1588 }
 0x2ca   : > { %11990 = vst [vmem:[#allocation81_spill] sm:$0xff] %v9975_v18 }
 0x2cb   : > { %v9977_v4 = vpop.permute.xlu1 %1650  ;;  %1792 = vrot.lane.b32.xlu0 %v9962_v45, %s8690_s21 }
 0x2cc   : > { %11991 = vst [vmem:[#allocation82_spill] sm:$0xff] %v9977_v4 }
 0x2cd   : > { %1574 = vrot.lane.b32.xlu1 %v9982_v0, %s8689_s20  ;;  %v9988_v38 = vpop.permute.xlu0 %1512 }
 0x2cf   : > { %v9990_v1 = vpop.permute.xlu1 %1730  ;;  %1684 = vrot.lane.b32.xlu0 %v9543_v42, %s8690_s21 }
 0x2d0   : > { %11994 = vst [vmem:[#allocation83_spill] sm:$0xff] %v9990_v1  ;;  %v10019_v1 = vsel %vm1355_vm1, %v9239_v59, %v9597_v30  ;;  %vm6033_vm1 = vcmask 990208  }
 0x2d1   : > { %1778 = vrot.lane.b32.xlu1 %v9951_v35, %s8690_s21  ;;  %v9996_v51 = vpop.permute.xlu0 %1808  ;;  %12000 = vst [vmem:[#allocation89_spill] sm:$0xff] %v10019_v1 }
 0x2d2   : > { %11995 = vst [vmem:[#allocation84_spill] sm:$0xff] %v9996_v51 }
 0x2d3   : > { %v9998_v12 = vpop.permute.xlu1 %1662  ;;  %1688 = vrot.lane.b32.xlu0 %v9564_v6, %s8690_s21 }
 0x2d4   : > { %11996 = vst [vmem:[#allocation85_spill] sm:$0xff] %v9998_v12 }
 0x2d5   : > { %1858 = vrot.lane.b32.xlu1 %v9969_v36, %s8690_s21  ;;  %v10004_v3 = vpop.permute.xlu0 %1740 }
 0x2d6   : > { %11997 = vst [vmem:[#allocation86_spill] sm:$0xff] %v10004_v3 }
 0x2d7   : > { %v10006_v45 = vpop.permute.xlu1 %1586  ;;  %1620 = vrot.lane.b32.xlu0 %v9572_v34, %s8690_s21 }
 0x2d9   : > { %1790 = vrot.lane.b32.xlu1 %v9982_v0, %s8690_s21  ;;  %v10012_v35 = vpop.permute.xlu0 %1820 }
 0x2da   : > { %11998 = vst [vmem:[#allocation87_spill] sm:$0xff] %v10012_v35 }
 0x2db   : > { %v10014_v51 = vpop.permute.xlu1 %1550  ;;  %1700 = vrot.lane.b32.xlu0 %v9590_v37, %s8690_s21 }
 0x2dc   : > { %11999 = vst [vmem:[#allocation88_spill] sm:$0xff] %v10014_v51 }
 0x2dd   : > { %1578 = vrot.lane.b32.xlu1 %v10019_v1, %s8689_s20  ;;  %v10025_v3 = vpop.permute.xlu0 %1664  ;;  %s325_s20 = scalar_lea.vmem %s11765_s8, %s8582_s22 }
 0x2de   : > { %12001 = vst [vmem:[#allocation90_spill] sm:$0xff] %v10025_v3 }
 0x2df   : > { %v10027_v36 = vpop.permute.xlu1 %1590  ;;  %1624 = vrot.lane.b32.xlu0 %v9637_v16, %s8690_s21 }
 0x2e1   : > { %1794 = vrot.lane.b32.xlu1 %v10019_v1, %s8690_s21  ;;  %v10033_v0 = vpop.permute.xlu0 %1552 }
 0x2e2   : > { %12002 = vst [vmem:[#allocation91_spill] sm:$0xff] %v10033_v0 }
 0x2e3   : > { %v10035_v59 = vpop.permute.xlu1 %1514  ;;  %1704 = vrot.lane.b32.xlu0 %v9650_v46, %s8690_s21 }
 0x2e5   : > { %1686 = vrot.lane.b32.xlu1 %v9610_v48, %s8690_s21  ;;  %v10041_v30 = vpop.permute.xlu0 %1592 }
 0x2e6   : > { %12003 = vst [vmem:[#allocation92_spill] sm:$0xff] %v10041_v30 }
 0x2e7   : > { %v10043_v35 = vpop.permute.xlu1 %1810  ;;  %1636 = vrot.lane.b32.xlu0 %v9663_v50, %s8690_s21 }
 0x2e8   : > { %12004 = vst [vmem:[#allocation93_spill] sm:$0xff] %v10043_v35 }
 0x2e9   : > { %1690 = vrot.lane.b32.xlu1 %v9631_v13, %s8690_s21  ;;  %v10049_v1 = vpop.permute.xlu0 %1556 }
 0x2ea   : > { %12005 = vst [vmem:[#allocation94_spill] sm:$0xff] %v10049_v1 }
 0x2eb   : > { %v10051_v40 = vpop.permute.xlu1 %1742  ;;  %1716 = vrot.lane.b32.xlu0 %v9676_v63, %s8690_s21 }
 0x2ec   : > { %12006 = vst [vmem:[#allocation95_spill] sm:$0xff] %v10051_v40 }
 0x2ed   : > { %1622 = vrot.lane.b32.xlu1 %v9639_v55, %s8690_s21  ;;  %v10057_v12 = vpop.permute.xlu0 %1596 }
 0x2ee   : > { %12007 = vst [vmem:[#allocation96_spill] sm:$0xff] %v10057_v12 }
 0x2ef   : > { %v10059_v3 = vpop.permute.xlu1 %1822  ;;  %1640 = vrot.lane.b32.xlu0 %v9741_v7, %s8690_s21 }
 0x2f0   : > { %12008 = vst [vmem:[#allocation97_spill] sm:$0xff] %v10059_v3 }
 0x2f1   : > { %1702 = vrot.lane.b32.xlu1 %v9652_v9, %s8690_s21  ;;  %v10065_v35 = vpop.permute.xlu0 %1744 }
 0x2f2   : > { %12009 = vst [vmem:[#allocation98_spill] sm:$0xff] %v10065_v35 }
 0x2f3   : > { %v10067_v43 = vpop.permute.xlu1 %1666  ;;  %1720 = vrot.lane.b32.xlu0 %v9754_v56, %s8690_s21 }
 0x2f4   : > { %12010 = vst [vmem:[#allocation99_spill] sm:$0xff] %v10067_v43 }
 0x2f5   : > { %1626 = vrot.lane.b32.xlu1 %v9714_v33, %s8690_s21  ;;  %v10073_v40 = vpop.permute.xlu0 %1824 }
 0x2f6   : > { %12011 = vst [vmem:[#allocation100_spill] sm:$0xff] %v10073_v40 }
 0x2f7   : > { %v10075_v63 = vpop.permute.xlu1 %1554  ;;  %1652 = vrot.lane.b32.xlu0 %v9767_v5, %s8690_s21 }
 0x2f8   : > { %12012 = vst [vmem:[#allocation101_spill] sm:$0xff] %v10075_v63 }
 0x2f9   : > { %1706 = vrot.lane.b32.xlu1 %v9727_v60, %s8690_s21  ;;  %v10081_v3 = vpop.permute.xlu0 %1756 }
 0x2fa   : > { %12013 = vst [vmem:[#allocation102_spill] sm:$0xff] %v10081_v3 }
 0x2fb   : > { %v10083_v35 = vpop.permute.xlu1 %1594  ;;  %1732 = vrot.lane.b32.xlu0 %v9780_v2, %s8690_s21 }
 0x2fd   : > { %1638 = vrot.lane.b32.xlu1 %v9735_v47, %s8690_s21  ;;  %v10089_v43 = vpop.permute.xlu0 %1836 }
 0x2fe   : > { %12014 = vst [vmem:[#allocation103_spill] sm:$0xff] %v10089_v43 }
 0x2ff   : > { %v10091_v40 = vpop.permute.xlu1 %1558  ;;  %1812 = vrot.lane.b32.xlu0 %v9845_v31, %s8690_s21 }
 0x300   : > { %12015 = vst [vmem:[#allocation104_spill] sm:$0xff] %v10091_v40 }
 0x301   : > { %1718 = vrot.lane.b32.xlu1 %v9743_v19, %s8690_s21  ;;  %v10097_v56 = vpop.permute.xlu0 %1560 }
 0x302   : > { %12016 = vst [vmem:[#allocation105_spill] sm:$0xff] %v10097_v56 }
 0x303   : > { %v10099_v3 = vpop.permute.xlu1 %1598  ;;  %1656 = vrot.lane.b32.xlu0 %v9858_v32, %s8690_s21 }
 0x304   : > { %12017 = vst [vmem:[#allocation106_spill] sm:$0xff] %v10099_v3 }
 0x305   : > { %1642 = vrot.lane.b32.xlu1 %v9818_v8, %s8690_s21  ;;  %v10105_v2 = vpop.permute.xlu0 %1600 }
 0x306   : > { %12018 = vst [vmem:[#allocation107_spill] sm:$0xff] %v10105_v2 }
 0x307   : > { %v10107_v25 = vpop.permute.xlu1 %1746  ;;  %1736 = vrot.lane.b32.xlu0 %v9871_v44, %s8690_s21 }
 0x308   : > { %12019 = vst [vmem:[#allocation108_spill] sm:$0xff] %v10107_v25 }
 0x309   : > { %1722 = vrot.lane.b32.xlu1 %v9831_v15, %s8690_s21  ;;  %v10113_v31 = vpop.permute.xlu0 %1564 }
 0x30a   : > { %12020 = vst [vmem:[#allocation109_spill] sm:$0xff] %v10113_v31 }
 0x30b   : > { %v10115_v19 = vpop.permute.xlu1 %1826  ;;  %1668 = vrot.lane.b32.xlu0 %v9884_v28, %s8690_s21 }
 0x30c   : > { %12021 = vst [vmem:[#allocation110_spill] sm:$0xff] %v10115_v19 }
 0x30d   : > { %1654 = vrot.lane.b32.xlu1 %v9839_v23, %s8690_s21  ;;  %v10121_v4 = vpop.permute.xlu0 %1604 }
 0x30e   : > { %12022 = vst [vmem:[#allocation111_spill] sm:$0xff] %v10121_v4 }
 0x30f   : > { %v10123_v37 = vpop.permute.xlu1 %1758  ;;  %1816 = vrot.lane.b32.xlu0 %v9944_v53, %s8690_s21 }
 0x310   : > { %12023 = vst [vmem:[#allocation112_spill] sm:$0xff] %v10123_v37 }
 0x311   : > { %1734 = vrot.lane.b32.xlu1 %v9847_v52, %s8690_s21  ;;  %v10129_v25 = vpop.permute.xlu0 %1760 }
 0x312   : > { %12024 = vst [vmem:[#allocation113_spill] sm:$0xff] %v10129_v25 }
 0x313   : > { %v10131_v44 = vpop.permute.xlu1 %1838  ;;  %1748 = vrot.lane.b32.xlu0 %v9957_v10, %s8690_s21 }
 0x314   : > { %12025 = vst [vmem:[#allocation114_spill] sm:$0xff] %v10131_v44 }
 0x315   : > { %1814 = vrot.lane.b32.xlu1 %v9922_v21, %s8690_s21  ;;  %v10139_v37 = vpop.permute.xlu0 %1840 }
 0x316   : > { %12026 = vst [vmem:[#allocation115_spill] sm:$0xff] %v10139_v37 }
 0x317   : > { %v10141_v15 = vpop.permute.xlu1 %1562  ;;  %1828 = vrot.lane.b32.xlu0 %v9975_v18, %s8690_s21 }
 0x318   : > { %12027 = vst [vmem:[#allocation116_spill] sm:$0xff] %v10141_v15 }
 0x319   : > { %1658 = vrot.lane.b32.xlu1 %v9930_v54, %s8690_s21  ;;  %v10147_v25 = vpop.permute.xlu0 %1772 }
 0x31a   : > { %12028 = vst [vmem:[#allocation117_spill] sm:$0xff] %v10147_v25 }
 0x31b   : > { %v10149_v53 = vpop.permute.xlu1 %1602  ;;  %1672 = vrot.lane.b32.xlu0 %v9988_v38, %s8690_s21 }
 0x31c   : > { %12029 = vst [vmem:[#allocation118_spill] sm:$0xff] %v10149_v53 }
 0x31d   : > { %1738 = vrot.lane.b32.xlu1 %v9938_v49, %s8690_s21  ;;  %v10157_v44 = vpop.permute.xlu0 %1852 }
 0x31e   : > { %12030 = vst [vmem:[#allocation119_spill] sm:$0xff] %v10157_v44 }
 0x31f   : > { %v10159_v43 = vpop.permute.xlu1 %1566  ;;  %1752 = vrot.lane.b32.xlu0 %v10033_v0, %s8690_s21 }
 0x320   : > { %12031 = vst [vmem:[#allocation120_spill] sm:$0xff] %v10159_v43 }
 0x321   : > { %1670 = vrot.lane.b32.xlu1 %v9946_v26, %s8690_s21  ;;  %v10165_v25 = vpop.permute.xlu0 %1568 }
 0x322   : > { %12032 = vst [vmem:[#allocation121_spill] sm:$0xff] %v10165_v25 }
 0x323   : > { %v10167_v37 = vpop.permute.xlu1 %1606  ;;  %1832 = vrot.lane.b32.xlu0 %v10041_v30, %s8690_s21 }
 0x324   : > { %12033 = vst [vmem:[#allocation122_spill] sm:$0xff] %v10167_v37 }
 0x325   : > { %1818 = vrot.lane.b32.xlu1 %v10006_v45, %s8690_s21  ;;  %v10173_v19 = vpop.permute.xlu0 %1608 }
 0x326   : > { %12034 = vst [vmem:[#allocation123_spill] sm:$0xff] %v10173_v19 }
 0x327   : > { %v10175_v44 = vpop.permute.xlu1 %1762  ;;  %1764 = vrot.lane.b32.xlu0 %v10049_v1, %s8690_s21 }
 0x328   : > { %12035 = vst [vmem:[#allocation124_spill] sm:$0xff] %v10175_v44 }
 0x329   : > { %1750 = vrot.lane.b32.xlu1 %v10014_v51, %s8690_s21  ;;  %v10181_v10 = vpop.permute.xlu0 %1572 }
 0x32a   : > { %12036 = vst [vmem:[#allocation125_spill] sm:$0xff] %v10181_v10 }
 0x32b   : > { %v10183_v0 = vpop.permute.xlu1 %1842  ;;  %1844 = vrot.lane.b32.xlu0 %v10057_v12, %s8690_s21 }
 0x32c   : > { %12037 = vst [vmem:[#allocation126_spill] sm:$0xff] %v10183_v0 }
 0x32d   : > { %1830 = vrot.lane.b32.xlu1 %v10027_v36, %s8690_s21  ;;  %v10189_v18 = vpop.permute.xlu0 %1776 }
 0x32e   : > { %12038 = vst [vmem:[#allocation127_spill] sm:$0xff] %v10189_v18 }
 0x32f   : > { %v10191_v30 = vpop.permute.xlu1 %1774  ;;  %1768 = vrot.lane.b32.xlu0 %v10097_v56, %s8690_s21 }
 0x330   : > { %12039 = vst [vmem:[#allocation128_spill] sm:$0xff] %v10191_v30 }
 0x331   : > { %1674 = vrot.lane.b32.xlu1 %v10035_v59, %s8690_s21  ;;  %v10197_v44 = vpop.permute.xlu0 %1856 }
 0x332   : > { %12040 = vst [vmem:[#allocation129_spill] sm:$0xff] %v10197_v44 }
 0x333   : > { %v10199_v1 = vpop.permute.xlu1 %1854  ;;  %1848 = vrot.lane.b32.xlu0 %v10105_v2, %s8690_s21 }
 0x334   : > { %12041 = vst [vmem:[#allocation130_spill] sm:$0xff] %v10199_v1 }
 0x335   : > { %1754 = vrot.lane.b32.xlu1 %v10075_v63, %s8690_s21  ;;  %v10205_v0 = vpop.permute.xlu0 %1788 }
 0x336   : > { %12042 = vst [vmem:[#allocation131_spill] sm:$0xff] %v10205_v0 }
 0x337   : > { %v10207_v18 = vpop.permute.xlu1 %1570  ;;  %1780 = vrot.lane.b32.xlu0 %v10113_v31, %s8690_s21 }
 0x338   : > { %12043 = vst [vmem:[#allocation132_spill] sm:$0xff] %v10207_v18 }
 0x339   : > { %1834 = vrot.lane.b32.xlu1 %v10083_v35, %s8690_s21  ;;  %v10213_v30 = vpop.permute.xlu0 %1576 }
 0x33a   : > { %12044 = vst [vmem:[#allocation133_spill] sm:$0xff] %v10213_v30 }
 0x33b   : > { %v10215_v44 = vpop.permute.xlu1 %1610  ;;  %1860 = vrot.lane.b32.xlu0 %v10121_v4, %s8690_s21 }
 0x33c   : > { %12045 = vst [vmem:[#allocation134_spill] sm:$0xff] %v10215_v44 }
 0x33d   : > { %1766 = vrot.lane.b32.xlu1 %v10091_v40, %s8690_s21  ;;  %v10221_v1 = vpop.permute.xlu0 %1792 }
 0x33e   : > { %12046 = vst [vmem:[#allocation135_spill] sm:$0xff] %v10221_v1 }
 0x33f   : > { %v10223_v0 = vpop.permute.xlu1 %1574  ;;  %1784 = vrot.lane.b32.xlu0 %v10165_v25, %s8690_s21 }
 0x340   : > { %12047 = vst [vmem:[#allocation136_spill] sm:$0xff] %v10223_v0 }
 0x341   : > { %1846 = vrot.lane.b32.xlu1 %v10099_v3, %s8690_s21  ;;  %v10229_v31 = vpop.permute.xlu0 %1684 }
 0x343   : > { %v10231_v56 = vpop.permute.xlu1 %1778  ;;  %1864 = vrot.lane.b32.xlu0 %v10173_v19, %s8690_s21  ;;  %v1886_v19 = vcombine.low %v9637_v16, %v9714_v33  ;;  %v1920_v33 = vcombine.low %v9741_v7, %v9818_v8  ;;  %v1954_v7 = vcombine.low %v9858_v32, %v9930_v54 }
 0x344   : > { %12048 = vst [vmem:[#allocation137_spill] sm:$0xff] %v10231_v56 }
 0x345   : > { %1770 = vrot.lane.b32.xlu1 %v10141_v15, %s8690_s21  ;;  %v10237_v40 = vpop.permute.xlu0 %1688  ;;  %v1900_v2 = vrot.slane %v1886_v19, %v9220_v11  ;;  %v1934_v19 = vrot.slane %v1920_v33, %v9220_v11  ;;  %v12057_v33 = vld [vmem:[#allocation33_spill] sm:$0xff] }
 0x347   : > { %v10239_v1 = vpop.permute.xlu1 %1858  ;;  %1796 = vrot.lane.b32.xlu0 %v10181_v10, %s8690_s21 }
 0x348   : > { %12049 = vst [vmem:[#allocation138_spill] sm:$0xff] %v10239_v1 }
 0x349   : > { %1850 = vrot.lane.b32.xlu1 %v10149_v53, %s8690_s21  ;;  %v10245_v25 = vpop.permute.xlu0 %1620 }
 0x34b   : > { %v10247_v51 = vpop.permute.xlu1 %1790  ;;  %1800 = vrot.lane.b32.xlu0 %v10213_v30, %s8690_s21 }
 0x34c   : > { %12050 = vst [vmem:[#allocation139_spill] sm:$0xff] %v10247_v51 }
 0x34d   : > { %1782 = vrot.lane.b32.xlu1 %v10159_v43, %s8690_s21  ;;  %v10253_v56 = vpop.permute.xlu0 %1700 }
 0x34f   : > { %v10255_v15 = vpop.permute.xlu1 %1578 }
 0x350   : > { %12051 = vst [vmem:[#allocation140_spill] sm:$0xff] %v10255_v15 }
 0x351   : > { %1862 = vrot.lane.b32.xlu1 %v10167_v37, %s8690_s21  ;;  %v10259_v10 = vpop.permute.xlu0 %1624 }
 0x353   : > { %v10261_v1 = vpop.permute.xlu1 %1794 }
 0x354   : > { %12052 = vst [vmem:[#allocation141_spill] sm:$0xff] %v10261_v1 }
 0x355   : > { %1786 = vrot.lane.b32.xlu1 %v10207_v18, %s8690_s21  ;;  %v10265_v51 = vpop.permute.xlu0 %1704 }
 0x357   : > { %v10267_v30 = vpop.permute.xlu1 %1686 }
 0x359   : > { %1866 = vrot.lane.b32.xlu1 %v10215_v44, %s8690_s21  ;;  %v10271_v43 = vpop.permute.xlu0 %1636  ;;  %v1885_v44 = vcombine.low %v9572_v34, %v9639_v55  ;;  %v1919_v34 = vcombine.low %v9663_v50, %v9735_v47  ;;  %v1953_v50 = vcombine.low %v9767_v5, %v9839_v23 }
 0x35b   : > { %v10273_v63 = vpop.permute.xlu1 %1690  ;;  %v1893_v12 = vrot.slane %v1885_v44, %v9220_v11  ;;  %v1927_v44 = vrot.slane %v1919_v34, %v9220_v11  ;;  %v1970_v34 = vcombine.low %v12057_v33, %v9584_v58 }
 0x35d   : > { %1798 = vrot.lane.b32.xlu1 %v10223_v0, %s8690_s21  ;;  %v10277_v4 = vpop.permute.xlu0 %1716  ;;  %v1935_v8 = vcombine.low %v1927_v44, %v1934_v19  ;;  %v1961_v19 = vrot.slane %v1953_v50, %v9220_v11  ;;  %v12058_v44 = vld [vmem:[#allocation28_spill] sm:$0xff]  ;;  %v2005_v50 = vcombine.low %v9694_v39, %v9756_v17  ;;  %v2157_v17 = vcombine.low %v9543_v42, %v9610_v48  ;;  %v12061_v48 = vld [vmem:[#allocation53_spill] sm:$0xff] }
 0x35e   : > { %12053 = vst [vmem:[#allocation142_spill] sm:$0xff] %v10277_v4  ;;  %v1901_v4 = vcombine.low %v1893_v12, %v1900_v2  ;;  %v1968_v12 = vrot.slane %v1954_v7, %v9220_v11  ;;  %v2038_v42 = vcombine.low %v12061_v48, %v9787_v41  ;;  %v12065_v41 = vld [vmem:[#allocation37_spill] sm:$0xff] }
 0x35f   : > { %v10279_v1 = vpop.permute.xlu1 %1622 }
 0x360   : > { %v1969_v23 = vcombine.low %v1961_v19, %v1968_v12  ;;  %v2004_v12 = vcombine.low %v9616_v62, %v9683_v22  ;;  %v2021_v62 = vcombine.low %v10245_v25, %v10279_v1  ;;  %v12062_v25 = vld [vmem:[#allocation21_spill] sm:$0xff]  ;;  %v12063_v1 = vld [vmem:[#allocation22_spill] sm:$0xff] }
 0x361   : > { %1802 = vrot.lane.b32.xlu1 %v10255_v15, %s8690_s21  ;;  %v10283_v18 = vpop.permute.xlu0 %1640  ;;  %v12054_v15 = vcombine.low %v9276_v61, %v9279_v27  ;;  %v12055_v27 = vld [vmem:[#allocation25_spill] sm:$0xff] }
 0x362   : > { %v12056_v61 = vcombine.low %v9339_v57, %v12055_v27  ;;  %v12059_v27 = vld [vmem:[#allocation29_spill] sm:$0xff]  ;;  %v2012_v22 = vrot.slane %v2004_v12, %v9220_v11 }
 0x363   : > { %v10285_v37 = vpop.permute.xlu1 %1702  ;;  %v12060_v32 = vcombine.low %v12058_v44, %v12059_v27  ;;  %v2039_v44 = vcombine.low %v9798_v29, %v9860_v24  ;;  %v2029_v27 = vrot.slane %v2021_v62, %v9220_v11 }
 0x365   : > { %v10291_v53 = vpop.permute.xlu0 %1720  ;;  %v2053_v29 = vrot.slane %v2039_v44, %v9220_v11  ;;  %v12073_v44 = vld [vmem:[#allocation65_spill] sm:$0xff] }
 0x367   : > { %v1627_v0 = vpop.permute.xlu1 %1626 }
 0x369   : > { %3020 = vxpose.xlu0.b32.start [1/16] (narrow) %v12054_v15, 16  ;;  %v10302_v16 = vpop.permute.xlu0 %1652 }
 0x36b   : > { %v10298_v3 = vpop.permute.xlu1 %1706 }
 0x36d   : > { %3021 = vxpose.xlu0.b32.cont [2/16] (narrow) %v1901_v4, 16  ;;  %v10313_v2 = vpop.permute.xlu0 %1732  ;;  %v1971_v4 = vcombine.low %v9621_v20, %v9688_v14  ;;  %v1988_v20 = vcombine.low %v9988_v38, %v10035_v59  ;;  %v1978_v14 = vrot.slane %v1970_v34, %v9220_v11  ;;  %v2022_v34 = vcombine.low %v10259_v10, %v1627_v0 }
 0x36e   : > { %v2165_v0 = vrot.slane %v2157_v17, %v9220_v11 }
 0x36f   : > { %v10306_v55 = vpop.permute.xlu1 %1638  ;;  %v1985_v5 = vrot.slane %v1971_v4, %v9220_v11  ;;  %v2002_v4 = vrot.slane %v1988_v20, %v9220_v11  ;;  %v2036_v10 = vrot.slane %v2022_v34, %v9220_v11  ;;  %v12069_v34 = vld [vmem:[#allocation64_spill] sm:$0xff] }
 0x371   : > { %3022 = vxpose.xlu0.b32.cont [3/16] (narrow) %v12056_v61, 16  ;;  %v10324_v57 = vpop.permute.xlu0 %1812  ;;  %v1987_v61 = vcombine.low %v9884_v28, %v9946_v26  ;;  %v1986_v7 = vcombine.low %v1978_v14, %v1985_v5  ;;  %v2158_v28 = vcombine.low %v9564_v6, %v9631_v13  ;;  %v2019_v26 = vrot.slane %v2005_v50, %v9220_v11 }
 0x372   : > { %v2192_v5 = vcombine.low %v9650_v46, %v9727_v60  ;;  %v2037_v20 = vcombine.low %v2029_v27, %v2036_v10  ;;  %v2046_v50 = vrot.slane %v2038_v42, %v9220_v11  ;;  %v12074_v10 = vld [vmem:[#allocation58_spill] sm:$0xff] }
 0x373   : > { %v10315_v15 = vpop.permute.xlu1 %1718  ;;  %v1995_v38 = vrot.slane %v1987_v61, %v9220_v11  ;;  %v2172_v6 = vrot.slane %v2158_v28, %v9220_v11  ;;  %v2020_v13 = vcombine.low %v2012_v22, %v2019_v26  ;;  %v12067_v28 = vld [vmem:[#allocation74_spill] sm:$0xff]  ;;  %v12071_v22 = vld [vmem:[#allocation24_spill] sm:$0xff] }
 0x374   : > { %v2206_v46 = vrot.slane %v2192_v5, %v9220_v11  ;;  %v2054_v12 = vcombine.low %v2046_v50, %v2053_v29  ;;  %v12078_v50 = vld [vmem:[#allocation90_spill] sm:$0xff] }
 0x375   : > { %3023 = vxpose.xlu0.b32.cont [4/16] (narrow) %v1935_v8, 16  ;;  %v10340_v58 = vpop.permute.xlu0 %1656  ;;  %v2003_v33 = vcombine.low %v1995_v38, %v2002_v4  ;;  %v2173_v61 = vcombine.low %v2165_v0, %v2172_v6  ;;  %v2055_v4 = vcombine.low %v10271_v43, %v10306_v55  ;;  %v12066_v38 = vld [vmem:[#allocation82_spill] sm:$0xff]  ;;  %v12070_v55 = vld [vmem:[#allocation23_spill] sm:$0xff]  ;;  %v2226_v0 = vcombine.low %v12074_v10, %v12073_v44  ;;  %v12086_v10 = vld [vmem:[#allocation45_spill] sm:$0xff] }
 0x376   : > { %v2073_v26 = vcombine.low %v12067_v28, %v12066_v38  ;;  %v12072_v62 = vcombine.low %v12070_v55, %v12071_v22  ;;  %v12082_v28 = vld [vmem:[#allocation26_spill] sm:$0xff]  ;;  %v12085_v22 = vld [vmem:[#allocation61_spill] sm:$0xff] }
 0x377   : > { %v1643_v47 = vpop.permute.xlu1 %1642  ;;  %v2063_v43 = vrot.slane %v2055_v4, %v9220_v11 }
 0x378   : > { %v2056_v14 = vcombine.low %v10283_v18, %v1643_v47  ;;  %v2087_v48 = vrot.slane %v2073_v26, %v9220_v11 }
 0x379   : > { %3024 = vxpose.xlu0.b32.cont [5/16] (narrow) %v12060_v32, 16  ;;  %v10356_v19 = vpop.permute.xlu0 %1736  ;;  %v12064_v32 = vcombine.low %v12062_v25, %v12063_v1  ;;  %v12075_v25 = vld [vmem:[#allocation56_spill] sm:$0xff]  ;;  %v12076_v1 = vld [vmem:[#allocation47_spill] sm:$0xff] }
 0x37a   : > { %v2070_v18 = vrot.slane %v2056_v14, %v9220_v11 }
 0x37b   : > { %v10332_v54 = vpop.permute.xlu1 %1722 }
 0x37c   : > { %v2071_v42 = vcombine.low %v2063_v43, %v2070_v18 }
 0x37d   : > { %3025 = vxpose.xlu0.b32.cont [6/16] (narrow) %v1969_v23, 16  ;;  %v10378_v23 = vpop.permute.xlu0 %1668 }
 0x37f   : > { %v10342_v8 = vpop.permute.xlu1 %1654 }
 0x380   : > { %v2089_v29 = vcombine.low %v10302_v16, %v10342_v8  ;;  %v12081_v8 = vld [vmem:[#allocation27_spill] sm:$0xff] }
 0x381   : > { %3026 = vxpose.xlu0.b32.cont [7/16] (narrow) %v1986_v7, 16  ;;  %v2191_v7 = vcombine.low %v12065_v41, %v9652_v9  ;;  %v10394_v9 = vpop.permute.xlu0 %1816  ;;  %v12083_v26 = vcombine.low %v12081_v8, %v12082_v28  ;;  %v12096_v8 = vld [vmem:[#allocation32_spill] sm:$0xff]  ;;  %v2293_v28 = vcombine.low %v10229_v31, %v10267_v30  ;;  %v12100_v31 = vld [vmem:[#allocation50_spill] sm:$0xff] }
 0x382   : > { %v2097_v16 = vrot.slane %v2089_v29, %v9220_v11  ;;  %v12091_v29 = vld [vmem:[#allocation31_spill] sm:$0xff]  ;;  %v12101_v30 = vld [vmem:[#allocation42_spill] sm:$0xff] }
 0x383   : > { %v10350_v59 = vpop.permute.xlu1 %1734  ;;  %v2199_v47 = vrot.slane %v2191_v7, %v9220_v11  ;;  %v12077_v7 = vld [vmem:[#allocation99_spill] sm:$0xff] }
 0x385   : > { %3027 = vxpose.xlu0.b32.cont [8/16] (narrow) %v2003_v33, 16  ;;  %v12068_v33 = vld [vmem:[#allocation70_spill] sm:$0xff] }
 0x386   : > { %v2072_v17 = vcombine.low %v12069_v34, %v12068_v33 }
 0x387   : > { %v10363_v39 = vpop.permute.xlu1 %1814 }
 0x388   : > { %v2080_v5 = vrot.slane %v2072_v17, %v9220_v11 }
 0x389   : > { %3028 = vxpose.xlu0.b32.cont [9/16] (narrow) %v2020_v13, 16  ;;  %v2207_v13 = vcombine.low %v2199_v47, %v2206_v46  ;;  %v12079_v46 = vld [vmem:[#allocation85_spill] sm:$0xff]  ;;  %v12084_v47 = vld [vmem:[#allocation68_spill] sm:$0xff] }
 0x38a   : > { %3052 = vxpose.xlu1.b32.start [1/16] (narrow) %v12064_v32, 16  ;;  %v2225_v32 = vcombine.low %v12076_v1, %v12075_v25  ;;  %v2088_v41 = vcombine.low %v2080_v5, %v2087_v48  ;;  %v2260_v33 = vcombine.low %v12084_v47, %v9938_v49  ;;  %v12089_v25 = vld [vmem:[#allocation35_spill] sm:$0xff] }
 0x38b   : > { %v1659_v24 = vpop.permute.xlu1 %1658 }
 0x38c   : > { %v2090_v27 = vcombine.low %v10340_v58, %v1659_v24  ;;  %v2107_v58 = vcombine.low %v12078_v50, %v12077_v7  ;;  %v2233_v4 = vrot.slane %v2225_v32, %v9220_v11  ;;  %v2274_v49 = vrot.slane %v2260_v33, %v9220_v11  ;;  %v12094_v7 = vld [vmem:[#allocation36_spill] sm:$0xff] }
 0x38d   : > { %3029 = vxpose.xlu0.b32.cont [10/16] (narrow) %v2037_v20, 16  ;;  %v10411_v20 = vpop.permute.xlu0 %1748 }
 0x38e   : > { %3053 = vxpose.xlu1.b32.cont [2/16] (narrow) %v2173_v61, 16  ;;  %v2240_v61 = vrot.slane %v2226_v0, %v9220_v11  ;;  %v2104_v24 = vrot.slane %v2090_v27, %v9220_v11  ;;  %v2121_v34 = vrot.slane %v2107_v58, %v9220_v11  ;;  %v12087_v0 = vld [vmem:[#allocation39_spill] sm:$0xff]  ;;  %v12088_v27 = vld [vmem:[#allocation41_spill] sm:$0xff] }
 0x38f   : > { %v10388_v60 = vpop.permute.xlu1 %1738  ;;  %v2277_v48 = vcombine.low %v12087_v0, %v12086_v10  ;;  %v2276_v1 = vcombine.low %v12089_v25, %v12088_v27  ;;  %v2310_v0 = vcombine.low %v12101_v30, %v12100_v31  ;;  %v2301_v25 = vrot.slane %v2293_v28, %v9220_v11 }
 0x390   : > { %v2105_v17 = vcombine.low %v2097_v16, %v2104_v24  ;;  %v2241_v43 = vcombine.low %v2233_v4, %v2240_v61  ;;  %v12095_v16 = vld [vmem:[#allocation34_spill] sm:$0xff] }
 0x391   : > { %3030 = vxpose.xlu0.b32.cont [11/16] (narrow) %v2054_v12, 16  ;;  %v12080_v12 = vld [vmem:[#allocation76_spill] sm:$0xff]  ;;  %v10431_v55 = vpop.permute.xlu0 %1828  ;;  %v2291_v4 = vrot.slane %v2277_v48, %v9220_v11 }
 0x392   : > { %3054 = vxpose.xlu1.b32.cont [3/16] (narrow) %v12072_v62, 16  ;;  %v2106_v38 = vcombine.low %v12080_v12, %v12079_v46  ;;  %v2259_v62 = vcombine.low %v12085_v22, %v9847_v52  ;;  %v12090_v52 = vld [vmem:[#allocation30_spill] sm:$0xff]  ;;  %v2294_v46 = vcombine.low %v10237_v40, %v10273_v63  ;;  %v12099_v22 = vld [vmem:[#allocation77_spill] sm:$0xff] }
 0x393   : > { %v1671_v6 = vpop.permute.xlu1 %1670  ;;  %v12092_v61 = vcombine.low %v12090_v52, %v12091_v29 }
 0x394   : > { %v2267_v32 = vrot.slane %v2259_v62, %v9220_v11  ;;  %v2123_v5 = vcombine.low %v10378_v23, %v1671_v6  ;;  %v2684_v23 = vcombine.low %v12096_v8, %v12095_v16  ;;  %v2284_v6 = vrot.slane %v2276_v1, %v9220_v11  ;;  %v12103_v1 = vld [vmem:[#allocation59_spill] sm:$0xff] }
 0x395   : > { %3031 = vxpose.xlu0.b32.cont [12/16] (narrow) %v2071_v42, 16  ;;  %v1673_v58 = vpop.permute.xlu0 %1672  ;;  %v2702_v62 = vcombine.low %v12099_v22, %v10006_v45  ;;  %v12114_v22 = vld [vmem:[#allocation6_spill] sm:$0xff] }
 0x396   : > { %3055 = vxpose.xlu1.b32.cont [4/16] (narrow) %v2207_v13, 16  ;;  %v2114_v13 = vrot.slane %v2106_v38, %v9220_v11  ;;  %v2275_v38 = vcombine.low %v2267_v32, %v2274_v49  ;;  %v2692_v49 = vrot.slane %v2684_v23, %v9220_v11  ;;  %v12104_v32 = vld [vmem:[#allocation49_spill] sm:$0xff]  ;;  %v12109_v23 = vld [vmem:[#allocation92_spill] sm:$0xff] }
 0x397   : > { %v10413_v14 = vpop.permute.xlu1 %1818  ;;  %v2719_v45 = vcombine.low %v12104_v32, %v12103_v1  ;;  %v2716_v52 = vrot.slane %v2702_v62, %v9220_v11  ;;  %v12117_v32 = vld [vmem:[#allocation142_spill] sm:$0xff] }
 0x398   : > { %v2122_v42 = vcombine.low %v2114_v13, %v2121_v34  ;;  %v12097_v34 = vld [vmem:[#allocation60_spill] sm:$0xff]  ;;  %v2308_v13 = vrot.slane %v2294_v46, %v9220_v11  ;;  %v2327_v46 = vcombine.low %v10253_v56, %v10285_v37  ;;  %v12111_v37 = vld [vmem:[#allocation55_spill] sm:$0xff] }
 0x399   : > { %3032 = vxpose.xlu0.b32.cont [13/16] (narrow) %v2088_v41, 16  ;;  %v12093_v41 = vld [vmem:[#allocation43_spill] sm:$0xff]  ;;  %v10470_v48 = vpop.permute.xlu0 %1752 }
 0x39a   : > { %3056 = vxpose.xlu1.b32.cont [5/16] (narrow) %v12083_v26, 16  ;;  %v2685_v50 = vcombine.low %v12094_v7, %v12093_v41  ;;  %v2131_v26 = vrot.slane %v2123_v5, %v9220_v11  ;;  %v2309_v29 = vcombine.low %v2301_v25, %v2308_v13  ;;  %v12105_v7 = vld [vmem:[#allocation46_spill] sm:$0xff] }
 0x39b   : > { %v10426_v18 = vpop.permute.xlu1 %1750 }
 0x39c   : > { %v2699_v33 = vrot.slane %v2685_v50, %v9220_v11  ;;  %v12106_v50 = vld [vmem:[#allocation40_spill] sm:$0xff] }
 0x39d   : > { %3033 = vxpose.xlu0.b32.cont [14/16] (narrow) %v2105_v17, 16  ;;  %v12098_v17 = vld [vmem:[#allocation51_spill] sm:$0xff]  ;;  %v10491_v16 = vpop.permute.xlu0 %1832 }
 0x39e   : > { %3057 = vxpose.xlu1.b32.cont [6/16] (narrow) %v2241_v43, 16  ;;  %v2311_v63 = vcombine.low %v12098_v17, %v12097_v34  ;;  %v2292_v43 = vcombine.low %v2284_v6, %v2291_v4  ;;  %v2700_v41 = vcombine.low %v2692_v49, %v2699_v33  ;;  %v2736_v6 = vcombine.low %v12109_v23, %v10083_v35  ;;  %v12110_v33 = vld [vmem:[#allocation62_spill] sm:$0xff]  ;;  %v12112_v34 = vld [vmem:[#allocation81_spill] sm:$0xff]  ;;  %v12115_v49 = vld [vmem:[#allocation11_spill] sm:$0xff] }
 0x39f   : > { %v10436_v44 = vpop.permute.xlu1 %1830  ;;  %v2344_v56 = vcombine.low %v12111_v37, %v12110_v33  ;;  %v2735_v17 = vcombine.low %v12112_v34, %v10027_v36  ;;  %v12116_v36 = vld [vmem:[#allocation54_spill] sm:$0xff]  ;;  %v2396_v34 = vcombine.low %v10356_v19, %v10388_v60 }
 0x3a0   : > { %v2325_v5 = vrot.slane %v2311_v63, %v9220_v11  ;;  %v2335_v63 = vrot.slane %v2327_v46, %v9220_v11  ;;  %v2750_v31 = vrot.slane %v2736_v6, %v9220_v11  ;;  %v12122_v46 = vld [vmem:[#allocation106_spill] sm:$0xff] }
 0x3a1   : > { %3034 = vxpose.xlu0.b32.cont [15/16] (narrow) %v2122_v42, 16  ;;  %v12102_v42 = vld [vmem:[#allocation67_spill] sm:$0xff]  ;;  %v2352_v25 = vrot.slane %v2344_v56, %v9220_v11  ;;  %v2743_v1 = vrot.slane %v2735_v17, %v9220_v11 }
 0x3a2   : > { %3058 = vxpose.xlu1.b32.cont [7/16] (narrow) %v12092_v61, 16  ;;  %v2701_v27 = vcombine.low %v12102_v42, %v9922_v21  ;;  %v2328_v61 = vcombine.low %v10265_v51, %v10298_v3  ;;  %v2318_v21 = vrot.slane %v2310_v0, %v9220_v11  ;;  %v12107_v51 = vld [vmem:[#allocation69_spill] sm:$0xff]  ;;  %v12108_v3 = vld [vmem:[#allocation63_spill] sm:$0xff]  ;;  %v2362_v0 = vcombine.low %v10291_v53, %v10332_v54 }
 0x3a3   : > { %v1675_v24 = vpop.permute.xlu1 %1674  ;;  %v2345_v8 = vcombine.low %v12108_v3, %v12107_v51  ;;  %v2752_v42 = vcombine.low %v12116_v36, %v12115_v49  ;;  %v12124_v51 = vld [vmem:[#allocation80_spill] sm:$0xff]  ;;  %v12129_v17 = vld [vmem:[#allocation71_spill] sm:$0xff]  ;;  %v12133_v36 = vld [vmem:[#allocation134_spill] sm:$0xff] }
 0x3a4   : > { %v2124_v12 = vcombine.low %v1673_v58, %v1675_v24  ;;  %v2718_v58 = vcombine.low %v12106_v50, %v12105_v7  ;;  %v2709_v4 = vrot.slane %v2701_v27, %v9220_v11  ;;  %v2342_v28 = vrot.slane %v2328_v61, %v9220_v11  ;;  %v10514_v27 = vpop.permute.xlu0 %1764  ;;  %v12119_v61 = vld [vmem:[#allocation75_spill] sm:$0xff]  ;;  %v12125_v3 = vld [vmem:[#allocation12_spill] sm:$0xff] }
 0x3a5   : > { %v2376_v54 = vrot.slane %v2362_v0, %v9220_v11  ;;  %v2760_v7 = vrot.slane %v2752_v42, %v9220_v11  ;;  %v12134_v42 = vld [vmem:[#allocation123_spill] sm:$0xff] }
 0x3a6   : > { %v2138_v47 = vrot.slane %v2124_v12, %v9220_v11  ;;  %3059 = vxpose.xlu1.b32.cont [8/16] (narrow) %v2275_v38, 16  ;;  %v2733_v12 = vrot.slane %v2719_v45, %v9220_v11  ;;  %v2326_v38 = vcombine.low %v2318_v21, %v2325_v5  ;;  %v2343_v30 = vcombine.low %v2335_v63, %v2342_v28  ;;  %v12121_v21 = vld [vmem:[#allocation66_spill] sm:$0xff]  ;;  %v12130_v63 = vld [vmem:[#allocation8_spill] sm:$0xff] }
 0x3a7   : > { %v10463_v40 = vpop.permute.xlu1 %1754  ;;  %v2361_v45 = vcombine.low %v12117_v32, %v10315_v15  ;;  %v12123_v15 = vld [vmem:[#allocation96_spill] sm:$0xff] }
 0x3a8   : > { %v2139_v10 = vcombine.low %v2131_v26, %v2138_v47  ;;  %v2717_v26 = vcombine.low %v2709_v4, %v2716_v52  ;;  %v2726_v47 = vrot.slane %v2718_v58, %v9220_v11  ;;  %v12120_v58 = vld [vmem:[#allocation73_spill] sm:$0xff]  ;;  %v10534_v23 = vpop.permute.xlu0 %1844  ;;  %v12135_v32 = vld [vmem:[#allocation44_spill] sm:$0xff] }
 0x3a9   : > { %v2378_v4 = vcombine.low %v12121_v21, %v12120_v58  ;;  %v12141_v21 = vld [vmem:[#allocation101_spill] sm:$0xff] }
 0x3aa   : > { %3060 = vxpose.xlu1.b32.cont [9/16] (narrow) %v2292_v43, 16  ;;  %3035 = vxpose.xlu0.b32.end [16/16] (narrow) %v2139_v10, 16  ;;  %v12113_v43 = vld [vmem:[#allocation15_spill] sm:$0xff]  ;;  %v2734_v35 = vcombine.low %v2726_v47, %v2733_v12  ;;  %v2359_v10 = vrot.slane %v2345_v8, %v9220_v11  ;;  %v2769_v12 = vcombine.low %v12123_v15, %v12122_v46  ;;  %v12127_v47 = vld [vmem:[#allocation118_spill] sm:$0xff] }
 0x3ab   : > { %v10485_v24 = vpop.permute.xlu1 %1834  ;;  %v2753_v62 = vcombine.low %v12114_v22, %v12113_v43  ;;  %v2787_v8 = vcombine.low %v12125_v3, %v12124_v51  ;;  %v2786_v43 = vcombine.low %v12130_v63, %v12129_v17  ;;  %v2386_v22 = vrot.slane %v2378_v4, %v9220_v11  ;;  %v12142_v4 = vld [vmem:[#allocation91_spill] sm:$0xff]  ;;  %v12144_v3 = vld [vmem:[#allocation72_spill] sm:$0xff] }
 0x3ac   : > { %v2360_v52 = vcombine.low %v2352_v25, %v2359_v10  ;;  %v12131_v10 = vld [vmem:[#allocation57_spill] sm:$0xff]  ;;  %v2804_v25 = vcombine.low %v12134_v42, %v12133_v36  ;;  %v2430_v46 = vcombine.low %v12142_v4, %v12141_v21  ;;  %v12143_v51 = vld [vmem:[#allocation79_spill] sm:$0xff]  ;;  %v2837_v36 = vcombine.low %v10324_v57, %v10363_v39 }
 0x3ad   : > { %v2767_v5 = vrot.slane %v2753_v62, %v9220_v11  ;;  %v2777_v62 = vrot.slane %v2769_v12, %v9220_v11  ;;  %v2801_v0 = vrot.slane %v2787_v8, %v9220_v11  ;;  %v2820_v8 = vcombine.low %v12144_v3, %v12143_v51  ;;  %v12155_v57 = vld [vmem:[#allocation97_spill] sm:$0xff]  ;;  %v12156_v39 = vld [vmem:[#allocation87_spill] sm:$0xff] }
 0x3ae   : > { %3061 = vxpose.xlu1.b32.cont [10/16] (narrow) %v2309_v29, 16  ;;  %3116 = vxpose.xlu0.b32.start [1/16] (narrow) %v2700_v41, 16  ;;  %v12118_v29 = vld [vmem:[#allocation83_spill] sm:$0xff]  ;;  %v2751_v41 = vcombine.low %v2743_v1, %v2750_v31  ;;  %v12132_v31 = vld [vmem:[#allocation48_spill] sm:$0xff]  ;;  %v2410_v1 = vrot.slane %v2396_v34, %v9220_v11  ;;  %v2818_v15 = vrot.slane %v2804_v25, %v9220_v11  ;;  %v12148_v34 = vld [vmem:[#allocation5_spill] sm:$0xff] }
 0x3af   : > { %v10506_v13 = vpop.permute.xlu1 %1766  ;;  %v2379_v53 = vcombine.low %v12119_v61, %v12118_v29  ;;  %v2768_v6 = vcombine.low %v2760_v7, %v2767_v5  ;;  %v12138_v29 = vld [vmem:[#allocation111_spill] sm:$0xff]  ;;  %v12140_v7 = vld [vmem:[#allocation84_spill] sm:$0xff]  ;;  %v2845_v21 = vrot.slane %v2837_v36, %v9220_v11  ;;  %v12168_v36 = vld [vmem:[#allocation109_spill] sm:$0xff] }
 0x3b0   : > { %v12159_v4 = vld [vmem:[#allocation19_spill] sm:$0xff] }
 0x3b1   : > { %v2393_v28 = vrot.slane %v2379_v53, %v9220_v11 }
 0x3b2   : > { %3062 = vxpose.xlu1.b32.cont [11/16] (narrow) %v2326_v38, 16  ;;  %3117 = vxpose.xlu0.b32.cont [2/16] (narrow) %v2717_v26, 16  ;;  %v2369_v38 = vrot.slane %v2361_v45, %v9220_v11  ;;  %v12126_v26 = vld [vmem:[#allocation107_spill] sm:$0xff]  ;;  %v12136_v45 = vld [vmem:[#allocation38_spill] sm:$0xff] }
 0x3b3   : > { %v10525_v50 = vpop.permute.xlu1 %1846  ;;  %v12128_v33 = vcombine.low %v12126_v26, %v12127_v47  ;;  %v2394_v19 = vcombine.low %v2386_v22, %v2393_v28  ;;  %v2412_v5 = vcombine.low %v12136_v45, %v12135_v32  ;;  %v12145_v26 = vld [vmem:[#allocation88_spill] sm:$0xff]  ;;  %v12146_v47 = vld [vmem:[#allocation78_spill] sm:$0xff]  ;;  %v2444_v22 = vrot.slane %v2430_v46, %v9220_v11 }
 0x3b4   : > { %v2377_v56 = vcombine.low %v2369_v38, %v2376_v54  ;;  %v12153_v45 = vld [vmem:[#allocation116_spill] sm:$0xff]  ;;  %v12160_v46 = vld [vmem:[#allocation10_spill] sm:$0xff] }
 0x3b5   : > { %v2784_v37 = vrot.slane %v12128_v33, %v9220_v11  ;;  %v2420_v28 = vrot.slane %v2412_v5, %v9220_v11  ;;  %v2429_v33 = vcombine.low %v12146_v47, %v12145_v26  ;;  %v12154_v5 = vld [vmem:[#allocation105_spill] sm:$0xff]  ;;  %v12162_v26 = vld [vmem:[#allocation7_spill] sm:$0xff] }
 0x3b6   : > { %3063 = vxpose.xlu1.b32.cont [12/16] (narrow) %v2343_v30, 16  ;;  %3118 = vxpose.xlu0.b32.cont [3/16] (narrow) %v2734_v35, 16  ;;  %v2395_v35 = vcombine.low %v10313_v2, %v10350_v59  ;;  %v2413_v30 = vcombine.low %v12132_v31, %v12131_v10  ;;  %v10559_v2 = vpop.permute.xlu0 %1768  ;;  %v2794_v59 = vrot.slane %v2786_v43, %v9220_v11  ;;  %v12149_v31 = vld [vmem:[#allocation9_spill] sm:$0xff] }
 0x3b7   : > { %v10552_v49 = vpop.permute.xlu1 %1770  ;;  %v2785_v60 = vcombine.low %v2777_v62, %v2784_v37  ;;  %v2838_v62 = vcombine.low %v10394_v9, %v10413_v14  ;;  %v12151_v9 = vld [vmem:[#allocation110_spill] sm:$0xff]  ;;  %v12152_v14 = vld [vmem:[#allocation100_spill] sm:$0xff] }
 0x3b8   : > { %v2403_v53 = vrot.slane %v2395_v35, %v9220_v11  ;;  %v2427_v54 = vrot.slane %v2413_v30, %v9220_v11  ;;  %v2802_v38 = vcombine.low %v2794_v59, %v2801_v0  ;;  %v12150_v30 = vld [vmem:[#allocation52_spill] sm:$0xff]  ;;  %v2855_v32 = vcombine.low %v12152_v14, %v12151_v9 }
 0x3b9   : > { %v2446_v0 = vcombine.low %v12150_v30, %v12149_v31  ;;  %v2464_v59 = vcombine.low %v12154_v5, %v12153_v45 }
 0x3ba   : > { %3064 = vxpose.xlu1.b32.cont [13/16] (narrow) %v2360_v52, 16  ;;  %3119 = vxpose.xlu0.b32.cont [4/16] (narrow) %v2751_v41, 16  ;;  %v12137_v52 = vld [vmem:[#allocation122_spill] sm:$0xff]  ;;  %v12139_v41 = vld [vmem:[#allocation93_spill] sm:$0xff]  ;;  %v2411_v12 = vcombine.low %v2403_v53, %v2410_v1  ;;  %v10582_v43 = vpop.permute.xlu0 %1848  ;;  %v2428_v35 = vcombine.low %v2420_v28, %v2427_v54  ;;  %v2854_v54 = vcombine.low %v12156_v39, %v12155_v57  ;;  %v12173_v39 = vld [vmem:[#allocation103_spill] sm:$0xff] }
 0x3bb   : > { %v2803_v61 = vcombine.low %v12138_v29, %v12137_v52  ;;  %v2821_v58 = vcombine.low %v12140_v7, %v12139_v41  ;;  %v2852_v52 = vrot.slane %v2838_v62, %v9220_v11  ;;  %v12157_v41 = vld [vmem:[#allocation104_spill] sm:$0xff]  ;;  %v12158_v7 = vld [vmem:[#allocation94_spill] sm:$0xff]  ;;  %v2478_v51 = vrot.slane %v2464_v59, %v9220_v11 }
 0x3bc   : > { %v12161_v28 = vld [vmem:[#allocation18_spill] sm:$0xff] }
 0x3bd   : > { %v2811_v37 = vrot.slane %v2803_v61, %v9220_v11  ;;  %v2835_v63 = vrot.slane %v2821_v58, %v9220_v11  ;;  %v2454_v61 = vrot.slane %v2446_v0, %v9220_v11  ;;  %v2463_v58 = vcombine.low %v12158_v7, %v12157_v41 }
 0x3be   : > { %3065 = vxpose.xlu1.b32.cont [14/16] (narrow) %v2377_v56, 16  ;;  %3120 = vxpose.xlu0.b32.cont [5/16] (narrow) %v2768_v6, 16  ;;  %v10573_v6 = vpop.permute.xlu1 %1850  ;;  %v12147_v56 = vld [vmem:[#allocation13_spill] sm:$0xff]  ;;  %v10602_v53 = vpop.permute.xlu0 %1780  ;;  %v2853_v3 = vcombine.low %v2845_v21, %v2852_v52  ;;  %v2480_v47 = vcombine.low %v12162_v26, %v12161_v28 }
 0x3bf   : > { %v2447_v17 = vcombine.low %v12148_v34, %v12147_v56  ;;  %v2819_v10 = vcombine.low %v2811_v37, %v2818_v15  ;;  %v2481_v15 = vcombine.low %v12160_v46, %v12159_v4  ;;  %v2862_v37 = vrot.slane %v2854_v54, %v9220_v11  ;;  %v12174_v54 = vld [vmem:[#allocation114_spill] sm:$0xff] }
 0x3c0   : > { %v2471_v56 = vrot.slane %v2463_v58, %v9220_v11  ;;  %v2871_v34 = vcombine.low %v10431_v55, %v10436_v44  ;;  %v2906_v59 = vcombine.low %v10582_v43, %v10573_v6  ;;  %v12175_v41 = vcombine.low %v12173_v39, %v12174_v54  ;;  %v12176_v46 = vld [vmem:[#allocation138_spill] sm:$0xff] }
 0x3c1   : > { %v2461_v42 = vrot.slane %v2447_v17, %v9220_v11  ;;  %v2495_v17 = vrot.slane %v2481_v15, %v9220_v11  ;;  %v2905_v4 = vcombine.low %v10534_v23, %v10525_v50  ;;  %v12177_v15 = vld [vmem:[#allocation129_spill] sm:$0xff]  ;;  %v12182_v23 = vld [vmem:[#allocation136_spill] sm:$0xff] }
 0x3c2   : > { %3066 = vxpose.xlu1.b32.cont [15/16] (narrow) %v2394_v19, 16  ;;  %3121 = vxpose.xlu0.b32.cont [6/16] (narrow) %v2785_v60, 16  ;;  %v2828_v19 = vrot.slane %v2820_v8, %v9220_v11  ;;  %v2437_v60 = vrot.slane %v2429_v33, %v9220_v11  ;;  %v10594_v1 = vpop.permute.xlu1 %1782  ;;  %v2872_v8 = vcombine.low %v10491_v16, %v10485_v24  ;;  %v1861_v24 = vpop.permute.xlu0 %1860 }
 0x3c3   : > { %v2479_v0 = vcombine.low %v2471_v56, %v2478_v51  ;;  %v2879_v44 = vrot.slane %v2871_v34, %v9220_v11  ;;  %v2896_v7 = vrot.slane %v12175_v41, %v9220_v11  ;;  %v12179_v51 = vld [vmem:[#allocation133_spill] sm:$0xff]  ;;  %v12181_v56 = vld [vmem:[#allocation119_spill] sm:$0xff] }
 0x3c4   : > { %v2836_v25 = vcombine.low %v2828_v19, %v2835_v63  ;;  %v2445_v29 = vcombine.low %v2437_v60, %v2444_v22  ;;  %v12163_v63 = vld [vmem:[#allocation126_spill] sm:$0xff]  ;;  %v12164_v22 = vld [vmem:[#allocation115_spill] sm:$0xff]  ;;  %v2886_v30 = vrot.slane %v2872_v8, %v9220_v11  ;;  %v2488_v19 = vrot.slane %v2480_v47, %v9220_v11  ;;  %v12167_v60 = vld [vmem:[#allocation120_spill] sm:$0xff] }
 0x3c5   : > { %v2889_v62 = vcombine.low %v12164_v22, %v12163_v63  ;;  %v2497_v55 = vcombine.low %v12168_v36, %v12167_v60  ;;  %v2920_v8 = vrot.slane %v2906_v59, %v9220_v11  ;;  %v12183_v34 = vld [vmem:[#allocation125_spill] sm:$0xff]  ;;  %v2913_v63 = vrot.slane %v2905_v4, %v9220_v11  ;;  %v12184_v22 = vld [vmem:[#allocation108_spill] sm:$0xff]  ;;  %v12186_v60 = vld [vmem:[#allocation95_spill] sm:$0xff] }
 0x3c6   : > { %3067 = vxpose.xlu1.b32.end [16/16] (narrow) %v2411_v12, 16  ;;  %3122 = vxpose.xlu0.b32.cont [7/16] (narrow) %v2802_v38, 16  ;;  %v2462_v12 = vcombine.low %v2454_v61, %v2461_v42  ;;  %v2869_v38 = vrot.slane %v2855_v32, %v9220_v11  ;;  %v10617_v33 = vpop.permute.xlu1 %1862  ;;  %v12169_v42 = vld [vmem:[#allocation89_spill] sm:$0xff]  ;;  %v2887_v5 = vcombine.low %v2879_v44, %v2886_v30  ;;  %v12172_v61 = vld [vmem:[#allocation14_spill] sm:$0xff]  ;;  %v10647_v58 = vpop.permute.xlu0 %1784 }
 0x3c7   : > { %v2903_v14 = vrot.slane %v2889_v62, %v9220_v11  ;;  %v2496_v52 = vcombine.low %v2488_v19, %v2495_v17  ;;  %v2505_v21 = vrot.slane %v2497_v55, %v9220_v11  ;;  %v2531_v17 = vcombine.low %v12183_v34, %v12182_v23  ;;  %v12185_v62 = vld [vmem:[#allocation98_spill] sm:$0xff]  ;;  %v12196_v23 = vld [vmem:[#allocation141_spill] sm:$0xff]  ;;  %v12197_v34 = vld [vmem:[#allocation135_spill] sm:$0xff] }
 0x3c8   : > { %v2870_v16 = vcombine.low %v2862_v37, %v2869_v38  ;;  %v12178_v38 = vld [vmem:[#allocation140_spill] sm:$0xff]  ;;  %v12180_v37 = vld [vmem:[#allocation130_spill] sm:$0xff]  ;;  %v2600_v4 = vcombine.low %v10559_v2, %v10552_v49 }
 0x3c9   : > { %v2904_v43 = vcombine.low %v2896_v7, %v2903_v14  ;;  %v2922_v50 = vcombine.low %v12181_v56, %v12180_v37  ;;  %v12187_v36 = vld [vmem:[#allocation86_spill] sm:$0xff]  ;;  %v2633_v56 = vcombine.low %v10602_v53, %v10594_v1 }
 0x3ca   : > { %3084 = vxpose.xlu1.b32.start [1/16] (narrow) %v2428_v35, 16  ;;  %3123 = vxpose.xlu0.b32.cont [8/16] (narrow) %v2819_v10, 16  ;;  %v12165_v35 = vld [vmem:[#allocation132_spill] sm:$0xff]  ;;  %v12166_v10 = vld [vmem:[#allocation121_spill] sm:$0xff]  ;;  %v10636_v32 = vpop.permute.xlu1 %1786  ;;  %v2548_v55 = vcombine.low %v12187_v36, %v12186_v60 }
 0x3cb   : > { %v2498_v31 = vcombine.low %v12166_v10, %v12165_v35  ;;  %v1865_v35 = vpop.permute.xlu0 %1864  ;;  %v2930_v44 = vrot.slane %v2922_v50, %v9220_v11 }
 0x3cd   : > { %v2512_v45 = vrot.slane %v2498_v31, %v9220_v11 }
 0x3ce   : > { %3085 = vxpose.xlu1.b32.cont [2/16] (narrow) %v2445_v29, 16  ;;  %3124 = vxpose.xlu0.b32.cont [9/16] (narrow) %v2836_v25, 16  ;;  %v12170_v25 = vld [vmem:[#allocation17_spill] sm:$0xff]  ;;  %v12171_v29 = vld [vmem:[#allocation20_spill] sm:$0xff]  ;;  %v1867_v47 = vpop.permute.xlu1 %1866 }
 0x3cf   : > { %v2515_v9 = vcombine.low %v12170_v25, %v12169_v42  ;;  %v2514_v57 = vcombine.low %v12172_v61, %v12171_v29  ;;  %v2513_v28 = vcombine.low %v2505_v21, %v2512_v45  ;;  %v2940_v19 = vcombine.low %v1865_v35, %v1867_v47 }
 0x3d0   : > { %v2539_v42 = vrot.slane %v2531_v17, %v9220_v11  ;;  %v2939_v25 = vcombine.low %v1861_v24, %v10617_v33  ;;  %v2566_v45 = vcombine.low %v10470_v48, %v10463_v40  ;;  %v2565_v29 = vcombine.low %v10411_v20, %v10426_v18  ;;  %v12188_v24 = vld [vmem:[#allocation124_spill] sm:$0xff]  ;;  %v12191_v48 = vld [vmem:[#allocation102_spill] sm:$0xff] }
 0x3d1   : > { %v2529_v6 = vrot.slane %v2515_v9, %v9220_v11  ;;  %v2522_v26 = vrot.slane %v2514_v57, %v9220_v11  ;;  %v12189_v57 = vld [vmem:[#allocation113_spill] sm:$0xff]  ;;  %v12190_v40 = vld [vmem:[#allocation112_spill] sm:$0xff]  ;;  %v2651_v17 = vcombine.low %v12197_v34, %v12196_v23 }
 0x3d2   : > { %3086 = vxpose.xlu1.b32.cont [3/16] (narrow) %v2462_v12, 16  ;;  %3125 = vxpose.xlu0.b32.cont [10/16] (narrow) %v2853_v3, 16  ;;  %v2923_v12 = vcombine.low %v12177_v15, %v12176_v46  ;;  %v2532_v3 = vcombine.low %v12179_v51, %v12178_v38  ;;  %v2947_v61 = vrot.slane %v2939_v25, %v9220_v11  ;;  %v12192_v15 = vld [vmem:[#allocation137_spill] sm:$0xff]  ;;  %v1799_v47 = vpop.permute.xlu1 %1798  ;;  %v12200_v25 = vld [vmem:[#allocation16_spill] sm:$0xff] }
 0x3d3   : > { %v2530_v10 = vcombine.low %v2522_v26, %v2529_v6  ;;  %v2583_v39 = vcombine.low %v12189_v57, %v12188_v24  ;;  %v2580_v54 = vrot.slane %v2566_v45, %v9220_v11  ;;  %v2582_v7 = vcombine.low %v12191_v48, %v12190_v40  ;;  %v8636_v48 = vld [vmem:[%s11761_s4] sm:$0xff]  }
 0x3d4   : > { %v2937_v31 = vrot.slane %v2923_v12, %v9220_v11  ;;  %v2546_v30 = vrot.slane %v2532_v3, %v9220_v11  ;;  %v2573_v21 = vrot.slane %v2565_v29, %v9220_v11  ;;  %v12193_v12 = vld [vmem:[#allocation127_spill] sm:$0xff]  ;;  %v2614_v51 = vrot.slane %v2600_v4, %v9220_v11  ;;  %v12194_v3 = vld [vmem:[#allocation128_spill] sm:$0xff]  ;;  %v3175_v4 = vld [vmem:[%s10721_s25 + $0x38] sm:$0xff] }
 0x3d5   : > { %v2597_v20 = vrot.slane %v2583_v39, %v9220_v11  ;;  %v2590_v6 = vrot.slane %v2582_v7, %v9220_v11  ;;  %v2617_v38 = vcombine.low %v12193_v12, %v12192_v15  ;;  %v3173_v29 = vld [vmem:[%s10721_s25 + $0x28] sm:$0xff]  ;;  %v12206_v7 = vmov 0  }
 0x3d6   : > { %3087 = vxpose.xlu1.b32.cont [4/16] (narrow) %v2479_v0, 16  ;;  %3126 = vxpose.xlu0.b32.cont [11/16] (narrow) %v2870_v16, 16  ;;  %v2549_v16 = vcombine.low %v12185_v62, %v12184_v22  ;;  %v2921_v0 = vcombine.low %v2913_v63, %v2920_v8  ;;  %v2938_v14 = vcombine.low %v2930_v44, %v2937_v31  ;;  %v12195_v8 = vld [vmem:[#allocation117_spill] sm:$0xff]  ;;  %v1803_v22 = vpop.permute.xlu1 %1802  ;;  %v12198_v62 = vld [vmem:[#allocation139_spill] sm:$0xff] }
 0x3d7   : > { %v2547_v59 = vcombine.low %v2539_v42, %v2546_v30  ;;  %v2581_v18 = vcombine.low %v2573_v21, %v2580_v54  ;;  %v2598_v46 = vcombine.low %v2590_v6, %v2597_v20  ;;  %v2631_v49 = vrot.slane %v2617_v38, %v9220_v11 }
 0x3d8   : > { %v2563_v9 = vrot.slane %v2549_v16, %v9220_v11  ;;  %v12199_v16 = vld [vmem:[#allocation131_spill] sm:$0xff] }
 0x3d9   : > { %v2650_v35 = vcombine.low %v12199_v16, %v12198_v62 }
 0x3da   : > { %3088 = vxpose.xlu1.b32.cont [5/16] (narrow) %v2496_v52, 16  ;;  %3127 = vxpose.xlu0.b32.cont [12/16] (narrow) %v2887_v5, 16  ;;  %v2954_v5 = vrot.slane %v2940_v19, %v9220_v11  ;;  %v2556_v52 = vrot.slane %v2548_v55, %v9220_v11 }
 0x3db   : > { %v2658_v31 = vrot.slane %v2650_v35, %v9220_v11 }
 0x3dc   : > { %v2564_v33 = vcombine.low %v2556_v52, %v2563_v9  ;;  %v2955_v41 = vcombine.low %v2947_v61, %v2954_v5  ;;  %v3169_v52 = vld [vmem:[%s10721_s25 + $0x8] sm:$0xff]  ;;  %v3168_v61 = vld [vmem:[%s10721_s25] sm:$0xff] }
 0x3de   : > { %3089 = vxpose.xlu1.b32.cont [6/16] (narrow) %v2513_v28, 16  ;;  %3128 = vxpose.xlu0.b32.cont [13/16] (narrow) %v2904_v43, 16  ;;  %v2599_v43 = vcombine.low %v10514_v27, %v10506_v13  ;;  %v2616_v28 = vcombine.low %v12195_v8, %v12194_v3  ;;  %v2634_v13 = vcombine.low %v10647_v58, %v10636_v32  ;;  %v1797_v27 = vpop.permute.xlu0 %1796  ;;  %v3170_v3 = vld [vmem:[%s10721_s25 + $0x10] sm:$0xff] }
 0x3df   : > { %v2641_v32 = vrot.slane %v2633_v56, %v9220_v11  ;;  %v2667_v30 = vcombine.low %v1797_v27, %v1799_v47  ;;  %v3174_v8 = vld [vmem:[%s10721_s25 + $0x30] sm:$0xff] }
 0x3e0   : > { %v2607_v26 = vrot.slane %v2599_v43, %v9220_v11  ;;  %v2624_v37 = vrot.slane %v2616_v28, %v9220_v11  ;;  %v2648_v63 = vrot.slane %v2634_v13, %v9220_v11 }
 0x3e1   : > { %v2675_v36 = vrot.slane %v2667_v30, %v9220_v11 }
 0x3e2   : > { %3090 = vxpose.xlu1.b32.cont [7/16] (narrow) %v2530_v10, 16  ;;  %3129 = vxpose.xlu0.b32.cont [14/16] (narrow) %v2921_v0, 16  ;;  %v2615_v2 = vcombine.low %v2607_v26, %v2614_v51  ;;  %v2632_v50 = vcombine.low %v2624_v37, %v2631_v49  ;;  %v1801_v58 = vpop.permute.xlu0 %1800  ;;  %v2665_v10 = vrot.slane %v2651_v17, %v9220_v11 }
 0x3e3   : > { %v2649_v1 = vcombine.low %v2641_v32, %v2648_v63  ;;  %v2668_v53 = vcombine.low %v1801_v58, %v1803_v22 }
 0x3e4   : > { %v2666_v19 = vcombine.low %v2658_v31, %v2665_v10 }
 0x3e5   : > { %v2682_v60 = vrot.slane %v2668_v53, %v9220_v11  ;;  %v12201_v11 = vld [vmem:[#allocation2_spill] sm:$0xff] }
 0x3e6   : > { %3091 = vxpose.xlu1.b32.cont [8/16] (narrow) %v2547_v59, 16  ;;  %3130 = vxpose.xlu0.b32.cont [15/16] (narrow) %v2938_v14, 16  ;;  %v3172_v14 = vld [vmem:[%s10721_s25 + $0x20] sm:$0xff] }
 0x3e7   : > { %v2683_v55 = vcombine.low %v2675_v36, %v2682_v60 }
 0x3ea   : > { %3092 = vxpose.xlu1.b32.cont [9/16] (narrow) %v2564_v33, 16  ;;  %3131 = vxpose.xlu0.b32.end [16/16] (narrow) %v2955_v41, 16  ;;  %v3036_v0 = vpop.trf.xlu0 }
 0x3eb   : > { %v3160_v5 = vadd.f32 %v12201_v11, %v3036_v0 }
 0x3ed   : > { %v10737_v54 = vadd.f32 %v3168_v61, %v3160_v5 }
 0x3ee   : > { %3093 = vxpose.xlu1.b32.cont [10/16] (narrow) %v2581_v18, 16  ;;  %v3037_v44 = vpop.trf.xlu0  ;;  %v3171_v18 = vld [vmem:[%s10721_s25 + $0x18] sm:$0xff] }
 0x3ef   : > { %v3164_v9 = vadd.f32 %v12200_v25, %v3037_v44  ;;  %12205 = vst [vmem:[#allocation29_spill] sm:$0xff] %v10737_v54 }
 0x3f1   : > { %v10731_v24 = vadd.f32 %v3172_v14, %v3164_v9 }
 0x3f2   : > { %3094 = vxpose.xlu1.b32.cont [11/16] (narrow) %v2598_v46, 16 }
 0x3f3   : > { %12202 = vst [vmem:[#allocation25_spill] sm:$0xff] %v10731_v24  ;;  %v3184_v40 = vpack.c.bf16 %v10731_v24, %v10737_v54 }
 0x3f6   : > { %3095 = vxpose.xlu1.b32.cont [12/16] (narrow) %v2615_v2, 16 }
 0x3fa   : > { %3096 = vxpose.xlu1.b32.cont [13/16] (narrow) %v2632_v50, 16 }
 0x3fe   : > { %3097 = vxpose.xlu1.b32.cont [14/16] (narrow) %v2649_v1, 16 }
 0x402   : > { %3098 = vxpose.xlu1.b32.cont [15/16] (narrow) %v2666_v19, 16 }
 0x406   : > { %v3068_v42 = vpop.trf.xlu1  ;;  %3099 = vxpose.xlu1.b32.end [16/16] (narrow) %v2683_v55, 16 }
 0x407   : > { %v3161_v45 = vadd.f32 %v12201_v11, %v3068_v42 }
 0x409   : > { %v10733_v57 = vadd.f32 %v3169_v52, %v3161_v45 }
 0x40a   : > { %v3069_v59 = vpop.trf.xlu1 }
 0x40b   : > { %v3165_v33 = vadd.f32 %v12200_v25, %v3069_v59  ;;  %12203 = vst [vmem:[#allocation33_spill] sm:$0xff] %v10733_v57 }
 0x40d   : > { %v10735_v39 = vadd.f32 %v3173_v29, %v3165_v33 }
 0x40f   : > { %12204 = vst [vmem:[#allocation28_spill] sm:$0xff] %v10735_v39  ;;  %v3185_v41 = vpack.c.bf16 %v10735_v39, %v10733_v57 }
 0x411   : > { %3213 = vmatprep.subr.bf16.mxu1 %v3185_v41 }
 0x412   : > { %3214 = vmatpush1.bf16.msra.mxu1 %v3184_v40 }
 0x415   : > { %8390 = vmatmul.mubr.msk.bf16.vlgmr.msra.gmra.mxu1 %vm3195_vm2, %v8636_v48 }
 0x416   : > { %3274 = vmatprep.mubr.bf16.mxu1 %v12206_v7 }
 0x42a   : > { %v3132_v21 = vpop.trf.xlu0 }
 0x42b   : > { %v3163_v20 = vadd.f32 %v12201_v11, %v3132_v21 }
 0x42d   : > { %v10752_v46 = vadd.f32 %v3171_v18, %v3163_v20 }
 0x42e   : > { %v3133_v6 = vpop.trf.xlu0 }
 0x42f   : > { %v3167_v43 = vadd.f32 %v12200_v25, %v3133_v6  ;;  %12207 = vst [vmem:[#allocation53_spill] sm:$0xff] %v10752_v46 }
 0x431   : > { %v10754_v15 = vadd.f32 %v3175_v4, %v3167_v43 }
 0x433   : > { %12208 = vst [vmem:[#allocation21_spill] sm:$0xff] %v10754_v15  ;;  %v3187_v12 = vpack.c.bf16 %v10754_v15, %v10752_v46 }
 0x435   : > { %3256 = vmatprep.subr.bf16.mxu1 %v3187_v12 }
 0x446   : > { %v3100_v38 = vpop.trf.xlu1 }
 0x447   : > { %v3162_v51 = vadd.f32 %v12201_v11, %v3100_v38 }
 0x449   : > { %v10762_v47 = vadd.f32 %v3170_v3, %v3162_v51 }
 0x44a   : > { %v3101_v28 = vpop.trf.xlu1 }
 0x44b   : > { %v3166_v26 = vadd.f32 %v12200_v25, %v3101_v28  ;;  %12209 = vst [vmem:[#allocation22_spill] sm:$0xff] %v10762_v47 }
 0x44d   : > { %v10764_v49 = vadd.f32 %v3174_v8, %v3166_v26 }
 0x44f   : > { %12210 = vst [vmem:[#allocation37_spill] sm:$0xff] %v10764_v49  ;;  %v3186_v2 = vpack.c.bf16 %v10764_v49, %v10762_v47 }
 0x451   : > { %3257 = vmatpush1.bf16.msra.mxu1 %v3186_v2 }
 0x454   : > { %8391 = vmatmul.mubr.msk.bf16.vlgmr.msra.gmra.mxu1 %vm3195_vm2, %v8636_v48 }
 0x455   : > { %3564 = vmatprep.mubr.bf16.mxu1 %v12206_v7 }
 0x4d5   : > { %v3233_v13 = vpop.f32.mrf.mxu1 }
 0x4d7   : > { %v3235_v27 = vpop.f32.mrf.mxu1 }
 0x4d8   : > { %v3285_v50 = vadd.f32 %v3235_v27, %v3233_v13 }
 0x4d9   : > { %v3237_v37 = vpop.f32.mrf.mxu1 }
 0x4db   : > { %v3239_v56 = vpop.f32.mrf.mxu1 }
 0x4dc   : > { %v3290_v63 = vadd.f32 %v3239_v56, %v3237_v37 }
 0x514   : > { %v3276_v23 = vpop.f32.mrf.mxu1 }
 0x515   : > { %v3286_v34 = vadd.f32 %v3285_v50, %v3276_v23 }
 0x516   : > { %v3278_v17 = vpop.f32.mrf.mxu1 }
 0x517   : > { %v3287_v22 = vadd.f32 %v3286_v34, %v3278_v17 }
 0x518   : > { %v3280_v62 = vpop.f32.mrf.mxu1 }
 0x519   : > { %v3291_v16 = vadd.f32 %v3290_v63, %v3280_v62  ;;  %3288 = vadd.xlane.f32.xlu0 %v3287_v22 }
 0x51a   : > { %v3282_v35 = vpop.f32.mrf.mxu1 }
 0x51b   : > { %v3292_v32 = vadd.f32 %v3291_v16, %v3282_v35 }
 0x51d   : > { %3293 = vadd.xlane.f32.xlu1 %v3292_v32 }
 0x5a2   : > { %v3289_v58 = vpop.xlane.xlu0 %3288 }
 0x5a3   : > { %v3296_v10 = vmul.f32 0.001953125, %v3289_v58 }
 0x5a5   : > { %v3298_v1 = vsub.f32 %v3233_v13, %v3296_v10  ;;  %v3299_v53 = vsub.f32 %v3235_v27, %v3296_v10  ;;  %v3300_v31 = vsub.f32 %v3276_v23, %v3296_v10  ;;  %v3301_v0 = vsub.f32 %v3278_v17, %v3296_v10 }
 0x5a6   : > { %v3294_v30 = vpop.xlane.xlu1 %3293 }
 0x5a7   : > { %v3297_v19 = vmul.f32 0.001953125, %v3294_v30  ;;  %v3306_v60 = vmul.f32 %v3298_v1, %v3298_v1  ;;  %v3307_v36 = vmul.f32 %v3299_v53, %v3299_v53  ;;  %v3308_v55 = vmul.f32 %v3300_v31, %v3300_v31 }
 0x5a8   : > { %v3309_v14 = vmul.f32 %v3301_v0, %v3301_v0 }
 0x5a9   : > { %v3302_v44 = vsub.f32 %v3237_v37, %v3297_v19  ;;  %v3303_v42 = vsub.f32 %v3239_v56, %v3297_v19  ;;  %v3304_v25 = vsub.f32 %v3280_v62, %v3297_v19  ;;  %v3314_v9 = vadd.f32 %v3307_v36, %v3306_v60  ;;  %v12211_v36 = vld [vmem:[#allocation3_spill] sm:$0xff] }
 0x5aa   : > { %v3305_v45 = vsub.f32 %v3282_v35, %v3297_v19  ;;  %v8394_v19 = vld.sshfl [vmem:[%s11764_s7 + $0x4] sm:$0x33 pattern:$0x75316420] }
 0x5ab   : > { %v3315_v11 = vadd.f32 %v3314_v9, %v3308_v55  ;;  %v3310_v5 = vmul.f32 %v3302_v44, %v3302_v44  ;;  %v3311_v59 = vmul.f32 %v3303_v42, %v3303_v42  ;;  %v3312_v29 = vmul.f32 %v3304_v25, %v3304_v25 }
 0x5ac   : > { %v3313_v33 = vmul.f32 %v3305_v45, %v3305_v45  ;;  %v3472_v60 = vcombine.high %v8394_v19, %v8394_v19 }
 0x5ad   : > { %v3316_v52 = vadd.f32 %v3315_v11, %v3309_v14  ;;  %v3319_v61 = vadd.f32 %v3311_v59, %v3310_v5  ;;  %v12212_v5 = vld [vmem:[#allocation4_spill] sm:$0xff] }
 0x5ae   : > { %v3486_v55 = vrot.slane %v3472_v60, %v12211_v36 }
 0x5af   : > { %3317 = vadd.xlane.f32.xlu0 %v3316_v52  ;;  %v3320_v41 = vadd.f32 %v3319_v61, %v3312_v29 }
 0x5b1   : > { %v3321_v40 = vadd.f32 %v3320_v41, %v3313_v33 }
 0x5b3   : > { %3322 = vadd.xlane.f32.xlu0 %v3321_v40 }
 0x638   : > { %v3318_v48 = vpop.xlane.xlu0 %3317 }
 0x639   : > { %v3324_v21 = vmul.f32 0.001953125, %v3318_v48 }
 0x63b   : > { %v3326_v20 = vadd.f32 1e-05, %v3324_v21 }
 0x63c   : > { %v3323_v18 = vpop.xlane.xlu0 %3322 }
 0x63d   : > { %8665 = vrsqrt.f32 %v3326_v20  ;;  %v3325_v4 = vmul.f32 0.001953125, %v3323_v18 }
 0x63f   : > { %v3327_v6 = vadd.f32 1e-05, %v3325_v4 }
 0x641   : > { %8667 = vrsqrt.f32 %v3327_v6 }
 0x64a   : > { %v8666_v43 = vpop.eup %8665 }
 0x64b   : > { %v3330_v12 = vmul.f32 %v8666_v43, %v3298_v1  ;;  %v3331_v38 = vmul.f32 %v8666_v43, %v3299_v53  ;;  %v3333_v3 = vmul.f32 %v8666_v43, %v3301_v0  ;;  %v3332_v23 = vmul.f32 %v8666_v43, %v3300_v31 }
 0x64d   : > { %v3338_v8 = vmul.f32 0.01, %v3330_v12  ;;  %v3339_v26 = vmul.f32 0.01, %v3331_v38  ;;  %v3341_v34 = vmul.f32 0.01, %v3333_v3 }
 0x64e   : > { %v8668_v51 = vpop.eup %8667  ;;  %v3340_v10 = vmul.f32 0.01, %v3332_v23 }
 0x64f   : > { %v3334_v28 = vmul.f32 %v8668_v51, %v3302_v44  ;;  %v3335_v2 = vmul.f32 %v8668_v51, %v3303_v42  ;;  %v3337_v13 = vmul.f32 %v8668_v51, %v3305_v45  ;;  %v3336_v27 = vmul.f32 %v8668_v51, %v3304_v25  ;;  %v8392_v25 = vld.sshfl [vmem:[%s11764_s7] sm:$0x33 pattern:$0x75316420] }
 0x650   : > { %v3346_v17 = vmax.f32 %v3330_v12, %v3338_v8  ;;  %v3347_v22 = vmax.f32 %v3331_v38, %v3339_v26  ;;  %v3349_v1 = vmax.f32 %v3333_v3, %v3341_v34  ;;  %v3348_v30 = vmax.f32 %v3332_v23, %v3340_v10  ;;  %v8404_v38 = vld.sshfl [vmem:[%s11764_s7 + $0x8] sm:$0x33 pattern:$0x75316420] }
 0x651   : > { %v3342_v37 = vmul.f32 0.01, %v3334_v28  ;;  %v3343_v56 = vmul.f32 0.01, %v3335_v2  ;;  %v3345_v50 = vmul.f32 0.01, %v3337_v13  ;;  %v3479_v44 = vrot.slane %v8394_v19, %v12211_v36 }
 0x652   : > { %v3344_v16 = vmul.f32 0.01, %v3336_v27  ;;  %v3497_v42 = vpack.i.b16 %v3486_v55, %v3486_v55  ;;  %v3391_v14 = vcombine.high %v8392_v25, %v8392_v25  ;;  %v3488_v45 = vcombine.high %v3486_v55, %v3486_v55 }
 0x653   : > { %v3350_v63 = vmax.f32 %v3334_v28, %v3342_v37  ;;  %v3351_v62 = vmax.f32 %v3335_v2, %v3343_v56  ;;  %v3353_v35 = vmax.f32 %v3337_v13, %v3345_v50  ;;  %v3487_v9 = vcombine.high %v3479_v44, %v3479_v44  ;;  %v8637_v2 = vld [vmem:[%s11762_s5 + $0x8] sm:$0xff]  }
 0x654   : > { %v3352_v53 = vmax.f32 %v3336_v27, %v3344_v16  ;;  %v3490_v11 = vpack.i.b16 %v3479_v44, %v3479_v44  ;;  %v3502_v59 = vrot.slane %v3497_v42, %v12212_v5  ;;  %v3405_v33 = vrot.slane %v3391_v14, %v12211_v36 }
 0x655   : > { %v10770_v32 = vpack.c.bf16 %v3350_v63, %v3346_v17  ;;  %v10772_v58 = vpack.c.bf16 %v3351_v62, %v3347_v22  ;;  %v10776_v31 = vpack.c.bf16 %v3353_v35, %v3349_v1  ;;  %v3504_v61 = vpack.i.b16 %v3487_v9, %v3487_v9  ;;  %v8411_v35 = vld.sshfl [vmem:[%s11764_s7 + $0xc] sm:$0x33 pattern:$0x75316420] }
 0x656   : > { %v10780_v0 = vpack.c.bf16 %v3352_v53, %v3348_v30  ;;  %v3495_v40 = vrot.slane %v3490_v11, %v12212_v5  ;;  %v3511_v48 = vpack.i.b16 %v3488_v45, %v3488_v45  ;;  %v3398_v20 = vrot.slane %v8392_v25, %v12211_v36 }
 0x657   : > { %3444 = vrot.lane.b32.xlu1 %v10770_v32, %s8691_s30  ;;  %3446 = vrot.lane.b32.xlu0 %v10772_v58, %s8691_s30  ;;  %v3509_v43 = vrot.slane %v3504_v61, %v12212_v5  ;;  %v3416_v12 = vpack.i.b16 %v3405_v33, %v3405_v33  ;;  %v3407_v8 = vcombine.high %v3405_v33, %v3405_v33 }
 0x658   : > { %v3516_v3 = vrot.slane %v3511_v48, %v12212_v5  ;;  %v3742_v28 = vcombine.high %v8404_v38, %v8404_v38  ;;  %v3406_v26 = vcombine.high %v3398_v20, %v3398_v20  ;;  %v3409_v23 = vpack.i.b16 %v3398_v20, %v3398_v20 }
 0x659   : > { %v3421_v50 = vrot.slane %v3416_v12, %v12212_v5  ;;  %v3430_v63 = vpack.i.b16 %v3407_v8, %v3407_v8  ;;  %v3749_v16 = vrot.slane %v8404_v38, %v12211_v36  ;;  %v3926_v1 = vcombine.high %v8411_v35, %v8411_v35 }
 0x65a   : > { %v3756_v22 = vrot.slane %v3742_v28, %v12211_v36  ;;  %v3423_v62 = vpack.i.b16 %v3406_v26, %v3406_v26  ;;  %v3414_v19 = vrot.slane %v3409_v23, %v12212_v5  ;;  %v8418_v28 = vld.sshfl [vmem:[%s11764_s7 + $0x10] sm:$0x33 pattern:$0x75316420] }
 0x65b   : > { %3442 = vrot.lane.b32.xlu1 %v10776_v31, %s8691_s30  ;;  %3366 = vrot.lane.b32.xlu0 %v10772_v58, %s8692_s9  ;;  %v3435_v55 = vrot.slane %v3430_v63, %v12212_v5  ;;  %v3757_v9 = vcombine.high %v3749_v16, %v3749_v16  ;;  %v3940_v45 = vrot.slane %v3926_v1, %v12211_v36 }
 0x65c   : > { %v3767_v44 = vpack.i.b16 %v3756_v22, %v3756_v22  ;;  %v3758_v42 = vcombine.high %v3756_v22, %v3756_v22  ;;  %v3428_v25 = vrot.slane %v3423_v62, %v12212_v5  ;;  %v3760_v61 = vpack.i.b16 %v3749_v16, %v3749_v16 }
 0x65d   : > { %v3951_v38 = vpack.i.b16 %v3940_v45, %v3940_v45 }
 0x65e   : > { %v3772_v48 = vrot.slane %v3767_v44, %v12212_v5  ;;  %v3765_v8 = vrot.slane %v3760_v61, %v12212_v5  ;;  %v8639_v44 = vld [vmem:[%s11762_s5 + $0x10] sm:$0xff]  }
 0x65f   : > { %3448 = vrot.lane.b32.xlu1 %v10780_v0, %s8691_s30  ;;  %3368 = vrot.lane.b32.xlu0 %v10780_v0, %s8692_s9  ;;  %v3956_v63 = vrot.slane %v3951_v38, %v12212_v5 }
 0x663   : > { %3364 = vrot.lane.b32.xlu1 %v10770_v32, %s8692_s9  ;;  %3716 = vrot.lane.b32.xlu0 %v10772_v58, %s8693_s10 }
 0x667   : > { %3359 = vrot.lane.b32.xlu1 %v10776_v31, %s8692_s9  ;;  %3718 = vrot.lane.b32.xlu0 %v10780_v0, %s8693_s10 }
 0x66b   : > { %3714 = vrot.lane.b32.xlu1 %v10770_v32, %s8693_s10  ;;  %3900 = vrot.lane.b32.xlu0 %v10772_v58, %s8694_s11 }
 0x66f   : > { %3712 = vrot.lane.b32.xlu1 %v10776_v31, %s8693_s10  ;;  %3902 = vrot.lane.b32.xlu0 %v10780_v0, %s8694_s11 }
 0x673   : > { %3898 = vrot.lane.b32.xlu1 %v10770_v32, %s8694_s11  ;;  %4084 = vrot.lane.b32.xlu0 %v10772_v58, %s8690_s21 }
 0x677   : > { %3896 = vrot.lane.b32.xlu1 %v10776_v31, %s8694_s11  ;;  %4086 = vrot.lane.b32.xlu0 %v10780_v0, %s8690_s21 }
 0x67b   : > { %4082 = vrot.lane.b32.xlu1 %v10770_v32, %s8690_s21  ;;  %4268 = vrot.lane.b32.xlu0 %v10772_v58, %s8695_s12 }
 0x67f   : > { %4080 = vrot.lane.b32.xlu1 %v10776_v31, %s8690_s21  ;;  %4270 = vrot.lane.b32.xlu0 %v10780_v0, %s8695_s12 }
 0x683   : > { %4266 = vrot.lane.b32.xlu1 %v10770_v32, %s8695_s12  ;;  %4452 = vrot.lane.b32.xlu0 %v10772_v58, %s8696_s13 }
 0x687   : > { %4264 = vrot.lane.b32.xlu1 %v10776_v31, %s8695_s12  ;;  %4454 = vrot.lane.b32.xlu0 %v10780_v0, %s8696_s13  ;;  %s8706_s12 = smov 119  }
 0x68b   : > { %4450 = vrot.lane.b32.xlu1 %v10770_v32, %s8696_s13  ;;  %4636 = vrot.lane.b32.xlu0 %v10772_v58, %s8697_s14 }
 0x68f   : > { %4448 = vrot.lane.b32.xlu1 %v10776_v31, %s8696_s13  ;;  %4638 = vrot.lane.b32.xlu0 %v10780_v0, %s8697_s14 }
 0x693   : > { %4634 = vrot.lane.b32.xlu1 %v10770_v32, %s8697_s14  ;;  %4820 = vrot.lane.b32.xlu0 %v10772_v58, %s8698_s15 }
 0x697   : > { %4632 = vrot.lane.b32.xlu1 %v10776_v31, %s8697_s14  ;;  %4822 = vrot.lane.b32.xlu0 %v10780_v0, %s8698_s15 }
 0x69b   : > { %4818 = vrot.lane.b32.xlu1 %v10770_v32, %s8698_s15  ;;  %5004 = vrot.lane.b32.xlu0 %v10772_v58, %s8699_s16 }
 0x69f   : > { %4816 = vrot.lane.b32.xlu1 %v10776_v31, %s8698_s15  ;;  %5006 = vrot.lane.b32.xlu0 %v10780_v0, %s8699_s16 }
 0x6a3   : > { %5002 = vrot.lane.b32.xlu1 %v10770_v32, %s8699_s16  ;;  %5188 = vrot.lane.b32.xlu0 %v10772_v58, %s8700_s17 }
 0x6a7   : > { %5000 = vrot.lane.b32.xlu1 %v10776_v31, %s8699_s16  ;;  %5190 = vrot.lane.b32.xlu0 %v10780_v0, %s8700_s17 }
 0x6ab   : > { %5186 = vrot.lane.b32.xlu1 %v10770_v32, %s8700_s17  ;;  %5372 = vrot.lane.b32.xlu0 %v10772_v58, %s8701_s18 }
 0x6af   : > { %5184 = vrot.lane.b32.xlu1 %v10776_v31, %s8700_s17  ;;  %5374 = vrot.lane.b32.xlu0 %v10780_v0, %s8701_s18 }
 0x6b3   : > { %5370 = vrot.lane.b32.xlu1 %v10770_v32, %s8701_s18  ;;  %5556 = vrot.lane.b32.xlu0 %v10772_v58, %s8702_s19 }
 0x6b7   : > { %5368 = vrot.lane.b32.xlu1 %v10776_v31, %s8701_s18  ;;  %5558 = vrot.lane.b32.xlu0 %v10780_v0, %s8702_s19 }
 0x6bb   : > { %5554 = vrot.lane.b32.xlu1 %v10770_v32, %s8702_s19  ;;  %5845 = vrot.lane.b32.xlu0 %v10780_v0, %s8703_s23 }
 0x6bf   : > { %5552 = vrot.lane.b32.xlu1 %v10776_v31, %s8702_s19  ;;  %5847 = vrot.lane.b32.xlu0 %v10776_v31, %s8703_s23 }
 0x6c3   : > { %5843 = vrot.lane.b32.xlu1 %v10772_v58, %s8703_s23  ;;  %6029 = vrot.lane.b32.xlu0 %v10780_v0, %s8704_s24 }
 0x6c7   : > { %5841 = vrot.lane.b32.xlu1 %v10770_v32, %s8703_s23  ;;  %6031 = vrot.lane.b32.xlu0 %v10776_v31, %s8704_s24 }
 0x6c9   : > { %v3445_v52 = vpop.permute.xlu1 %3444  ;;  %v3447_v29 = vpop.permute.xlu0 %3446 }
 0x6ca   : > { %v10853_v41 = vsel %vm3450_vm3, %v3445_v52, %v3447_v29 }
 0x6cb   : > { %6027 = vrot.lane.b32.xlu1 %v10772_v58, %s8704_s24  ;;  %v3518_v21 = vmul.bf16 %v3502_v59, %v10853_v41  ;;  %6213 = vrot.lane.b32.xlu0 %v10780_v0, %s8705_s29 }
 0x6cd   : > { %v3443_v18 = vpop.permute.xlu1 %3442  ;;  %v3367_v4 = vpop.permute.xlu0 %3366  ;;  %3546 = vmatprep.subr.bf16.mxu1 %v3518_v21  ;;  %v3781_v21 = vpack.i.b16 %v3758_v42, %v3758_v42  ;;  %v4117_v42 = vrot.slane %v8418_v28, %v12211_v36 }
 0x6ce   : > { %v10863_v6 = vsel %vm3450_vm3, %v3443_v18, %v3445_v52 }
 0x6cf   : > { %v3517_v51 = vmul.bf16 %v3495_v40, %v10863_v6  ;;  %6025 = vrot.lane.b32.xlu1 %v10770_v32, %s8704_s24  ;;  %6215 = vrot.lane.b32.xlu0 %v10776_v31, %s8705_s29 }
 0x6d1   : > { %3547 = vmatpush1.bf16.msra.mxu1 %v3517_v51  ;;  %v3449_v13 = vpop.permute.xlu1 %3448  ;;  %v3369_v27 = vpop.permute.xlu0 %3368 }
 0x6d2   : > { %v10879_v37 = vsel %vm3450_vm3, %v3447_v29, %v3449_v13  ;;  %v10882_v56 = vsel %vm3450_vm3, %v3449_v13, %v3443_v18  ;;  %v10910_v14 = vsel %vm3370_vm4, %v3367_v4, %v3369_v27  ;;  %v3774_v18 = vpack.i.b16 %v3757_v9, %v3757_v9 }
 0x6d3   : > { %v3519_v34 = vmul.bf16 %v3509_v43, %v10879_v37  ;;  %v3520_v17 = vmul.bf16 %v3516_v3, %v10882_v56  ;;  %6211 = vrot.lane.b32.xlu1 %v10772_v58, %s8705_s29  ;;  %6397 = vrot.lane.b32.xlu0 %v10780_v0, %s8706_s12  ;;  %v3438_v20 = vmul.bf16 %v3428_v25, %v10910_v14  ;;  %v8425_v25 = vld.sshfl [vmem:[%s11764_s7 + $0x14] sm:$0x33 pattern:$0x75316420]  ;;  %vm6217_vm3 = vcmask 982016  }
 0x6d4   : > { %8398 = vmatmul.mubr.msk.bf16.vlgmr.msra.gmra.mxu1 %vm3195_vm2, %v8637_v2  ;;  %v3933_v43 = vrot.slane %v8411_v35, %v12211_v36  ;;  %v3942_v13 = vcombine.high %v3940_v45, %v3940_v45 }
 0x6d5   : > { %3589 = vmatprep.subr.bf16.mxu0 %v3520_v17  ;;  %v3365_v10 = vpop.permute.xlu1 %3364  ;;  %3658 = vmatprep.mubr.bf16.mxu1 %v12206_v7  ;;  %v3717_v53 = vpop.permute.xlu0 %3716 }
 0x6d6   : > { %v10899_v30 = vsel %vm3370_vm4, %v3365_v10, %v3367_v4  ;;  %3590 = vmatpush1.bf16.msra.mxu0 %v3519_v34  ;;  %v8638_v4 = vld [vmem:[%s11762_s5] sm:$0xff]   ;;  %v3941_v23 = vcombine.high %v3933_v43, %v3933_v43  ;;  %v3944_v35 = vpack.i.b16 %v3933_v43, %v3933_v43 }
 0x6d7   : > { %v3437_v60 = vmul.bf16 %v3421_v50, %v10899_v30  ;;  %6209 = vrot.lane.b32.xlu1 %v10770_v32, %s8705_s29  ;;  %6399 = vrot.lane.b32.xlu0 %v10776_v31, %s8706_s12  ;;  %v3779_v50 = vrot.slane %v3774_v18, %v12212_v5  ;;  %v4125_v18 = vcombine.high %v4117_v42, %v4117_v42 }
 0x6d8   : > { %v3949_v61 = vrot.slane %v3944_v35, %v12212_v5 }
 0x6d9   : > { %8399 = vmatmul.mubr.msk.bf16.vlgmr.msra.gmra.mxu0 %vm3195_vm2, %v8637_v2  ;;  %3640 = vmatprep.subr.bf16.mxu1 %v3437_v60  ;;  %v3360_v11 = vpop.permute.xlu1 %3359  ;;  %v3719_v59 = vpop.permute.xlu0 %3718  ;;  %v3786_v2 = vrot.slane %v3781_v21, %v12212_v5 }
 0x6da   : > { %v10915_v52 = vsel %vm3370_vm4, %v3369_v27, %v3360_v11  ;;  %v10918_v29 = vsel %vm3370_vm4, %v3360_v11, %v3365_v10  ;;  %3701 = vmatprep.mubr.bf16.mxu0 %v12206_v7  ;;  %v4110_v27 = vcombine.high %v8418_v28, %v8418_v28  ;;  %v10945_v34 = vsel %vm3720_vm5, %v3717_v53, %v3719_v59 }
 0x6db   : > { %v3436_v33 = vmul.bf16 %v3414_v19, %v10918_v29  ;;  %v3439_v40 = vmul.bf16 %v3435_v55, %v10915_v52  ;;  %6395 = vrot.lane.b32.xlu1 %v10772_v58, %s8706_s12  ;;  %v3789_v60 = vmul.bf16 %v3779_v50, %v10945_v34  ;;  %v3958_v55 = vpack.i.b16 %v3941_v23, %v3941_v23 }
 0x6dc   : > { %v4124_v19 = vrot.slane %v4110_v27, %v12211_v36  ;;  %v4294_v11 = vcombine.high %v8425_v25, %v8425_v25  ;;  %v4142_v23 = vpack.i.b16 %v4125_v18, %v4125_v18  ;;  %vm6401_vm4 = vcmask 973824  }
 0x6dd   : > { %3641 = vmatpush1.bf16.msra.mxu1 %v3436_v33  ;;  %3683 = vmatprep.subr.bf16.mxu0 %v3439_v40  ;;  %v3715_v12 = vpop.permute.xlu1 %3714  ;;  %v3901_v51 = vpop.permute.xlu0 %3900 }
 0x6de   : > { %v10932_v3 = vsel %vm3720_vm5, %v3715_v12, %v3717_v53  ;;  %3684 = vmatpush1.bf16.msra.mxu0 %v3438_v20  ;;  %v3965_v53 = vpack.i.b16 %v3942_v13, %v3942_v13  ;;  %v4126_v21 = vcombine.high %v4124_v19, %v4124_v19  ;;  %v3963_v20 = vrot.slane %v3958_v55, %v12212_v5 }
 0x6df   : > { %v3788_v26 = vmul.bf16 %v3772_v48, %v10932_v3  ;;  %6393 = vrot.lane.b32.xlu1 %v10770_v32, %s8706_s12  ;;  %v4135_v48 = vpack.i.b16 %v4124_v19, %v4124_v19  ;;  %v8432_v19 = vld.sshfl [vmem:[%s11764_s7 + $0x18] sm:$0x33 pattern:$0x75316420] }
 0x6e0   : > { %8401 = vmatmul.mubr.msk.bf16.vlgmr.msra.gmra.mxu1 %vm3195_vm2, %v8638_v4  ;;  %v3970_v40 = vrot.slane %v3965_v53, %v12212_v5  ;;  %v4149_v27 = vpack.i.b16 %v4126_v21, %v4126_v21 }
 0x6e1   : > { %8402 = vmatmul.mubr.msk.bf16.vlgmr.msra.gmra.mxu0 %vm3195_vm2, %v8638_v4  ;;  %3816 = vmatprep.subr.bf16.mxu1 %v3788_v26  ;;  %v3713_v17 = vpop.permute.xlu1 %3712  ;;  %v3903_v22 = vpop.permute.xlu0 %3902  ;;  %v4128_v26 = vpack.i.b16 %v4117_v42, %v4117_v42  ;;  %v4140_v13 = vrot.slane %v4135_v48, %v12212_v5  ;;  %v4478_v42 = vcombine.high %v8432_v19, %v8432_v19 }
 0x6e2   : > { %v10950_v62 = vsel %vm3720_vm5, %v3719_v59, %v3713_v17  ;;  %v10953_v16 = vsel %vm3720_vm5, %v3713_v17, %v3715_v12  ;;  %3834 = vmatprep.mubr.bf16.mxu1 %v12206_v7  ;;  %3877 = vmatprep.mubr.bf16.mxu0 %v12206_v7  ;;  %v10977_v4 = vsel %vm3904_vm6, %v3901_v51, %v3903_v22  ;;  %v8640_v17 = vld [vmem:[%s11762_s5 + $0x18] sm:$0xff]  }
 0x6e3   : > { %v3787_v10 = vmul.bf16 %v3765_v8, %v10953_v16  ;;  %v3790_v1 = vmul.bf16 %v3786_v2, %v10950_v62  ;;  %v4308_v12 = vrot.slane %v4294_v11, %v12211_v36  ;;  %v3973_v50 = vmul.bf16 %v3963_v20, %v10977_v4 }
 0x6e4   : > { %v4133_v53 = vrot.slane %v4128_v26, %v12212_v5  ;;  %v4154_v55 = vrot.slane %v4149_v27, %v12212_v5 }
 0x6e5   : > { %3817 = vmatpush1.bf16.msra.mxu1 %v3787_v10  ;;  %3859 = vmatprep.subr.bf16.mxu0 %v3790_v1  ;;  %v3899_v9 = vpop.permute.xlu1 %3898  ;;  %v4085_v45 = vpop.permute.xlu0 %4084  ;;  %v4319_v35 = vpack.i.b16 %v4308_v12, %v4308_v12 }
 0x6e6   : > { %v10969_v59 = vsel %vm3904_vm6, %v3899_v9, %v3901_v51  ;;  %3860 = vmatpush1.bf16.msra.mxu0 %v3789_v60 }
 0x6e7   : > { %v3972_v33 = vmul.bf16 %v3956_v63, %v10969_v59  ;;  %v4301_v63 = vrot.slane %v8425_v25, %v12211_v36  ;;  %v4147_v25 = vrot.slane %v4142_v23, %v12212_v5 }
 0x6e8   : > { %8408 = vmatmul.mubr.msk.bf16.vlgmr.msra.gmra.mxu1 %vm3195_vm2, %v8639_v44 }
 0x6e9   : > { %8409 = vmatmul.mubr.msk.bf16.vlgmr.msra.gmra.mxu0 %vm3195_vm2, %v8639_v44  ;;  %4000 = vmatprep.subr.bf16.mxu1 %v3972_v33  ;;  %v3897_v43 = vpop.permute.xlu1 %3896  ;;  %v4087_v38 = vpop.permute.xlu0 %4086  ;;  %v4310_v44 = vcombine.high %v4308_v12, %v4308_v12  ;;  %v4324_v33 = vrot.slane %v4319_v35, %v12212_v5  ;;  %v4312_v20 = vpack.i.b16 %v4301_v63, %v4301_v63 }
 0x6ea   : > { %v10982_v8 = vsel %vm3904_vm6, %v3903_v22, %v3897_v43  ;;  %v10985_v28 = vsel %vm3904_vm6, %v3897_v43, %v3899_v9  ;;  %4018 = vmatprep.mubr.bf16.mxu1 %v12206_v7  ;;  %4061 = vmatprep.mubr.bf16.mxu0 %v12206_v7  ;;  %v4309_v9 = vcombine.high %v4301_v63, %v4301_v63 }
 0x6eb   : > { %v3971_v51 = vmul.bf16 %v3949_v61, %v10985_v28  ;;  %v3974_v2 = vmul.bf16 %v3970_v40, %v10982_v8  ;;  %v11009_v11 = vsel %vm4088_vm7, %v4085_v45, %v4087_v38  ;;  %v4333_v43 = vpack.i.b16 %v4310_v44, %v4310_v44 }
 0x6ec   : > { %v4492_v12 = vrot.slane %v4478_v42, %v12211_v36  ;;  %v4157_v26 = vmul.bf16 %v4147_v25, %v11009_v11  ;;  %v4317_v63 = vrot.slane %v4312_v20, %v12212_v5 }
 0x6ed   : > { %4001 = vmatpush1.bf16.msra.mxu1 %v3971_v51  ;;  %4043 = vmatprep.subr.bf16.mxu0 %v3974_v2  ;;  %v4083_v22 = vpop.permute.xlu1 %4082  ;;  %v4269_v10 = vpop.permute.xlu0 %4268  ;;  %v4326_v51 = vpack.i.b16 %v4309_v9, %v4309_v9  ;;  %v4485_v2 = vrot.slane %v8432_v19, %v12211_v36  ;;  %v4338_v35 = vrot.slane %v4333_v43, %v12212_v5 }
 0x6ee   : > { %v10998_v1 = vsel %vm4088_vm7, %v4083_v22, %v4085_v45  ;;  %4044 = vmatpush1.bf16.msra.mxu0 %v3973_v50  ;;  %v4494_v19 = vcombine.high %v4492_v12, %v4492_v12 }
 0x6ef   : > { %v4156_v60 = vmul.bf16 %v4140_v13, %v10998_v1  ;;  %v8439_v13 = vld.sshfl [vmem:[%s11764_s7 + $0x1c] sm:$0x33 pattern:$0x75316420]  ;;  %v4496_v20 = vpack.i.b16 %v4485_v2, %v4485_v2 }
 0x6f0   : > { %8415 = vmatmul.mubr.msk.bf16.vlgmr.msra.gmra.mxu1 %vm3195_vm2, %v8640_v17  ;;  %v4662_v50 = vcombine.high %v8439_v13, %v8439_v13  ;;  %v4517_v43 = vpack.i.b16 %v4494_v19, %v4494_v19 }
 0x6f1   : > { %8416 = vmatmul.mubr.msk.bf16.vlgmr.msra.gmra.mxu0 %vm3195_vm2, %v8640_v17  ;;  %4184 = vmatprep.subr.bf16.mxu1 %v4156_v60  ;;  %v4081_v61 = vpop.permute.xlu1 %4080  ;;  %v4271_v40 = vpop.permute.xlu0 %4270  ;;  %v4331_v60 = vrot.slane %v4326_v51, %v12212_v5  ;;  %v4669_v51 = vrot.slane %v8439_v13, %v12211_v36 }
 0x6f2   : > { %v11014_v48 = vsel %vm4088_vm7, %v4087_v38, %v4081_v61  ;;  %v11017_v21 = vsel %vm4088_vm7, %v4081_v61, %v4083_v22  ;;  %4202 = vmatprep.mubr.bf16.mxu1 %v12206_v7  ;;  %4245 = vmatprep.mubr.bf16.mxu0 %v12206_v7  ;;  %v8641_v38 = vld [vmem:[%s11762_s5 + $0x20] sm:$0xff]   ;;  %v11041_v44 = vsel %vm4272_vm8, %v4269_v10, %v4271_v40 }
 0x6f3   : > { %v4155_v45 = vmul.bf16 %v4133_v53, %v11017_v21  ;;  %v4158_v18 = vmul.bf16 %v4154_v55, %v11014_v48  ;;  %v4503_v53 = vpack.i.b16 %v4492_v12, %v4492_v12  ;;  %v4493_v55 = vcombine.high %v4485_v2, %v4485_v2 }
 0x6f4   : > { %v4676_v25 = vrot.slane %v4662_v50, %v12211_v36  ;;  %v4341_v12 = vmul.bf16 %v4331_v60, %v11041_v44  ;;  %v4522_v13 = vrot.slane %v4517_v43, %v12212_v5  ;;  %v4680_v43 = vpack.i.b16 %v4669_v51, %v4669_v51 }
 0x6f5   : > { %4185 = vmatpush1.bf16.msra.mxu1 %v4155_v45  ;;  %4227 = vmatprep.subr.bf16.mxu0 %v4158_v18  ;;  %v4267_v27 = vpop.permute.xlu1 %4266  ;;  %v4453_v23 = vpop.permute.xlu0 %4452  ;;  %v4508_v18 = vrot.slane %v4503_v53, %v12212_v5 }
 0x6f6   : > { %v11033_v17 = vsel %vm4272_vm8, %v4267_v27, %v4269_v10  ;;  %4228 = vmatpush1.bf16.msra.mxu0 %v4157_v26  ;;  %v4510_v26 = vpack.i.b16 %v4493_v55, %v4493_v55  ;;  %v4687_v2 = vpack.i.b16 %v4676_v25, %v4676_v25  ;;  %v4678_v53 = vcombine.high %v4676_v25, %v4676_v25 }
 0x6f7   : > { %v4340_v22 = vmul.bf16 %v4324_v33, %v11033_v17  ;;  %v4677_v55 = vcombine.high %v4669_v51, %v4669_v51  ;;  %v8453_v51 = vld.sshfl [vmem:[%s11764_s7 + $0x24] sm:$0x33 pattern:$0x75316420] }
 0x6f8   : > { %8422 = vmatmul.mubr.msk.bf16.vlgmr.msra.gmra.mxu1 %vm3195_vm2, %v8641_v38  ;;  %v4515_v60 = vrot.slane %v4510_v26, %v12212_v5  ;;  %v4701_v26 = vpack.i.b16 %v4678_v53, %v4678_v53 }
 0x6f9   : > { %8423 = vmatmul.mubr.msk.bf16.vlgmr.msra.gmra.mxu0 %vm3195_vm2, %v8641_v38  ;;  %4368 = vmatprep.subr.bf16.mxu1 %v4340_v22  ;;  %v4265_v42 = vpop.permute.xlu1 %4264  ;;  %v4455_v9 = vpop.permute.xlu0 %4454  ;;  %v8446_v22 = vld.sshfl [vmem:[%s11764_s7 + $0x20] sm:$0x33 pattern:$0x75316420] }
 0x6fa   : > { %v11046_v61 = vsel %vm4272_vm8, %v4271_v40, %v4265_v42  ;;  %v11049_v33 = vsel %vm4272_vm8, %v4265_v42, %v4267_v27  ;;  %4386 = vmatprep.mubr.bf16.mxu1 %v12206_v7  ;;  %4429 = vmatprep.mubr.bf16.mxu0 %v12206_v7  ;;  %v8642_v40 = vld [vmem:[%s11762_s5 + $0x28] sm:$0xff]   ;;  %v4846_v19 = vcombine.high %v8446_v22, %v8446_v22 }
 0x6fb   : > { %v4339_v10 = vmul.bf16 %v4317_v63, %v11049_v33  ;;  %v4342_v45 = vmul.bf16 %v4338_v35, %v11046_v61  ;;  %v4501_v63 = vrot.slane %v4496_v20, %v12212_v5  ;;  %v11073_v42 = vsel %vm4456_vm9, %v4453_v23, %v4455_v9 }
 0x6fd   : > { %4369 = vmatpush1.bf16.msra.mxu1 %v4339_v10  ;;  %4411 = vmatprep.subr.bf16.mxu0 %v4342_v45  ;;  %v4451_v38 = vpop.permute.xlu1 %4450  ;;  %v4637_v27 = vpop.permute.xlu0 %4636  ;;  %v4692_v10 = vrot.slane %v4687_v2, %v12212_v5  ;;  %v4525_v2 = vmul.bf16 %v4515_v60, %v11073_v42  ;;  %v4685_v60 = vrot.slane %v4680_v43, %v12212_v5 }
 0x6fe   : > { %v11062_v50 = vsel %vm4456_vm9, %v4451_v38, %v4453_v23  ;;  %4412 = vmatpush1.bf16.msra.mxu0 %v4341_v12 }
 0x6ff   : > { %v4524_v35 = vmul.bf16 %v4508_v18, %v11062_v50 }
 0x700   : > { %8429 = vmatmul.mubr.msk.bf16.vlgmr.msra.gmra.mxu1 %vm3195_vm2, %v8642_v40 }
 0x701   : > { %8430 = vmatmul.mubr.msk.bf16.vlgmr.msra.gmra.mxu0 %vm3195_vm2, %v8642_v40  ;;  %4552 = vmatprep.subr.bf16.mxu1 %v4524_v35  ;;  %v4449_v20 = vpop.permute.xlu1 %4448  ;;  %v4639_v45 = vpop.permute.xlu0 %4638  ;;  %v4860_v40 = vrot.slane %v4846_v19, %v12211_v36  ;;  %v4694_v35 = vpack.i.b16 %v4677_v55, %v4677_v55 }
 0x702   : > { %v11078_v18 = vsel %vm4456_vm9, %v4455_v9, %v4449_v20  ;;  %v11081_v25 = vsel %vm4456_vm9, %v4449_v20, %v4451_v38  ;;  %4570 = vmatprep.mubr.bf16.mxu1 %v12206_v7  ;;  %4613 = vmatprep.mubr.bf16.mxu0 %v12206_v7  ;;  %v8643_v9 = vld [vmem:[%s11762_s5 + $0x30] sm:$0xff]   ;;  %v4853_v38 = vrot.slane %v8446_v22, %v12211_v36 }
 0x703   : > { %v4523_v23 = vmul.bf16 %v4501_v63, %v11081_v25  ;;  %v4526_v12 = vmul.bf16 %v4522_v13, %v11078_v18  ;;  %v5030_v13 = vcombine.high %v8453_v51, %v8453_v51  ;;  %v4706_v22 = vrot.slane %v4701_v26, %v12212_v5 }
 0x704   : > { %v4871_v20 = vpack.i.b16 %v4860_v40, %v4860_v40  ;;  %v4862_v15 = vcombine.high %v4860_v40, %v4860_v40  ;;  %v4699_v49 = vrot.slane %v4694_v35, %v12212_v5  ;;  %v4864_v40 = vpack.i.b16 %v4853_v38, %v4853_v38 }
 0x705   : > { %4553 = vmatpush1.bf16.msra.mxu1 %v4523_v23  ;;  %4595 = vmatprep.subr.bf16.mxu0 %v4526_v12  ;;  %v4635_v63 = vpop.permute.xlu1 %4634  ;;  %v4821_v53 = vpop.permute.xlu0 %4820  ;;  %v4861_v23 = vcombine.high %v4853_v38, %v4853_v38  ;;  %v11105_v12 = vsel %vm4640_vm10, %v4637_v27, %v4639_v45  ;;  %v5044_v43 = vrot.slane %v5030_v13, %v12211_v36 }
 0x706   : > { %v11097_v19 = vsel %vm4640_vm10, %v4635_v63, %v4637_v27  ;;  %4596 = vmatpush1.bf16.msra.mxu0 %v4525_v2  ;;  %v4709_v13 = vmul.bf16 %v4699_v49, %v11105_v12  ;;  %v8460_v49 = vld.sshfl [vmem:[%s11764_s7 + $0x28] sm:$0x33 pattern:$0x75316420] }
 0x707   : > { %v4708_v55 = vmul.bf16 %v4692_v10, %v11097_v19  ;;  %v4878_v24 = vpack.i.b16 %v4861_v23, %v4861_v23  ;;  %v5046_v23 = vcombine.high %v5044_v43, %v5044_v43 }
 0x708   : > { %8436 = vmatmul.mubr.msk.bf16.vlgmr.msra.gmra.mxu1 %vm3195_vm2, %v8643_v9 }
 0x709   : > { %8437 = vmatmul.mubr.msk.bf16.vlgmr.msra.gmra.mxu0 %vm3195_vm2, %v8643_v9  ;;  %4736 = vmatprep.subr.bf16.mxu1 %v4708_v55  ;;  %v4633_v2 = vpop.permute.xlu1 %4632  ;;  %v4823_v39 = vpop.permute.xlu0 %4822  ;;  %v4876_v9 = vrot.slane %v4871_v20, %v12212_v5  ;;  %v4885_v55 = vpack.i.b16 %v4862_v15, %v4862_v15  ;;  %v4869_v15 = vrot.slane %v4864_v40, %v12212_v5 }
 0x70a   : > { %v11110_v10 = vsel %vm4640_vm10, %v4639_v45, %v4633_v2  ;;  %v11113_v26 = vsel %vm4640_vm10, %v4633_v2, %v4635_v63  ;;  %4754 = vmatprep.mubr.bf16.mxu1 %v12206_v7  ;;  %4797 = vmatprep.mubr.bf16.mxu0 %v12206_v7  ;;  %v8644_v45 = vld [vmem:[%s11762_s5 + $0x38] sm:$0xff]   ;;  %v5037_v63 = vrot.slane %v8453_v51, %v12211_v36 }
 0x70b   : > { %12213 = vst [vmem:[#allocation82_spill] sm:$0xff] %v11110_v10  ;;  %v4707_v27 = vmul.bf16 %v4685_v60, %v11113_v26  ;;  %v4710_v35 = vmul.bf16 %v4706_v22, %v11110_v10  ;;  %v5055_v2 = vpack.i.b16 %v5044_v43, %v5044_v43  ;;  %v4890_v51 = vrot.slane %v4885_v55, %v12212_v5 }
 0x70c   : > { %v5045_v46 = vcombine.high %v5037_v63, %v5037_v63  ;;  %v11137_v47 = vsel %vm4824_vm11, %v4821_v53, %v4823_v39 }
 0x70d   : > { %4737 = vmatpush1.bf16.msra.mxu1 %v4707_v27  ;;  %4779 = vmatprep.subr.bf16.mxu0 %v4710_v35  ;;  %v4819_v38 = vpop.permute.xlu1 %4818  ;;  %v5005_v60 = vpop.permute.xlu0 %5004  ;;  %v5214_v27 = vcombine.high %v8460_v49, %v8460_v49  ;;  %v4883_v35 = vrot.slane %v4878_v24, %v12212_v5  ;;  %12215 = vst [vmem:[#allocation70_spill] sm:$0xff] %v11137_v47 }
 0x70e   : > { %v11126_v22 = vsel %vm4824_vm11, %v4819_v38, %v4821_v53  ;;  %4780 = vmatpush1.bf16.msra.mxu0 %v4709_v13  ;;  %v5060_v13 = vrot.slane %v5055_v2, %v12212_v5  ;;  %v5048_v24 = vpack.i.b16 %v5037_v63, %v5037_v63  ;;  %v5062_v54 = vpack.i.b16 %v5045_v46, %v5045_v46  ;;  %v8467_v63 = vld.sshfl [vmem:[%s11764_s7 + $0x2c] sm:$0x33 pattern:$0x75316420] }
 0x70f   : > { %12214 = vst [vmem:[#allocation74_spill] sm:$0xff] %v11126_v22  ;;  %v4892_v20 = vmul.bf16 %v4876_v9, %v11126_v22  ;;  %v4893_v2 = vmul.bf16 %v4883_v35, %v11137_v47 }
 0x710   : > { %8443 = vmatmul.mubr.msk.bf16.vlgmr.msra.gmra.mxu1 %vm3195_vm2, %v8644_v45  ;;  %v5053_v46 = vrot.slane %v5048_v24, %v12212_v5  ;;  %v5067_v22 = vrot.slane %v5062_v54, %v12212_v5 }
 0x711   : > { %8444 = vmatmul.mubr.msk.bf16.vlgmr.msra.gmra.mxu0 %vm3195_vm2, %v8644_v45  ;;  %4920 = vmatprep.subr.bf16.mxu1 %v4892_v20  ;;  %v4817_v40 = vpop.permute.xlu1 %4816  ;;  %v5007_v57 = vpop.permute.xlu0 %5006  ;;  %v5069_v45 = vpack.i.b16 %v5046_v23, %v5046_v23  ;;  %v5228_v20 = vrot.slane %v5214_v27, %v12211_v36 }
 0x712   : > { %v11142_v9 = vsel %vm4824_vm11, %v4823_v39, %v4817_v40  ;;  %v11145_v43 = vsel %vm4824_vm11, %v4817_v40, %v4819_v38  ;;  %4938 = vmatprep.mubr.bf16.mxu1 %v12206_v7  ;;  %4981 = vmatprep.mubr.bf16.mxu0 %v12206_v7  ;;  %v8645_v39 = vld [vmem:[%s11762_s5 + $0x40] sm:$0xff]   ;;  %v5221_v38 = vrot.slane %v8460_v49, %v12211_v36 }
 0x713   : > { %12216 = vst [vmem:[#allocation64_spill] sm:$0xff] %v11142_v9  ;;  %12217 = vst [vmem:[#allocation23_spill] sm:$0xff] %v11145_v43  ;;  %v4891_v53 = vmul.bf16 %v4869_v15, %v11145_v43  ;;  %v4894_v55 = vmul.bf16 %v4890_v51, %v11142_v9  ;;  %v5398_v51 = vcombine.high %v8467_v63, %v8467_v63 }
 0x714   : > { %v5074_v40 = vrot.slane %v5069_v45, %v12212_v5  ;;  %v5239_v9 = vpack.i.b16 %v5228_v20, %v5228_v20  ;;  %v5230_v49 = vcombine.high %v5228_v20, %v5228_v20  ;;  %v5229_v43 = vcombine.high %v5221_v38, %v5221_v38 }
 0x715   : > { %4921 = vmatpush1.bf16.msra.mxu1 %v4891_v53  ;;  %4963 = vmatprep.subr.bf16.mxu0 %v4894_v55  ;;  %v5003_v15 = vpop.permute.xlu1 %5002  ;;  %v5189_v23 = vpop.permute.xlu0 %5188  ;;  %v5010_v53 = vsel %vm5008_vm12, %v5005_v60, %v5007_v57  ;;  %v5232_v54 = vpack.i.b16 %v5221_v38, %v5221_v38 }
 0x716   : > { %v5009_v27 = vsel %vm5008_vm12, %v5003_v15, %v5005_v60  ;;  %4964 = vmatpush1.bf16.msra.mxu0 %v4893_v2  ;;  %v5412_v2 = vrot.slane %v5398_v51, %v12211_v36  ;;  %v5244_v60 = vrot.slane %v5239_v9, %v12212_v5  ;;  %v8646_v51 = vld [vmem:[%s11762_s5 + $0x48] sm:$0xff]  }
 0x717   : > { %v5076_v35 = vmul.bf16 %v5060_v13, %v5009_v27  ;;  %v5253_v27 = vpack.i.b16 %v5230_v49, %v5230_v49  ;;  %v5237_v9 = vrot.slane %v5232_v54, %v12212_v5 }
 0x718   : > { %8450 = vmatmul.mubr.msk.bf16.vlgmr.msra.gmra.mxu1 %vm3195_vm2, %v8645_v39 }
 0x719   : > { %8451 = vmatmul.mubr.msk.bf16.vlgmr.msra.gmra.mxu0 %vm3195_vm2, %v8645_v39  ;;  %5104 = vmatprep.subr.bf16.mxu1 %v5076_v35  ;;  %v5001_v55 = vpop.permute.xlu1 %5000  ;;  %v5191_v10 = vpop.permute.xlu0 %5190  ;;  %v5077_v39 = vmul.bf16 %v5067_v22, %v5010_v53  ;;  %v5246_v35 = vpack.i.b16 %v5229_v43, %v5229_v43  ;;  %v8474_v22 = vld.sshfl [vmem:[%s11764_s7 + $0x30] sm:$0x33 pattern:$0x75316420] }
 0x71a   : > { %v5011_v13 = vsel %vm5008_vm12, %v5007_v57, %v5001_v55  ;;  %v5018_v24 = vsel %vm5008_vm12, %v5001_v55, %v5003_v15  ;;  %5122 = vmatprep.mubr.bf16.mxu1 %v12206_v7  ;;  %5165 = vmatprep.mubr.bf16.mxu0 %v12206_v7  ;;  %v5405_v57 = vrot.slane %v8467_v63, %v12211_v36 }
 0x71b   : > { %v5075_v45 = vmul.bf16 %v5053_v46, %v5018_v24  ;;  %v5078_v20 = vmul.bf16 %v5074_v40, %v5011_v13  ;;  %v5423_v55 = vpack.i.b16 %v5412_v2, %v5412_v2  ;;  %v5258_v46 = vrot.slane %v5253_v27, %v12212_v5 }
 0x71c   : > { %v5414_v40 = vcombine.high %v5412_v2, %v5412_v2  ;;  %v5582_v63 = vcombine.high %v8474_v22, %v8474_v22  ;;  %v5251_v49 = vrot.slane %v5246_v35, %v12212_v5  ;;  %v5413_v53 = vcombine.high %v5405_v57, %v5405_v57 }
 0x71d   : > { %5105 = vmatpush1.bf16.msra.mxu1 %v5075_v45  ;;  %5147 = vmatprep.subr.bf16.mxu0 %v5078_v20  ;;  %v5187_v15 = vpop.permute.xlu1 %5186  ;;  %v5373_v47 = vpop.permute.xlu0 %5372  ;;  %v5194_v13 = vsel %vm5192_vm13, %v5189_v23, %v5191_v10  ;;  %v5428_v54 = vrot.slane %v5423_v55, %v12212_v5  ;;  %v5416_v2 = vpack.i.b16 %v5405_v57, %v5405_v57  ;;  %v8647_v55 = vld [vmem:[%s11762_s5 + $0x50] sm:$0xff]   ;;  %v8486_v57 = vld.sshfl [vmem:[%s11764_s7 + $0x38] sm:$0x33 pattern:$0x75316420] }
 0x71e   : > { %v5193_v38 = vsel %vm5192_vm13, %v5187_v15, %v5189_v23  ;;  %5148 = vmatpush1.bf16.msra.mxu0 %v5077_v39  ;;  %v5437_v35 = vpack.i.b16 %v5414_v40, %v5414_v40  ;;  %v5596_v23 = vrot.slane %v5582_v63, %v12211_v36  ;;  %v5871_v40 = vcombine.high %v8486_v57, %v8486_v57 }
 0x71f   : > { %v5260_v43 = vmul.bf16 %v5244_v60, %v5193_v38  ;;  %v5430_v38 = vpack.i.b16 %v5413_v53, %v5413_v53 }
 0x720   : > { %8457 = vmatmul.mubr.msk.bf16.vlgmr.msra.gmra.mxu1 %vm3195_vm2, %v8646_v51  ;;  %v5607_v53 = vpack.i.b16 %v5596_v23, %v5596_v23 }
 0x721   : > { %8458 = vmatmul.mubr.msk.bf16.vlgmr.msra.gmra.mxu0 %vm3195_vm2, %v8646_v51  ;;  %5288 = vmatprep.subr.bf16.mxu1 %v5260_v43  ;;  %v5185_v24 = vpop.permute.xlu1 %5184  ;;  %v5375_v45 = vpop.permute.xlu0 %5374  ;;  %v5261_v51 = vmul.bf16 %v5251_v49, %v5194_v13  ;;  %v5442_v49 = vrot.slane %v5437_v35, %v12212_v5  ;;  %v5435_v13 = vrot.slane %v5430_v38, %v12212_v5 }
 0x722   : > { %v5195_v20 = vsel %vm5192_vm13, %v5191_v10, %v5185_v24  ;;  %v5202_v60 = vsel %vm5192_vm13, %v5185_v24, %v5187_v15  ;;  %5306 = vmatprep.mubr.bf16.mxu1 %v12206_v7  ;;  %5349 = vmatprep.mubr.bf16.mxu0 %v12206_v7  ;;  %v5589_v10 = vrot.slane %v8474_v22, %v12211_v36 }
 0x723   : > { %v5259_v27 = vmul.bf16 %v5237_v9, %v5202_v60  ;;  %v5262_v39 = vmul.bf16 %v5258_v46, %v5195_v20  ;;  %v5421_v46 = vrot.slane %v5416_v2, %v12212_v5  ;;  %v5598_v22 = vcombine.high %v5596_v23, %v5596_v23 }
 0x724   : > { %v5597_v24 = vcombine.high %v5589_v10, %v5589_v10  ;;  %v5378_v20 = vsel %vm5376_vm14, %v5373_v47, %v5375_v45  ;;  %v5885_v35 = vrot.slane %v5871_v40, %v12211_v36 }
 0x725   : > { %5289 = vmatpush1.bf16.msra.mxu1 %v5259_v27  ;;  %5331 = vmatprep.subr.bf16.mxu0 %v5262_v39  ;;  %v5371_v15 = vpop.permute.xlu1 %5370  ;;  %v5557_v9 = vpop.permute.xlu0 %5556  ;;  %v5600_v27 = vpack.i.b16 %v5589_v10, %v5589_v10  ;;  %v5621_v38 = vpack.i.b16 %v5598_v22, %v5598_v22  ;;  %v8648_v10 = vld [vmem:[%s11762_s5 + $0x58] sm:$0xff]  }
 0x726   : > { %v5377_v43 = vsel %vm5376_vm14, %v5371_v15, %v5373_v47  ;;  %5332 = vmatpush1.bf16.msra.mxu0 %v5261_v51  ;;  %v5612_v47 = vrot.slane %v5607_v53, %v12212_v5  ;;  %v5896_v40 = vpack.i.b16 %v5885_v35, %v5885_v35 }
 0x727   : > { %v5444_v63 = vmul.bf16 %v5428_v54, %v5377_v43  ;;  %v5614_v43 = vpack.i.b16 %v5597_v24, %v5597_v24  ;;  %v5626_v22 = vrot.slane %v5621_v38, %v12212_v5 }
 0x728   : > { %8464 = vmatmul.mubr.msk.bf16.vlgmr.msra.gmra.mxu1 %vm3195_vm2, %v8647_v55 }
 0x729   : > { %8465 = vmatmul.mubr.msk.bf16.vlgmr.msra.gmra.mxu0 %vm3195_vm2, %v8647_v55  ;;  %5472 = vmatprep.subr.bf16.mxu1 %v5444_v63  ;;  %v5369_v60 = vpop.permute.xlu1 %5368  ;;  %v5559_v39 = vpop.permute.xlu0 %5558  ;;  %v5445_v55 = vmul.bf16 %v5435_v13, %v5378_v20  ;;  %v5887_v13 = vcombine.high %v5885_v35, %v5885_v35  ;;  %v5619_v20 = vrot.slane %v5614_v43, %v12212_v5 }
 0x72a   : > { %v5379_v2 = vsel %vm5376_vm14, %v5375_v45, %v5369_v60  ;;  %v5386_v54 = vsel %vm5376_vm14, %v5369_v60, %v5371_v15  ;;  %5490 = vmatprep.mubr.bf16.mxu1 %v12206_v7  ;;  %5533 = vmatprep.mubr.bf16.mxu0 %v12206_v7  ;;  %v5878_v60 = vrot.slane %v8486_v57, %v12211_v36 }
 0x72b   : > { %v5443_v23 = vmul.bf16 %v5421_v46, %v5386_v54  ;;  %v5446_v51 = vmul.bf16 %v5442_v49, %v5379_v2  ;;  %v5605_v46 = vrot.slane %v5600_v27, %v12212_v5  ;;  %v8493_v49 = vld.sshfl [vmem:[%s11764_s7 + $0x3c] sm:$0x33 pattern:$0x75316420]  ;;  %v5562_v2 = vsel %vm5560_vm15, %v5557_v9, %v5559_v39 }
 0x72c   : > { %v6055_v24 = vcombine.high %v8493_v49, %v8493_v49  ;;  %v5901_v35 = vrot.slane %v5896_v40, %v12212_v5  ;;  %v5910_v57 = vpack.i.b16 %v5887_v13, %v5887_v13  ;;  %v5886_v43 = vcombine.high %v5878_v60, %v5878_v60  ;;  %v8500_v40 = vld.sshfl [vmem:[%s11764_s7 + $0x40] sm:$0x33 pattern:$0x75316420] }
 0x72d   : > { %5473 = vmatpush1.bf16.msra.mxu1 %v5443_v23  ;;  %5515 = vmatprep.subr.bf16.mxu0 %v5446_v51  ;;  %v5555_v45 = vpop.permute.xlu1 %5554  ;;  %v11216_v15 = vpop.permute.xlu0 %5845 }
 0x72e   : > { %v5561_v63 = vsel %vm5560_vm15, %v5555_v45, %v5557_v9  ;;  %5516 = vmatpush1.bf16.msra.mxu0 %v5445_v55  ;;  %v6069_v9 = vrot.slane %v6055_v24, %v12211_v36  ;;  %v5629_v55 = vmul.bf16 %v5619_v20, %v5562_v2  ;;  %v5915_v13 = vrot.slane %v5910_v57, %v12212_v5 }
 0x72f   : > { %v5628_v53 = vmul.bf16 %v5612_v47, %v5561_v63  ;;  %v6239_v20 = vcombine.high %v8500_v40, %v8500_v40  ;;  %v5903_v2 = vpack.i.b16 %v5886_v43, %v5886_v43 }
 0x730   : > { %8471 = vmatmul.mubr.msk.bf16.vlgmr.msra.gmra.mxu1 %vm3195_vm2, %v8648_v10  ;;  %v6080_v24 = vpack.i.b16 %v6069_v9, %v6069_v9 }
 0x731   : > { %8472 = vmatmul.mubr.msk.bf16.vlgmr.msra.gmra.mxu0 %vm3195_vm2, %v8648_v10  ;;  %5656 = vmatprep.subr.bf16.mxu1 %v5628_v53  ;;  %v5553_v27 = vpop.permute.xlu1 %5552  ;;  %v5848_v54 = vpop.permute.xlu0 %5847  ;;  %v8649_v10 = vld [vmem:[%s11762_s5 + $0x60] sm:$0xff]   ;;  %v6071_v53 = vcombine.high %v6069_v9, %v6069_v9 }
 0x732   : > { %v5563_v23 = vsel %vm5560_vm15, %v5559_v39, %v5553_v27  ;;  %v5570_v51 = vsel %vm5560_vm15, %v5553_v27, %v5555_v45  ;;  %5674 = vmatprep.mubr.bf16.mxu1 %v12206_v7  ;;  %5717 = vmatprep.mubr.bf16.mxu0 %v12206_v7  ;;  %v6062_v27 = vrot.slane %v8493_v49, %v12211_v36 }
 0x733   : > { %v5627_v47 = vmul.bf16 %v5605_v46, %v5570_v51  ;;  %v5630_v38 = vmul.bf16 %v5626_v22, %v5563_v23  ;;  %v5889_v46 = vpack.i.b16 %v5878_v60, %v5878_v60  ;;  %v6253_v49 = vrot.slane %v6239_v20, %v12211_v36 }
 0x734   : > { %v5852_v9 = vsel %vm5849_vm0, %v11216_v15, %v5848_v54 }
 0x735   : > { %5657 = vmatpush1.bf16.msra.mxu1 %v5627_v47  ;;  %5699 = vmatprep.subr.bf16.mxu0 %v5630_v38  ;;  %v5844_v39 = vpop.permute.xlu1 %5843  ;;  %v11238_v45 = vpop.permute.xlu0 %6029  ;;  %v5894_v23 = vrot.slane %v5889_v46, %v12212_v5  ;;  %v6085_v47 = vrot.slane %v6080_v24, %v12212_v5  ;;  %v6070_v38 = vcombine.high %v6062_v27, %v6062_v27 }
 0x736   : > { %v5851_v63 = vsel %vm5849_vm0, %v5844_v39, %v11216_v15  ;;  %5700 = vmatpush1.bf16.msra.mxu0 %v5629_v55  ;;  %5761 = vmatprep.subr.bf16.mxu1 %v10772_v58  ;;  %v6255_v46 = vcombine.high %v6253_v49, %v6253_v49  ;;  %v6264_v24 = vpack.i.b16 %v6253_v49, %v6253_v49 }
 0x737   : > { %v5917_v22 = vmul.bf16 %v5901_v35, %v5851_v63  ;;  %5804 = vmatprep.subr.bf16.mxu0 %v10776_v31  ;;  %v6094_v31 = vpack.i.b16 %v6071_v53, %v6071_v53  ;;  %v6087_v20 = vpack.i.b16 %v6070_v38, %v6070_v38 }
 0x738   : > { %8478 = vmatmul.mubr.msk.bf16.vlgmr.msra.gmra.mxu1 %vm3195_vm2, %v8649_v10 }
 0x739   : > { %8479 = vmatmul.mubr.msk.bf16.vlgmr.msra.gmra.mxu0 %vm3195_vm2, %v8649_v10  ;;  %5762 = vmatpush1.bf16.msra.mxu1 %v10770_v32  ;;  %v5842_v58 = vpop.permute.xlu1 %5841  ;;  %v6032_v60 = vpop.permute.xlu0 %6031  ;;  %v5908_v32 = vrot.slane %v5903_v2, %v12212_v5  ;;  %v6073_v10 = vpack.i.b16 %v6062_v27, %v6062_v27  ;;  %v6099_v63 = vrot.slane %v6094_v31, %v12212_v5  ;;  %v11282_v31 = vld.sshfl [vmem:[%s11764_s7 + $0x48] sm:$0x33 pattern:$0x75316420] }
 0x73a   : > { %v5859_v51 = vsel %vm5849_vm0, %v5848_v54, %v5842_v58  ;;  %5805 = vmatpush1.bf16.msra.mxu0 %v10780_v0  ;;  %5945 = vmatprep.subr.bf16.mxu1 %v5917_v22  ;;  %v5850_v57 = vsel %vm5849_vm0, %v5842_v58, %v5844_v39  ;;  %v8650_v0 = vld [vmem:[%s11762_s5 + $0x68] sm:$0xff]   ;;  %v8507_v39 = vld.sshfl [vmem:[%s11764_s7 + $0x44] sm:$0x33 pattern:$0x75316420]  ;;  %v6246_v2 = vrot.slane %v8500_v40, %v12211_v36 }
 0x73b   : > { %v5919_v35 = vmul.bf16 %v5915_v13, %v5859_v51  ;;  %5779 = vmatprep.mubr.bf16.mxu1 %v12206_v7  ;;  %5822 = vmatprep.mubr.bf16.mxu0 %v12206_v7  ;;  %v5916_v53 = vmul.bf16 %v5894_v23, %v5850_v57  ;;  %v6423_v15 = vcombine.high %v8507_v39, %v8507_v39  ;;  %v8651_v57 = vld [vmem:[%s11762_s5 + $0x70] sm:$0xff]  }
 0x73c   : > { %v5918_v54 = vmul.bf16 %v5908_v32, %v5852_v9  ;;  %v6078_v58 = vrot.slane %v6073_v10, %v12212_v5  ;;  %v6278_v51 = vpack.i.b16 %v6255_v46, %v6255_v46  ;;  %v6092_v49 = vrot.slane %v6087_v20, %v12212_v5 }
 0x73d   : > { %5988 = vmatprep.subr.bf16.mxu0 %v5919_v35  ;;  %v6028_v55 = vpop.permute.xlu1 %6027  ;;  %v11272_v22 = vpop.permute.xlu0 %6213  ;;  %v6437_v40 = vrot.slane %v6423_v15, %v12211_v36  ;;  %v6254_v32 = vcombine.high %v6246_v2, %v6246_v2  ;;  %v6587_v10 = vcombine.high %v11282_v31, %v11282_v31  ;;  %v6257_v46 = vpack.i.b16 %v6246_v2, %v6246_v2  ;;  %v11306_v2 = vld.sshfl [vmem:[%s11764_s7 + $0x4c] sm:$0x33 pattern:$0x75316420] }
 0x73e   : > { %v6035_v43 = vsel %vm6033_vm1, %v6028_v55, %v11238_v45 }
 0x73f   : > { %v6101_v13 = vmul.bf16 %v6085_v47, %v6035_v43  ;;  %v6269_v47 = vrot.slane %v6264_v24, %v12212_v5  ;;  %v6448_v24 = vpack.i.b16 %v6437_v40, %v6437_v40  ;;  %v6439_v15 = vcombine.high %v6437_v40, %v6437_v40 }
 0x740   : > { %8483 = vmatmul.mubr.msk.bf16.vlgmr.msra.gmra.mxu1 %vm3195_vm2, %v8650_v0  ;;  %v6271_v20 = vpack.i.b16 %v6254_v32, %v6254_v32 }
 0x741   : > { %5946 = vmatpush1.bf16.msra.mxu1 %v5916_v53  ;;  %8484 = vmatmul.mubr.msk.bf16.vlgmr.msra.gmra.mxu0 %vm3195_vm2, %v8650_v0  ;;  %v6026_v27 = vpop.permute.xlu1 %6025  ;;  %v6036_v0 = vsel %vm6033_vm1, %v11238_v45, %v6032_v60  ;;  %v6216_v9 = vpop.permute.xlu0 %6215  ;;  %v6430_v45 = vrot.slane %v8507_v39, %v12211_v36  ;;  %v6453_v39 = vrot.slane %v6448_v24, %v12212_v5 }
 0x742   : > { %5989 = vmatpush1.bf16.msra.mxu0 %v5918_v54  ;;  %6129 = vmatprep.subr.bf16.mxu1 %v6101_v13  ;;  %v6043_v23 = vsel %vm6033_vm1, %v6032_v60, %v6026_v27  ;;  %v6034_v38 = vsel %vm6033_vm1, %v6026_v27, %v6028_v55  ;;  %v6283_v55 = vrot.slane %v6278_v51, %v12212_v5 }
 0x743   : > { %v6103_v35 = vmul.bf16 %v6099_v63, %v6043_v23  ;;  %5963 = vmatprep.mubr.bf16.mxu1 %v12206_v7  ;;  %6006 = vmatprep.mubr.bf16.mxu0 %v12206_v7  ;;  %v6100_v53 = vmul.bf16 %v6078_v58, %v6034_v38  ;;  %v6102_v54 = vmul.bf16 %v6092_v49, %v6036_v0  ;;  %v8652_v38 = vld [vmem:[%s11762_s5 + $0x78] sm:$0xff]  }
 0x744   : > { %v6601_v27 = vrot.slane %v6587_v10, %v12211_v36  ;;  %v6262_v58 = vrot.slane %v6257_v46, %v12212_v5  ;;  %v6276_v40 = vrot.slane %v6271_v20, %v12212_v5  ;;  %v6438_v49 = vcombine.high %v6430_v45, %v6430_v45 }
 0x745   : > { %6172 = vmatprep.subr.bf16.mxu0 %v6103_v35  ;;  %v6212_v43 = vpop.permute.xlu1 %6211  ;;  %v6398_v51 = vpop.permute.xlu0 %6397  ;;  %v6220_v10 = vsel %vm6217_vm3, %v11272_v22, %v6216_v9 }
 0x746   : > { %v6219_v63 = vsel %vm6217_vm3, %v6212_v43, %v11272_v22  ;;  %v6603_v0 = vcombine.high %v6601_v27, %v6601_v27  ;;  %v6612_v24 = vpack.i.b16 %v6601_v27, %v6601_v27 }
 0x747   : > { %v6285_v13 = vmul.bf16 %v6269_v47, %v6219_v63  ;;  %v6462_v47 = vpack.i.b16 %v6439_v15, %v6439_v15  ;;  %v6286_v15 = vmul.bf16 %v6276_v40, %v6220_v10 }
 0x748   : > { %8490 = vmatmul.mubr.msk.bf16.vlgmr.msra.gmra.mxu1 %vm3195_vm2, %v8651_v57 }
 0x749   : > { %6130 = vmatpush1.bf16.msra.mxu1 %v6100_v53  ;;  %8491 = vmatmul.mubr.msk.bf16.vlgmr.msra.gmra.mxu0 %vm3195_vm2, %v8651_v57  ;;  %v6210_v60 = vpop.permute.xlu1 %6209  ;;  %v6751_v57 = vcombine.high %v11306_v2, %v11306_v2 }
 0x74a   : > { %6173 = vmatpush1.bf16.msra.mxu0 %v6102_v54  ;;  %6313 = vmatprep.subr.bf16.mxu1 %v6285_v13  ;;  %v6227_v23 = vsel %vm6217_vm3, %v6216_v9, %v6210_v60  ;;  %v6218_v32 = vsel %vm6217_vm3, %v6210_v60, %v6212_v43  ;;  %v6441_v13 = vpack.i.b16 %v6430_v45, %v6430_v45 }
 0x74b   : > { %v6287_v35 = vmul.bf16 %v6283_v55, %v6227_v23  ;;  %6147 = vmatprep.mubr.bf16.mxu1 %v12206_v7  ;;  %6190 = vmatprep.mubr.bf16.mxu0 %v12206_v7  ;;  %v6284_v55 = vmul.bf16 %v6262_v58, %v6218_v32  ;;  %v6467_v43 = vrot.slane %v6462_v47, %v12212_v5  ;;  %v6400_v23 = vpop.permute.xlu0 %6399 }
 0x74c   : > { %v6455_v54 = vpack.i.b16 %v6438_v49, %v6438_v49  ;;  %v6765_v20 = vrot.slane %v6751_v57, %v12211_v36  ;;  %v6626_v60 = vpack.i.b16 %v6603_v0, %v6603_v0  ;;  %v6594_v9 = vrot.slane %v11282_v31, %v12211_v36  ;;  %v8653_v49 = vld [vmem:[%s11762_s5 + $0x80] sm:$0xff]  }
 0x74d   : > { %6356 = vmatprep.subr.bf16.mxu0 %v6287_v35  ;;  %v6396_v63 = vpop.permute.xlu1 %6395  ;;  %v6446_v27 = vrot.slane %v6441_v13, %v12212_v5  ;;  %v6617_v35 = vrot.slane %v6612_v24, %v12212_v5  ;;  %v6404_v57 = vsel %vm6401_vm4, %v6398_v51, %v6400_v23 }
 0x74e   : > { %v6403_v46 = vsel %vm6401_vm4, %v6396_v63, %v6398_v51  ;;  %v6602_v47 = vcombine.high %v6594_v9, %v6594_v9  ;;  %v6460_v31 = vrot.slane %v6455_v54, %v12212_v5  ;;  %v6767_v32 = vcombine.high %v6765_v20, %v6765_v20 }
 0x74f   : > { %v6469_v53 = vmul.bf16 %v6453_v39, %v6403_v46  ;;  %v8528_v39 = vld.sshfl [vmem:[%s11764_s7 + $0x50] sm:$0x33 pattern:$0x75316420]  ;;  %v6605_v0 = vpack.i.b16 %v6594_v9, %v6594_v9  ;;  %v6758_v51 = vrot.slane %v11306_v2, %v12211_v36  ;;  %v8654_v2 = vld [vmem:[%s11762_s5 + $0x88] sm:$0xff]  }
 0x750   : > { %8497 = vmatmul.mubr.msk.bf16.vlgmr.msra.gmra.mxu1 %vm3195_vm2, %v8652_v38  ;;  %v6915_v10 = vcombine.high %v8528_v39, %v8528_v39  ;;  %v6619_v13 = vpack.i.b16 %v6602_v47, %v6602_v47 }
 0x751   : > { %6314 = vmatpush1.bf16.msra.mxu1 %v6284_v55  ;;  %8498 = vmatmul.mubr.msk.bf16.vlgmr.msra.gmra.mxu0 %vm3195_vm2, %v8652_v38  ;;  %v6394_v22 = vpop.permute.xlu1 %6393  ;;  %v6631_v38 = vrot.slane %v6626_v60, %v12212_v5  ;;  %v6633_v55 = vmul.bf16 %v6617_v35, %v10910_v14  ;;  %v6766_v54 = vcombine.high %v6758_v51, %v6758_v51  ;;  %v8535_v60 = vld.sshfl [vmem:[%s11764_s7 + $0x54] sm:$0x33 pattern:$0x75316420] }
 0x752   : > { %6357 = vmatpush1.bf16.msra.mxu0 %v6286_v15  ;;  %6497 = vmatprep.subr.bf16.mxu1 %v6469_v53  ;;  %v6411_v45 = vsel %vm6401_vm4, %v6400_v23, %v6394_v22  ;;  %v6402_v40 = vsel %vm6401_vm4, %v6394_v22, %v6396_v63  ;;  %v6776_v53 = vpack.i.b16 %v6765_v20, %v6765_v20 }
 0x753   : > { %v6471_v58 = vmul.bf16 %v6467_v43, %v6411_v45  ;;  %6331 = vmatprep.mubr.bf16.mxu1 %v12206_v7  ;;  %6374 = vmatprep.mubr.bf16.mxu0 %v12206_v7  ;;  %v6468_v46 = vmul.bf16 %v6446_v27, %v6402_v40  ;;  %v6470_v43 = vmul.bf16 %v6460_v31, %v6404_v57  ;;  %v8542_v57 = vld.sshfl [vmem:[%s11764_s7 + $0x58] sm:$0x33 pattern:$0x75316420] }
 0x754   : > { %v6790_v63 = vpack.i.b16 %v6767_v32, %v6767_v32  ;;  %v6635_v24 = vmul.bf16 %v6631_v38, %v10918_v29  ;;  %v6610_v15 = vrot.slane %v6605_v0, %v12212_v5  ;;  %v6929_v14 = vrot.slane %v6915_v10, %v12211_v36 }
 0x755   : > { %6540 = vmatprep.subr.bf16.mxu0 %v6471_v58  ;;  %v6781_v20 = vrot.slane %v6776_v53, %v12212_v5  ;;  %v6624_v29 = vrot.slane %v6619_v13, %v12212_v5  ;;  %v6769_v9 = vpack.i.b16 %v6758_v51, %v6758_v51  ;;  %v7079_v27 = vcombine.high %v8535_v60, %v8535_v60 }
 0x756   : > { %v6795_v23 = vrot.slane %v6790_v63, %v12212_v5  ;;  %v6931_v22 = vcombine.high %v6929_v14, %v6929_v14  ;;  %v6632_v45 = vmul.bf16 %v6610_v15, %v10899_v30  ;;  %v6783_v58 = vpack.i.b16 %v6766_v54, %v6766_v54 }
 0x757   : > { %v6797_v35 = vmul.bf16 %v6781_v20, %v10879_v37  ;;  %v6940_v47 = vpack.i.b16 %v6929_v14, %v6929_v14  ;;  %v6634_v31 = vmul.bf16 %v6624_v29, %v10915_v52  ;;  %v6922_v32 = vrot.slane %v8528_v39, %v12211_v36  ;;  %v8655_v39 = vld [vmem:[%s11762_s5 + $0x90] sm:$0xff]   ;;  %v8549_v20 = vld.sshfl [vmem:[%s11764_s7 + $0x5c] sm:$0x33 pattern:$0x75316420] }
 0x758   : > { %8504 = vmatmul.mubr.msk.bf16.vlgmr.msra.gmra.mxu1 %vm3195_vm2, %v8653_v49  ;;  %v6799_v40 = vmul.bf16 %v6795_v23, %v10863_v6  ;;  %v6774_v30 = vrot.slane %v6769_v9, %v12212_v5  ;;  %v7093_v38 = vrot.slane %v7079_v27, %v12211_v36  ;;  %v6788_v37 = vrot.slane %v6783_v58, %v12212_v5  ;;  %v8656_v29 = vld [vmem:[%s11762_s5 + $0x98] sm:$0xff]  }
 0x759   : > { %6498 = vmatpush1.bf16.msra.mxu1 %v6468_v46  ;;  %8505 = vmatmul.mubr.msk.bf16.vlgmr.msra.gmra.mxu0 %vm3195_vm2, %v8653_v49  ;;  %v6954_v49 = vpack.i.b16 %v6931_v22, %v6931_v22  ;;  %v6945_v52 = vrot.slane %v6940_v47, %v12212_v5  ;;  %v6930_v6 = vcombine.high %v6922_v32, %v6922_v32 }
 0x75a   : > { %6541 = vmatpush1.bf16.msra.mxu0 %v6470_v43  ;;  %6661 = vmatprep.subr.bf16.mxu1 %v6633_v55  ;;  %v7095_v10 = vcombine.high %v7093_v38, %v7093_v38  ;;  %v6796_v46 = vmul.bf16 %v6774_v30, %v10853_v41  ;;  %v6933_v55 = vpack.i.b16 %v6922_v32, %v6922_v32  ;;  %v8556_v32 = vld.sshfl [vmem:[%s11764_s7 + $0x60] sm:$0x33 pattern:$0x75316420] }
 0x75b   : > { %6704 = vmatprep.subr.bf16.mxu0 %v6635_v24  ;;  %6515 = vmatprep.mubr.bf16.mxu1 %v12206_v7  ;;  %v6959_v0 = vrot.slane %v6954_v49, %v12212_v5  ;;  %v7243_v53 = vcombine.high %v8542_v57, %v8542_v57  ;;  %v6798_v13 = vmul.bf16 %v6788_v37, %v10882_v56  ;;  %v8657_v30 = vld [vmem:[%s11762_s5 + $0xa0] sm:$0xff]  }
 0x75c   : > { %6558 = vmatprep.mubr.bf16.mxu0 %v12206_v7  ;;  %v6961_v43 = vmul.bf16 %v6945_v52, %v10945_v34  ;;  %v7104_v63 = vpack.i.b16 %v7093_v38, %v7093_v38  ;;  %v6947_v24 = vpack.i.b16 %v6930_v6, %v6930_v6  ;;  %v7118_v15 = vpack.i.b16 %v7095_v10, %v7095_v10 }
 0x75d   : > { %v6963_v51 = vmul.bf16 %v6959_v0, %v10953_v16  ;;  %v7086_v14 = vrot.slane %v8535_v60, %v12211_v36  ;;  %v6938_v41 = vrot.slane %v6933_v55, %v12212_v5  ;;  %v7257_v56 = vrot.slane %v7243_v53, %v12211_v36 }
 0x75e   : > { %v7109_v34 = vrot.slane %v7104_v63, %v12212_v5  ;;  %v6952_v54 = vrot.slane %v6947_v24, %v12212_v5  ;;  %v7123_v60 = vrot.slane %v7118_v15, %v12212_v5  ;;  %v7407_v9 = vcombine.high %v8549_v20, %v8549_v20  ;;  %v8563_v63 = vld.sshfl [vmem:[%s11764_s7 + $0x64] sm:$0x33 pattern:$0x75316420]  ;;  %v8658_v24 = vld [vmem:[%s11762_s5 + $0xa8] sm:$0xff]  }
 0x75f   : > { %v7094_v16 = vcombine.high %v7086_v14, %v7086_v14  ;;  %v6960_v23 = vmul.bf16 %v6938_v41, %v10932_v3  ;;  %v7097_v22 = vpack.i.b16 %v7086_v14, %v7086_v14  ;;  %v7268_v58 = vpack.i.b16 %v7257_v56, %v7257_v56 }
 0x760   : > { %8511 = vmatmul.mubr.msk.bf16.vlgmr.msra.gmra.mxu1 %vm3195_vm2, %v8654_v2  ;;  %v6962_v27 = vmul.bf16 %v6952_v54, %v10950_v62  ;;  %v7127_v47 = vmul.bf16 %v7123_v60, %v10985_v28 }
 0x761   : > { %6662 = vmatpush1.bf16.msra.mxu1 %v6632_v45  ;;  %8512 = vmatmul.mubr.msk.bf16.vlgmr.msra.gmra.mxu0 %vm3195_vm2, %v8654_v2  ;;  %v7259_v2 = vcombine.high %v7257_v56, %v7257_v56  ;;  %v7125_v45 = vmul.bf16 %v7109_v34, %v10977_v4  ;;  %v7102_v3 = vrot.slane %v7097_v22, %v12212_v5  ;;  %v8570_v22 = vld.sshfl [vmem:[%s11764_s7 + $0x68] sm:$0x33 pattern:$0x75316420] }
 0x762   : > { %6705 = vmatpush1.bf16.msra.mxu0 %v6634_v31  ;;  %6825 = vmatprep.subr.bf16.mxu1 %v6797_v35  ;;  %v7111_v35 = vpack.i.b16 %v7094_v16, %v7094_v16  ;;  %v7421_v4 = vrot.slane %v7407_v9, %v12211_v36  ;;  %v7273_v62 = vrot.slane %v7268_v58, %v12212_v5  ;;  %v8659_v9 = vld [vmem:[%s11762_s5 + $0xb0] sm:$0xff]  }
 0x763   : > { %6868 = vmatprep.subr.bf16.mxu0 %v6799_v40  ;;  %6679 = vmatprep.mubr.bf16.mxu1 %v12206_v7  ;;  %v7282_v31 = vpack.i.b16 %v7259_v2, %v7259_v2  ;;  %v7250_v40 = vrot.slane %v8542_v57, %v12211_v36  ;;  %v7124_v52 = vmul.bf16 %v7102_v3, %v10969_v59 }
 0x764   : > { %6722 = vmatprep.mubr.bf16.mxu0 %v12206_v7  ;;  %v7116_v49 = vrot.slane %v7111_v35, %v12212_v5  ;;  %v7423_v37 = vcombine.high %v7421_v4, %v7421_v4  ;;  %v7571_v57 = vcombine.high %v8556_v32, %v8556_v32  ;;  %v7432_v10 = vpack.i.b16 %v7421_v4, %v7421_v4 }
 0x765   : > { %v7258_v28 = vcombine.high %v7250_v40, %v7250_v40  ;;  %v7287_v38 = vrot.slane %v7282_v31, %v12212_v5  ;;  %v7261_v6 = vpack.i.b16 %v7250_v40, %v7250_v40  ;;  %v7735_v56 = vcombine.high %v8563_v63, %v8563_v63 }
 0x766   : > { %v7126_v0 = vmul.bf16 %v7116_v49, %v10982_v8  ;;  %v7446_v53 = vpack.i.b16 %v7423_v37, %v7423_v37  ;;  %v7437_v8 = vrot.slane %v7432_v10, %v12212_v5  ;;  %v7578_v2 = vrot.slane %v8556_v32, %v12211_v36 }
 0x767   : > { %v7291_v55 = vmul.bf16 %v7287_v38, %v11017_v21  ;;  %v7266_v59 = vrot.slane %v7261_v6, %v12212_v5 }
 0x768   : > { %8518 = vmatmul.mubr.msk.bf16.vlgmr.msra.gmra.mxu1 %vm3195_vm2, %v8655_v39  ;;  %v7453_v34 = vmul.bf16 %v7437_v8, %v11041_v44  ;;  %v7749_v44 = vrot.slane %v7735_v56, %v12211_v36  ;;  %v7589_v35 = vpack.i.b16 %v7578_v2, %v7578_v2 }
 0x769   : > { %6826 = vmatpush1.bf16.msra.mxu1 %v6796_v46  ;;  %8519 = vmatmul.mubr.msk.bf16.vlgmr.msra.gmra.mxu0 %vm3195_vm2, %v8655_v39  ;;  %v7289_v39 = vmul.bf16 %v7273_v62, %v11009_v11  ;;  %v7275_v46 = vpack.i.b16 %v7258_v28, %v7258_v28  ;;  %v7585_v11 = vrot.slane %v7571_v57, %v12211_v36 }
 0x76a   : > { %6869 = vmatpush1.bf16.msra.mxu0 %v6798_v13  ;;  %6989 = vmatprep.subr.bf16.mxu1 %v6961_v43  ;;  %v7414_v13 = vrot.slane %v8549_v20, %v12211_v36  ;;  %v7288_v14 = vmul.bf16 %v7266_v59, %v10998_v1  ;;  %v7760_v3 = vpack.i.b16 %v7749_v44, %v7749_v44 }
 0x76b   : > { %7032 = vmatprep.subr.bf16.mxu0 %v6963_v51  ;;  %6843 = vmatprep.mubr.bf16.mxu1 %v12206_v7  ;;  %v7280_v43 = vrot.slane %v7275_v46, %v12212_v5  ;;  %v7451_v51 = vrot.slane %v7446_v53, %v12212_v5  ;;  %v7587_v15 = vcombine.high %v7585_v11, %v7585_v11 }
 0x76c   : > { %6886 = vmatprep.mubr.bf16.mxu0 %v12206_v7  ;;  %v7422_v21 = vcombine.high %v7414_v13, %v7414_v13  ;;  %v7425_v41 = vpack.i.b16 %v7414_v13, %v7414_v13  ;;  %v7596_v16 = vpack.i.b16 %v7585_v11, %v7585_v11  ;;  %v7742_v28 = vrot.slane %v8563_v63, %v12211_v36 }
 0x76d   : > { %v7290_v54 = vmul.bf16 %v7280_v43, %v11014_v48  ;;  %v7610_v60 = vpack.i.b16 %v7587_v15, %v7587_v15  ;;  %v7906_v53 = vrot.slane %v8570_v22, %v12211_v36 }
 0x76e   : > { %v7439_v20 = vpack.i.b16 %v7422_v21, %v7422_v21  ;;  %v7430_v1 = vrot.slane %v7425_v41, %v12212_v5  ;;  %v7601_v48 = vrot.slane %v7596_v16, %v12212_v5  ;;  %v7753_v6 = vpack.i.b16 %v7742_v28, %v7742_v28  ;;  %v12218_v21 = vld [vmem:[#allocation70_spill] sm:$0xff] }
 0x76f   : > { %v7914_v13 = vcombine.high %v7906_v53, %v7906_v53  ;;  %v7917_v43 = vpack.i.b16 %v7906_v53, %v7906_v53 }
 0x770   : > { %8525 = vmatmul.mubr.msk.bf16.vlgmr.msra.gmra.mxu1 %vm3195_vm2, %v8656_v29  ;;  %v7452_v58 = vmul.bf16 %v7430_v1, %v11033_v17  ;;  %v7617_v31 = vmul.bf16 %v7601_v48, %v11073_v42  ;;  %v7594_v17 = vrot.slane %v7589_v35, %v12212_v5  ;;  %v12222_v48 = vld [vmem:[#allocation64_spill] sm:$0xff] }
 0x771   : > { %6990 = vmatpush1.bf16.msra.mxu1 %v6960_v23  ;;  %8526 = vmatmul.mubr.msk.bf16.vlgmr.msra.gmra.mxu0 %vm3195_vm2, %v8656_v29  ;;  %v7455_v29 = vmul.bf16 %v7451_v51, %v11049_v33  ;;  %v7444_v23 = vrot.slane %v7439_v20, %v12212_v5  ;;  %v7586_v33 = vcombine.high %v7578_v2, %v7578_v2  ;;  %v8662_v20 = vld [vmem:[%s11762_s5 + $0xc8] sm:$0xff]   ;;  %v12221_v2 = vld [vmem:[#allocation74_spill] sm:$0xff] }
 0x772   : > { %7033 = vmatpush1.bf16.msra.mxu0 %v6962_v27  ;;  %7153 = vmatprep.subr.bf16.mxu1 %v7125_v45  ;;  %v7615_v45 = vrot.slane %v7610_v60, %v12212_v5  ;;  %v7751_v27 = vcombine.high %v7749_v44, %v7749_v44  ;;  %v7931_v15 = vpack.i.b16 %v7914_v13, %v7914_v13 }
 0x773   : > { %7196 = vmatprep.subr.bf16.mxu0 %v7127_v47  ;;  %7007 = vmatprep.mubr.bf16.mxu1 %v12206_v7  ;;  %v7899_v47 = vcombine.high %v8570_v22, %v8570_v22  ;;  %v7454_v40 = vmul.bf16 %v7444_v23, %v11046_v61  ;;  %v7603_v4 = vpack.i.b16 %v7586_v33, %v7586_v33 }
 0x774   : > { %7050 = vmatprep.mubr.bf16.mxu0 %v12206_v7  ;;  %v7619_v62 = vmul.bf16 %v7615_v45, %v11081_v25  ;;  %v7774_v49 = vpack.i.b16 %v7751_v27, %v7751_v27  ;;  %v7765_v61 = vrot.slane %v7760_v3, %v12212_v5  ;;  %v7750_v25 = vcombine.high %v7742_v28, %v7742_v28 }
 0x775   : > { %v7913_v42 = vrot.slane %v7899_v47, %v12211_v36  ;;  %v7608_v32 = vrot.slane %v7603_v4, %v12212_v5  ;;  %v7936_v16 = vrot.slane %v7931_v15, %v12212_v5 }
 0x776   : > { %v7779_v38 = vrot.slane %v7774_v49, %v12212_v5  ;;  %v7781_v57 = vmul.bf16 %v7765_v61, %v11105_v12  ;;  %v7767_v10 = vpack.i.b16 %v7750_v25, %v7750_v25 }
 0x777   : > { %v7915_v37 = vcombine.high %v7913_v42, %v7913_v42  ;;  %v7946_v23 = vmul.bf16 %v7936_v16, %v12222_v48 }
 0x778   : > { %8532 = vmatmul.mubr.msk.bf16.vlgmr.msra.gmra.mxu1 %vm3195_vm2, %v8657_v30  ;;  %v7783_v46 = vmul.bf16 %v7779_v38, %v11113_v26  ;;  %v7772_v12 = vrot.slane %v7767_v10, %v12212_v5  ;;  %v8661_v26 = vld [vmem:[%s11762_s5 + $0xc0] sm:$0xff]  }
 0x779   : > { %7154 = vmatpush1.bf16.msra.mxu1 %v7124_v52  ;;  %8533 = vmatmul.mubr.msk.bf16.vlgmr.msra.gmra.mxu0 %vm3195_vm2, %v8657_v30  ;;  %v8660_v30 = vld [vmem:[%s11762_s5 + $0xb8] sm:$0xff]   ;;  %v7616_v52 = vmul.bf16 %v7594_v17, %v11062_v50  ;;  %v7758_v50 = vrot.slane %v7753_v6, %v12212_v5 }
 0x77a   : > { %7197 = vmatpush1.bf16.msra.mxu0 %v7126_v0  ;;  %7317 = vmatprep.subr.bf16.mxu1 %v7289_v39  ;;  %v7618_v39 = vmul.bf16 %v7608_v32, %v11078_v18  ;;  %v7924_v0 = vpack.i.b16 %v7913_v42, %v7913_v42 }
 0x77b   : > { %7360 = vmatprep.subr.bf16.mxu0 %v7291_v55  ;;  %7171 = vmatprep.mubr.bf16.mxu1 %v12206_v7  ;;  %v7938_v55 = vpack.i.b16 %v7915_v37, %v7915_v37  ;;  %v7780_v8 = vmul.bf16 %v7758_v50, %v11097_v19 }
 0x77c   : > { %7214 = vmatprep.mubr.bf16.mxu0 %v12206_v7  ;;  %v7929_v18 = vrot.slane %v7924_v0, %v12212_v5 }
 0x77d   : > { %v7943_v36 = vrot.slane %v7938_v55, %v12212_v5 }
 0x77e   : > { %v7945_v63 = vmul.bf16 %v7929_v18, %v12218_v21 }
 0x780   : > { %8539 = vmatmul.mubr.msk.bf16.vlgmr.msra.gmra.mxu1 %vm3195_vm2, %v8658_v24 }
 0x781   : > { %7318 = vmatpush1.bf16.msra.mxu1 %v7288_v14  ;;  %8540 = vmatmul.mubr.msk.bf16.vlgmr.msra.gmra.mxu0 %vm3195_vm2, %v8658_v24  ;;  %v12219_v24 = vld [vmem:[#allocation82_spill] sm:$0xff]  ;;  %v12220_v14 = vld [vmem:[#allocation23_spill] sm:$0xff] }
 0x782   : > { %7361 = vmatpush1.bf16.msra.mxu0 %v7290_v54  ;;  %7481 = vmatprep.subr.bf16.mxu1 %v7453_v34  ;;  %v7782_v51 = vmul.bf16 %v7772_v12, %v12219_v24  ;;  %v7947_v41 = vmul.bf16 %v7943_v36, %v12220_v14  ;;  %v7922_v54 = vrot.slane %v7917_v43, %v12212_v5 }
 0x783   : > { %7524 = vmatprep.subr.bf16.mxu0 %v7455_v29  ;;  %7335 = vmatprep.mubr.bf16.mxu1 %v12206_v7 }
 0x784   : > { %7378 = vmatprep.mubr.bf16.mxu0 %v12206_v7  ;;  %v7944_v1 = vmul.bf16 %v7922_v54, %v12221_v2 }
 0x788   : > { %8546 = vmatmul.mubr.msk.bf16.vlgmr.msra.gmra.mxu1 %vm3195_vm2, %v8659_v9 }
 0x789   : > { %7482 = vmatpush1.bf16.msra.mxu1 %v7452_v58  ;;  %8547 = vmatmul.mubr.msk.bf16.vlgmr.msra.gmra.mxu0 %vm3195_vm2, %v8659_v9 }
 0x78a   : > { %7525 = vmatpush1.bf16.msra.mxu0 %v7454_v40  ;;  %7645 = vmatprep.subr.bf16.mxu1 %v7617_v31  ;;  %v8663_v31 = vld [vmem:[%s11762_s5 + $0xd0] sm:$0xff]  }
 0x78b   : > { %7688 = vmatprep.subr.bf16.mxu0 %v7619_v62  ;;  %7499 = vmatprep.mubr.bf16.mxu1 %v12206_v7 }
 0x78c   : > { %7542 = vmatprep.mubr.bf16.mxu0 %v12206_v7 }
 0x790   : > { %8553 = vmatmul.mubr.msk.bf16.vlgmr.msra.gmra.mxu1 %vm3195_vm2, %v8660_v30 }
 0x791   : > { %7646 = vmatpush1.bf16.msra.mxu1 %v7616_v52  ;;  %8554 = vmatmul.mubr.msk.bf16.vlgmr.msra.gmra.mxu0 %vm3195_vm2, %v8660_v30 }
 0x792   : > { %7689 = vmatpush1.bf16.msra.mxu0 %v7618_v39  ;;  %7809 = vmatprep.subr.bf16.mxu1 %v7781_v57 }
 0x793   : > { %7852 = vmatprep.subr.bf16.mxu0 %v7783_v46  ;;  %7663 = vmatprep.mubr.bf16.mxu1 %v12206_v7 }
 0x794   : > { %v3566_v59 = vpop.f32.mrf.mxu1  ;;  %7706 = vmatprep.mubr.bf16.mxu0 %v12206_v7 }
 0x796   : > { %v3568_v11 = vpop.f32.mrf.mxu1 }
 0x798   : > { %8560 = vmatmul.mubr.msk.bf16.vlgmr.msra.gmra.mxu1 %vm3195_vm2, %v8661_v26  ;;  %v3570_v34 = vpop.f32.mrf.mxu1 }
 0x799   : > { %7810 = vmatpush1.bf16.msra.mxu1 %v7780_v8  ;;  %v3609_v56 = vpop.f32.mrf.mxu0  ;;  %8561 = vmatmul.mubr.msk.bf16.vlgmr.msra.gmra.mxu0 %vm3195_vm2, %v8661_v26 }
 0x79a   : > { %7853 = vmatpush1.bf16.msra.mxu0 %v7782_v51  ;;  %7973 = vmatprep.subr.bf16.mxu1 %v7945_v63  ;;  %v3572_v60 = vpop.f32.mrf.mxu1 }
 0x79b   : > { %8016 = vmatprep.subr.bf16.mxu0 %v7947_v41  ;;  %v3611_v19 = vpop.f32.mrf.mxu0  ;;  %7827 = vmatprep.mubr.bf16.mxu1 %v12206_v7 }
 0x79c   : > { %7870 = vmatprep.mubr.bf16.mxu0 %v12206_v7 }
 0x79d   : > { %v3613_v29 = vpop.f32.mrf.mxu0 }
 0x79f   : > { %v3615_v44 = vpop.f32.mrf.mxu0 }
 0x7a0   : > { %v3660_v33 = vpop.f32.mrf.mxu1  ;;  %8567 = vmatmul.mubr.msk.bf16.vlgmr.msra.gmra.mxu1 %vm3195_vm2, %v8662_v20 }
 0x7a1   : > { %v3661_v22 = vadd.f32 %v3660_v33, %v3566_v59  ;;  %7974 = vmatpush1.bf16.msra.mxu1 %v7944_v1  ;;  %v3703_v9 = vpop.f32.mrf.mxu0  ;;  %8568 = vmatmul.mubr.msk.bf16.vlgmr.msra.gmra.mxu0 %vm3195_vm2, %v8662_v20 }
 0x7a2   : > { %v3704_v5 = vadd.f32 %v3703_v9, %v3609_v56  ;;  %8017 = vmatpush1.bf16.msra.mxu0 %v7946_v23  ;;  %v3662_v45 = vpop.f32.mrf.mxu1  ;;  %7991 = vmatprep.mubr.bf16.mxu1 %v12206_v7 }
 0x7a3   : > { %v3663_v27 = vadd.f32 %v3662_v45, %v3568_v11  ;;  %v3705_v58 = vpop.f32.mrf.mxu0  ;;  %8034 = vmatprep.mubr.bf16.mxu0 %v12206_v7 }
 0x7a4   : > { %v3706_v35 = vadd.f32 %v3705_v58, %v3611_v19  ;;  %v3664_v47 = vpop.f32.mrf.mxu1 }
 0x7a5   : > { %v3665_v40 = vadd.f32 %v3664_v47, %v3570_v34  ;;  %v3707_v3 = vpop.f32.mrf.mxu0 }
 0x7a6   : > { %v3708_v4 = vadd.f32 %v3707_v3, %v3613_v29  ;;  %v3666_v62 = vpop.f32.mrf.mxu1 }
 0x7a7   : > { %v3667_v49 = vadd.f32 %v3666_v62, %v3572_v60  ;;  %v3709_v28 = vpop.f32.mrf.mxu0 }
 0x7a8   : > { %v3710_v17 = vadd.f32 %v3709_v28, %v3615_v44  ;;  %v3836_v42 = vpop.f32.mrf.mxu1  ;;  %8574 = vmatmul.mubr.msk.bf16.vlgmr.msra.gmra.mxu1 %vm3195_vm2, %v8663_v31 }
 0x7a9   : > { %v3888_v61 = vadd.f32 %v3836_v42, %v3661_v22  ;;  %v3879_v32 = vpop.f32.mrf.mxu0  ;;  %8575 = vmatmul.mubr.msk.bf16.vlgmr.msra.gmra.mxu0 %vm3195_vm2, %v8663_v31  ;;  %8167 = vmatprep.mubr.bf16.mxu1 %v12206_v7 }
 0x7aa   : > { %v3890_v25 = vadd.f32 %v3879_v32, %v3704_v5  ;;  %v3838_v30 = vpop.f32.mrf.mxu1  ;;  %8210 = vmatprep.mubr.bf16.mxu0 %v12206_v7 }
 0x7ab   : > { %v3889_v38 = vadd.f32 %v3838_v30, %v3663_v27  ;;  %v3881_v37 = vpop.f32.mrf.mxu0 }
 0x7ac   : > { %v3891_v52 = vadd.f32 %v3881_v37, %v3706_v35  ;;  %v3840_v6 = vpop.f32.mrf.mxu1 }
 0x7ad   : > { %v3892_v57 = vadd.f32 %v3840_v6, %v3665_v40  ;;  %v3883_v39 = vpop.f32.mrf.mxu0 }
 0x7ae   : > { %v3894_v0 = vadd.f32 %v3883_v39, %v3708_v4  ;;  %v3842_v10 = vpop.f32.mrf.mxu1 }
 0x7af   : > { %v3893_v46 = vadd.f32 %v3842_v10, %v3667_v49  ;;  %v3885_v55 = vpop.f32.mrf.mxu0 }
 0x7b0   : > { %v3895_v53 = vadd.f32 %v3885_v55, %v3710_v17  ;;  %v4020_v50 = vpop.f32.mrf.mxu1 }
 0x7b1   : > { %v4072_v18 = vadd.f32 %v4020_v50, %v3888_v61  ;;  %v4063_v12 = vpop.f32.mrf.mxu0 }
 0x7b2   : > { %v4074_v13 = vadd.f32 %v4063_v12, %v3890_v25  ;;  %v4022_v59 = vpop.f32.mrf.mxu1 }
 0x7b3   : > { %v4073_v26 = vadd.f32 %v4022_v59, %v3889_v38  ;;  %v4065_v36 = vpop.f32.mrf.mxu0 }
 0x7b4   : > { %v4075_v11 = vadd.f32 %v4065_v36, %v3891_v52  ;;  %v4024_v7 = vpop.f32.mrf.mxu1 }
 0x7b5   : > { %v4076_v8 = vadd.f32 %v4024_v7, %v3892_v57  ;;  %v4067_v43 = vpop.f32.mrf.mxu0 }
 0x7b6   : > { %v4078_v21 = vadd.f32 %v4067_v43, %v3894_v0  ;;  %v4026_v63 = vpop.f32.mrf.mxu1 }
 0x7b7   : > { %v4077_v24 = vadd.f32 %v4026_v63, %v3893_v46  ;;  %v4069_v51 = vpop.f32.mrf.mxu0 }
 0x7b8   : > { %v4079_v15 = vadd.f32 %v4069_v51, %v3895_v53  ;;  %v4204_v14 = vpop.f32.mrf.mxu1 }
 0x7b9   : > { %v4256_v41 = vadd.f32 %v4204_v14, %v4072_v18  ;;  %v4247_v56 = vpop.f32.mrf.mxu0 }
 0x7ba   : > { %v4258_v34 = vadd.f32 %v4247_v56, %v4074_v13  ;;  %v4206_v54 = vpop.f32.mrf.mxu1 }
 0x7bb   : > { %v4257_v19 = vadd.f32 %v4206_v54, %v4073_v26  ;;  %v4249_v16 = vpop.f32.mrf.mxu0 }
 0x7bc   : > { %v4259_v20 = vadd.f32 %v4249_v16, %v4075_v11  ;;  %v4208_v29 = vpop.f32.mrf.mxu1 }
 0x7bd   : > { %v4260_v60 = vadd.f32 %v4208_v29, %v4076_v8  ;;  %v4251_v2 = vpop.f32.mrf.mxu0 }
 0x7be   : > { %v4262_v1 = vadd.f32 %v4251_v2, %v4078_v21  ;;  %v4210_v44 = vpop.f32.mrf.mxu1 }
 0x7bf   : > { %v4261_v48 = vadd.f32 %v4210_v44, %v4077_v24  ;;  %v4253_v23 = vpop.f32.mrf.mxu0 }
 0x7c0   : > { %v4263_v33 = vadd.f32 %v4253_v23, %v4079_v15  ;;  %v4388_v22 = vpop.f32.mrf.mxu1 }
 0x7c1   : > { %v4440_v9 = vadd.f32 %v4388_v22, %v4256_v41  ;;  %v4431_v5 = vpop.f32.mrf.mxu0 }
 0x7c2   : > { %v4442_v45 = vadd.f32 %v4431_v5, %v4258_v34  ;;  %v4390_v27 = vpop.f32.mrf.mxu1 }
 0x7c3   : > { %v4441_v58 = vadd.f32 %v4390_v27, %v4257_v19  ;;  %v4433_v35 = vpop.f32.mrf.mxu0 }
 0x7c4   : > { %v4443_v47 = vadd.f32 %v4433_v35, %v4259_v20  ;;  %v4392_v31 = vpop.f32.mrf.mxu1 }
 0x7c5   : > { %v4444_v40 = vadd.f32 %v4392_v31, %v4260_v60  ;;  %v4435_v3 = vpop.f32.mrf.mxu0 }
 0x7c6   : > { %v4446_v4 = vadd.f32 %v4435_v3, %v4262_v1  ;;  %v4394_v62 = vpop.f32.mrf.mxu1 }
 0x7c7   : > { %v4445_v49 = vadd.f32 %v4394_v62, %v4261_v48  ;;  %v4437_v28 = vpop.f32.mrf.mxu0 }
 0x7c8   : > { %v4447_v17 = vadd.f32 %v4437_v28, %v4263_v33  ;;  %v4572_v42 = vpop.f32.mrf.mxu1 }
 0x7c9   : > { %v4624_v61 = vadd.f32 %v4572_v42, %v4440_v9  ;;  %v4615_v32 = vpop.f32.mrf.mxu0 }
 0x7ca   : > { %v4626_v25 = vadd.f32 %v4615_v32, %v4442_v45  ;;  %v4574_v30 = vpop.f32.mrf.mxu1 }
 0x7cb   : > { %v4625_v38 = vadd.f32 %v4574_v30, %v4441_v58  ;;  %v4617_v37 = vpop.f32.mrf.mxu0 }
 0x7cc   : > { %v4627_v52 = vadd.f32 %v4617_v37, %v4443_v47  ;;  %v4576_v6 = vpop.f32.mrf.mxu1 }
 0x7cd   : > { %v4628_v57 = vadd.f32 %v4576_v6, %v4444_v40  ;;  %v4619_v39 = vpop.f32.mrf.mxu0 }
 0x7ce   : > { %v4630_v0 = vadd.f32 %v4619_v39, %v4446_v4  ;;  %v4578_v10 = vpop.f32.mrf.mxu1 }
 0x7cf   : > { %v4629_v46 = vadd.f32 %v4578_v10, %v4445_v49  ;;  %v4621_v55 = vpop.f32.mrf.mxu0 }
 0x7d0   : > { %v4631_v53 = vadd.f32 %v4621_v55, %v4447_v17  ;;  %v4756_v50 = vpop.f32.mrf.mxu1 }
 0x7d1   : > { %v4808_v18 = vadd.f32 %v4756_v50, %v4624_v61  ;;  %v4799_v12 = vpop.f32.mrf.mxu0 }
 0x7d2   : > { %v4810_v13 = vadd.f32 %v4799_v12, %v4626_v25  ;;  %v4758_v59 = vpop.f32.mrf.mxu1 }
 0x7d3   : > { %v4809_v26 = vadd.f32 %v4758_v59, %v4625_v38  ;;  %v4801_v36 = vpop.f32.mrf.mxu0 }
 0x7d4   : > { %v4811_v11 = vadd.f32 %v4801_v36, %v4627_v52  ;;  %v4760_v7 = vpop.f32.mrf.mxu1 }
 0x7d5   : > { %v4812_v8 = vadd.f32 %v4760_v7, %v4628_v57  ;;  %v4803_v43 = vpop.f32.mrf.mxu0 }
 0x7d6   : > { %v4814_v21 = vadd.f32 %v4803_v43, %v4630_v0  ;;  %v4762_v63 = vpop.f32.mrf.mxu1 }
 0x7d7   : > { %v4813_v24 = vadd.f32 %v4762_v63, %v4629_v46  ;;  %v4805_v51 = vpop.f32.mrf.mxu0 }
 0x7d8   : > { %v4815_v15 = vadd.f32 %v4805_v51, %v4631_v53  ;;  %v4940_v14 = vpop.f32.mrf.mxu1 }
 0x7d9   : > { %v4992_v41 = vadd.f32 %v4940_v14, %v4808_v18  ;;  %v4983_v56 = vpop.f32.mrf.mxu0 }
 0x7da   : > { %v4994_v34 = vadd.f32 %v4983_v56, %v4810_v13  ;;  %v4942_v54 = vpop.f32.mrf.mxu1 }
 0x7db   : > { %v4993_v19 = vadd.f32 %v4942_v54, %v4809_v26  ;;  %v4985_v16 = vpop.f32.mrf.mxu0 }
 0x7dc   : > { %v4995_v20 = vadd.f32 %v4985_v16, %v4811_v11  ;;  %v4944_v29 = vpop.f32.mrf.mxu1 }
 0x7dd   : > { %v4996_v60 = vadd.f32 %v4944_v29, %v4812_v8  ;;  %v4987_v2 = vpop.f32.mrf.mxu0 }
 0x7de   : > { %v4998_v1 = vadd.f32 %v4987_v2, %v4814_v21  ;;  %v4946_v44 = vpop.f32.mrf.mxu1 }
 0x7df   : > { %v4997_v48 = vadd.f32 %v4946_v44, %v4813_v24  ;;  %v4989_v23 = vpop.f32.mrf.mxu0 }
 0x7e0   : > { %v4999_v33 = vadd.f32 %v4989_v23, %v4815_v15  ;;  %v5124_v22 = vpop.f32.mrf.mxu1 }
 0x7e1   : > { %v5176_v9 = vadd.f32 %v5124_v22, %v4992_v41  ;;  %v5167_v5 = vpop.f32.mrf.mxu0 }
 0x7e2   : > { %v5178_v45 = vadd.f32 %v5167_v5, %v4994_v34  ;;  %v5126_v27 = vpop.f32.mrf.mxu1 }
 0x7e3   : > { %v5177_v58 = vadd.f32 %v5126_v27, %v4993_v19  ;;  %v5169_v35 = vpop.f32.mrf.mxu0 }
 0x7e4   : > { %v5179_v47 = vadd.f32 %v5169_v35, %v4995_v20  ;;  %v5128_v31 = vpop.f32.mrf.mxu1 }
 0x7e5   : > { %v5180_v40 = vadd.f32 %v5128_v31, %v4996_v60  ;;  %v5171_v3 = vpop.f32.mrf.mxu0 }
 0x7e6   : > { %v5182_v4 = vadd.f32 %v5171_v3, %v4998_v1  ;;  %v5130_v62 = vpop.f32.mrf.mxu1 }
 0x7e7   : > { %v5181_v49 = vadd.f32 %v5130_v62, %v4997_v48  ;;  %v5173_v28 = vpop.f32.mrf.mxu0 }
 0x7e8   : > { %v5183_v17 = vadd.f32 %v5173_v28, %v4999_v33  ;;  %v5308_v42 = vpop.f32.mrf.mxu1 }
 0x7e9   : > { %v5360_v61 = vadd.f32 %v5308_v42, %v5176_v9  ;;  %v5351_v32 = vpop.f32.mrf.mxu0 }
 0x7ea   : > { %v5362_v25 = vadd.f32 %v5351_v32, %v5178_v45  ;;  %v5310_v30 = vpop.f32.mrf.mxu1 }
 0x7eb   : > { %v5361_v38 = vadd.f32 %v5310_v30, %v5177_v58  ;;  %v5353_v37 = vpop.f32.mrf.mxu0 }
 0x7ec   : > { %v5363_v52 = vadd.f32 %v5353_v37, %v5179_v47  ;;  %v5312_v6 = vpop.f32.mrf.mxu1 }
 0x7ed   : > { %v5364_v57 = vadd.f32 %v5312_v6, %v5180_v40  ;;  %v5355_v39 = vpop.f32.mrf.mxu0 }
 0x7ee   : > { %v5366_v0 = vadd.f32 %v5355_v39, %v5182_v4  ;;  %v5314_v10 = vpop.f32.mrf.mxu1 }
 0x7ef   : > { %v5365_v46 = vadd.f32 %v5314_v10, %v5181_v49  ;;  %v5357_v55 = vpop.f32.mrf.mxu0 }
 0x7f0   : > { %v5367_v53 = vadd.f32 %v5357_v55, %v5183_v17  ;;  %v5492_v50 = vpop.f32.mrf.mxu1 }
 0x7f1   : > { %v5544_v18 = vadd.f32 %v5492_v50, %v5360_v61  ;;  %v5535_v12 = vpop.f32.mrf.mxu0 }
 0x7f2   : > { %v5546_v13 = vadd.f32 %v5535_v12, %v5362_v25  ;;  %v5494_v59 = vpop.f32.mrf.mxu1 }
 0x7f3   : > { %v5545_v26 = vadd.f32 %v5494_v59, %v5361_v38  ;;  %v5537_v36 = vpop.f32.mrf.mxu0 }
 0x7f4   : > { %v5547_v11 = vadd.f32 %v5537_v36, %v5363_v52  ;;  %v5496_v7 = vpop.f32.mrf.mxu1 }
 0x7f5   : > { %v5548_v8 = vadd.f32 %v5496_v7, %v5364_v57  ;;  %v5539_v43 = vpop.f32.mrf.mxu0 }
 0x7f6   : > { %v5550_v21 = vadd.f32 %v5539_v43, %v5366_v0  ;;  %v5498_v63 = vpop.f32.mrf.mxu1 }
 0x7f7   : > { %v5549_v24 = vadd.f32 %v5498_v63, %v5365_v46  ;;  %v5541_v51 = vpop.f32.mrf.mxu0 }
 0x7f8   : > { %v5551_v15 = vadd.f32 %v5541_v51, %v5367_v53  ;;  %v5676_v14 = vpop.f32.mrf.mxu1 }
 0x7f9   : > { %v5728_v41 = vadd.f32 %v5676_v14, %v5544_v18  ;;  %v5719_v56 = vpop.f32.mrf.mxu0 }
 0x7fa   : > { %v5730_v34 = vadd.f32 %v5719_v56, %v5546_v13  ;;  %v5678_v54 = vpop.f32.mrf.mxu1 }
 0x7fb   : > { %v5729_v19 = vadd.f32 %v5678_v54, %v5545_v26  ;;  %v5721_v16 = vpop.f32.mrf.mxu0 }
 0x7fc   : > { %v5731_v20 = vadd.f32 %v5721_v16, %v5547_v11  ;;  %v5680_v29 = vpop.f32.mrf.mxu1 }
 0x7fd   : > { %v5732_v60 = vadd.f32 %v5680_v29, %v5548_v8  ;;  %v5723_v2 = vpop.f32.mrf.mxu0 }
 0x7fe   : > { %v5734_v1 = vadd.f32 %v5723_v2, %v5550_v21  ;;  %v5682_v44 = vpop.f32.mrf.mxu1 }
 0x7ff   : > { %v5733_v48 = vadd.f32 %v5682_v44, %v5549_v24  ;;  %v5725_v23 = vpop.f32.mrf.mxu0 }
 0x800   : > { %v5735_v33 = vadd.f32 %v5725_v23, %v5551_v15  ;;  %v5781_v22 = vpop.f32.mrf.mxu1 }
 0x801   : > { %v5833_v9 = vadd.f32 %v5781_v22, %v5728_v41  ;;  %v5824_v5 = vpop.f32.mrf.mxu0 }
 0x802   : > { %v5835_v45 = vadd.f32 %v5824_v5, %v5730_v34  ;;  %v5783_v27 = vpop.f32.mrf.mxu1 }
 0x803   : > { %v5834_v58 = vadd.f32 %v5783_v27, %v5729_v19  ;;  %v5826_v35 = vpop.f32.mrf.mxu0 }
 0x804   : > { %v5836_v47 = vadd.f32 %v5826_v35, %v5731_v20  ;;  %v5785_v31 = vpop.f32.mrf.mxu1 }
 0x805   : > { %v5837_v40 = vadd.f32 %v5785_v31, %v5732_v60  ;;  %v5828_v3 = vpop.f32.mrf.mxu0 }
 0x806   : > { %v5839_v4 = vadd.f32 %v5828_v3, %v5734_v1  ;;  %v5787_v62 = vpop.f32.mrf.mxu1 }
 0x807   : > { %v5838_v49 = vadd.f32 %v5787_v62, %v5733_v48  ;;  %v5830_v28 = vpop.f32.mrf.mxu0 }
 0x808   : > { %v5840_v17 = vadd.f32 %v5830_v28, %v5735_v33  ;;  %v5965_v42 = vpop.f32.mrf.mxu1 }
 0x809   : > { %v6017_v61 = vadd.f32 %v5965_v42, %v5833_v9  ;;  %v6008_v32 = vpop.f32.mrf.mxu0 }
 0x80a   : > { %v6019_v25 = vadd.f32 %v6008_v32, %v5835_v45  ;;  %v5967_v30 = vpop.f32.mrf.mxu1 }
 0x80b   : > { %v6018_v38 = vadd.f32 %v5967_v30, %v5834_v58  ;;  %v6010_v37 = vpop.f32.mrf.mxu0 }
 0x80c   : > { %v6020_v52 = vadd.f32 %v6010_v37, %v5836_v47  ;;  %v5969_v6 = vpop.f32.mrf.mxu1 }
 0x80d   : > { %v6021_v57 = vadd.f32 %v5969_v6, %v5837_v40  ;;  %v6012_v39 = vpop.f32.mrf.mxu0 }
 0x80e   : > { %v6023_v0 = vadd.f32 %v6012_v39, %v5839_v4  ;;  %v5971_v10 = vpop.f32.mrf.mxu1 }
 0x80f   : > { %v6022_v46 = vadd.f32 %v5971_v10, %v5838_v49  ;;  %v6014_v55 = vpop.f32.mrf.mxu0 }
 0x810   : > { %v6024_v53 = vadd.f32 %v6014_v55, %v5840_v17  ;;  %v6149_v50 = vpop.f32.mrf.mxu1 }
 0x811   : > { %v11523_v18 = vadd.f32 %v6149_v50, %v6017_v61  ;;  %v6192_v12 = vpop.f32.mrf.mxu0 }
 0x812   : > { %v11525_v13 = vadd.f32 %v6192_v12, %v6019_v25  ;;  %v6151_v59 = vpop.f32.mrf.mxu1 }
 0x813   : > { %v11527_v26 = vadd.f32 %v6151_v59, %v6018_v38  ;;  %v6194_v36 = vpop.f32.mrf.mxu0 }
 0x814   : > { %v11529_v11 = vadd.f32 %v6194_v36, %v6020_v52  ;;  %v6153_v7 = vpop.f32.mrf.mxu1 }
 0x815   : > { %v11531_v8 = vadd.f32 %v6153_v7, %v6021_v57  ;;  %v6196_v43 = vpop.f32.mrf.mxu0 }
 0x816   : > { %v11533_v21 = vadd.f32 %v6196_v43, %v6023_v0  ;;  %v6155_v63 = vpop.f32.mrf.mxu1 }
 0x817   : > { %v11535_v24 = vadd.f32 %v6155_v63, %v6022_v46  ;;  %v6198_v51 = vpop.f32.mrf.mxu0 }
 0x818   : > { %v11537_v15 = vadd.f32 %v6198_v51, %v6024_v53  ;;  %v11539_v14 = vpop.f32.mrf.mxu1 }
 0x819   : > { %v11541_v41 = vpop.f32.mrf.mxu0 }
 0x81a   : > { %v6335_v56 = vpop.f32.mrf.mxu1 }
 0x81b   : > { %v11543_v34 = vpop.f32.mrf.mxu0 }
 0x81c   : > { %v11545_v54 = vpop.f32.mrf.mxu1 }
 0x81d   : > { %v11547_v19 = vpop.f32.mrf.mxu0 }
 0x81e   : > { %v11549_v16 = vpop.f32.mrf.mxu1 }
 0x81f   : > { %v11551_v20 = vpop.f32.mrf.mxu0 }
 0x820   : > { %v6517_v29 = vpop.f32.mrf.mxu1 }
 0x821   : > { %v11553_v60 = vpop.f32.mrf.mxu0 }
 0x822   : > { %v6519_v2 = vpop.f32.mrf.mxu1 }
 0x823   : > { %v11555_v1 = vpop.f32.mrf.mxu0 }
 0x824   : > { %v11557_v44 = vpop.f32.mrf.mxu1 }
 0x825   : > { %v11559_v48 = vpop.f32.mrf.mxu0 }
 0x826   : > { %v11561_v23 = vpop.f32.mrf.mxu1 }
 0x827   : > { %v11563_v33 = vpop.f32.mrf.mxu0 }
 0x828   : > { %v6681_v22 = vpop.f32.mrf.mxu1 }
 0x829   : > { %v11565_v9 = vpop.f32.mrf.mxu0 }
 0x82a   : > { %v6683_v5 = vpop.f32.mrf.mxu1 }
 0x82b   : > { %v11567_v45 = vpop.f32.mrf.mxu0 }
 0x82c   : > { %v11569_v27 = vpop.f32.mrf.mxu1 }
 0x82d   : > { %v11571_v58 = vpop.f32.mrf.mxu0 }
 0x82e   : > { %v11573_v35 = vpop.f32.mrf.mxu1 }
 0x82f   : > { %v11575_v47 = vpop.f32.mrf.mxu0 }
 0x830   : > { %v6845_v31 = vpop.f32.mrf.mxu1 }
 0x831   : > { %v11577_v40 = vpop.f32.mrf.mxu0 }
 0x832   : > { %v6847_v3 = vpop.f32.mrf.mxu1 }
 0x833   : > { %v11579_v4 = vpop.f32.mrf.mxu0 }
 0x834   : > { %v11581_v62 = vpop.f32.mrf.mxu1 }
 0x835   : > { %v11583_v49 = vpop.f32.mrf.mxu0 }
 0x836   : > { %v11585_v28 = vpop.f32.mrf.mxu1 }
 0x837   : > { %v11587_v17 = vpop.f32.mrf.mxu0 }
 0x838   : > { %v11589_v42 = vpop.f32.mrf.mxu1 }
 0x839   : > { %v11591_v61 = vpop.f32.mrf.mxu0 }
 0x83a   : > { %v7011_v32 = vpop.f32.mrf.mxu1 }
 0x83b   : > { %v11593_v25 = vpop.f32.mrf.mxu0 }
 0x83c   : > { %v11595_v30 = vpop.f32.mrf.mxu1 }
 0x83d   : > { %v11597_v38 = vpop.f32.mrf.mxu0 }
 0x83e   : > { %v11599_v37 = vpop.f32.mrf.mxu1 }
 0x83f   : > { %v11601_v52 = vpop.f32.mrf.mxu0 }
 0x840   : > { %12223 = vst [vmem:[#allocation24_spill] sm:$0xff] %v11601_v52  ;;  %v11603_v6 = vpop.f32.mrf.mxu1 }
 0x841   : > { %v11605_v57 = vpop.f32.mrf.mxu0 }
 0x842   : > { %v11607_v39 = vpop.f32.mrf.mxu1 }
 0x843   : > { %v11609_v0 = vpop.f32.mrf.mxu0 }
 0x844   : > { %v11611_v10 = vpop.f32.mrf.mxu1 }
 0x845   : > { %12224 = vst [vmem:[#allocation65_spill] sm:$0xff] %v11611_v10  ;;  %v11613_v46 = vpop.f32.mrf.mxu0 }
 0x846   : > { %12225 = vst [vmem:[#allocation58_spill] sm:$0xff] %v11613_v46  ;;  %v11615_v55 = vpop.f32.mrf.mxu1 }
 0x847   : > { %12226 = vst [vmem:[#allocation56_spill] sm:$0xff] %v11615_v55  ;;  %v11617_v53 = vpop.f32.mrf.mxu0 }
 0x848   : > { %12227 = vst [vmem:[#allocation47_spill] sm:$0xff] %v11617_v53  ;;  %v11619_v50 = vpop.f32.mrf.mxu1 }
 0x849   : > { %v11621_v12 = vpop.f32.mrf.mxu0 }
 0x84a   : > { %12228 = vst [vmem:[#allocation99_spill] sm:$0xff] %v11621_v12  ;;  %v11623_v59 = vpop.f32.mrf.mxu1 }
 0x84b   : > { %v11625_v36 = vpop.f32.mrf.mxu0 }
 0x84c   : > { %12229 = vst [vmem:[#allocation90_spill] sm:$0xff] %v11625_v36  ;;  %v11627_v7 = vpop.f32.mrf.mxu1 }
 0x84d   : > { %12230 = vst [vmem:[#allocation85_spill] sm:$0xff] %v11627_v7  ;;  %v11629_v43 = vpop.f32.mrf.mxu0 }
 0x84e   : > { %12231 = vst [vmem:[#allocation76_spill] sm:$0xff] %v11629_v43  ;;  %v11631_v63 = vpop.f32.mrf.mxu1  ;;  %v6385_v43 = vadd.f32 %v11539_v14, %v11523_v18 }
 0x84f   : > { %12232 = vst [vmem:[#allocation27_spill] sm:$0xff] %v11631_v63  ;;  %v11633_v51 = vpop.f32.mrf.mxu0  ;;  %v6386_v63 = vadd.f32 %v6335_v56, %v11527_v26  ;;  %v6390_v26 = vadd.f32 %v11549_v16, %v11535_v24 }
 0x850   : > { %12233 = vst [vmem:[#allocation26_spill] sm:$0xff] %v11633_v51  ;;  %v11635_v46 = vpop.f32.mrf.mxu1 }
 0x851   : > { %12234 = vst [vmem:[#allocation68_spill] sm:$0xff] %v11635_v46  ;;  %v11637_v52 = vpop.f32.mrf.mxu0 }
 0x852   : > { %12235 = vst [vmem:[#allocation61_spill] sm:$0xff] %v11637_v52  ;;  %v11639_v53 = vpop.f32.mrf.mxu1  ;;  %v6387_v52 = vadd.f32 %v11541_v41, %v11525_v13  ;;  %v6391_v41 = vadd.f32 %v11547_v19, %v11533_v21 }
 0x853   : > { %12236 = vst [vmem:[#allocation45_spill] sm:$0xff] %v11639_v53  ;;  %v11641_v55 = vpop.f32.mrf.mxu0  ;;  %v6569_v53 = vadd.f32 %v6517_v29, %v6385_v43 }
 0x854   : > { %12237 = vst [vmem:[#allocation39_spill] sm:$0xff] %v11641_v55  ;;  %v11643_v12 = vpop.f32.mrf.mxu1  ;;  %v6570_v55 = vadd.f32 %v6519_v2, %v6386_v63  ;;  %v6571_v14 = vadd.f32 %v11553_v60, %v6387_v52  ;;  %v6392_v2 = vadd.f32 %v11551_v20, %v11537_v15  ;;  %v12243_v63 = vld [vmem:[#allocation99_spill] sm:$0xff] }
 0x855   : > { %v11645_v10 = vpop.f32.mrf.mxu0  ;;  %v6733_v56 = vadd.f32 %v6681_v22, %v6569_v53  ;;  %v6575_v22 = vadd.f32 %v11559_v48, %v6391_v41  ;;  %v12241_v53 = vld [vmem:[#allocation65_spill] sm:$0xff]  ;;  %v12247_v41 = vld [vmem:[#allocation58_spill] sm:$0xff] }
 0x856   : > { %12238 = vst [vmem:[#allocation41_spill] sm:$0xff] %v11645_v10  ;;  %v11647_v36 = vpop.f32.mrf.mxu1  ;;  %v6388_v10 = vadd.f32 %v11543_v34, %v11529_v11 }
 0x857   : > { %12239 = vst [vmem:[#allocation35_spill] sm:$0xff] %v11647_v36  ;;  %v11652_v51 = vpop.f32.mrf.mxu0  ;;  %v6389_v36 = vadd.f32 %v11545_v54, %v11531_v8  ;;  %v6574_v8 = vadd.f32 %v11561_v23, %v6390_v26  ;;  %v6735_v54 = vadd.f32 %v11565_v9, %v6571_v14  ;;  %v6897_v24 = vadd.f32 %v6845_v31, %v6733_v56 }
 0x858   : > { %12240 = vst [vmem:[#allocation30_spill] sm:$0xff] %v11652_v51  ;;  %v11654_v7 = vpop.f32.mrf.mxu1  ;;  %v6734_v51 = vadd.f32 %v6683_v5, %v6570_v55  ;;  %v6572_v29 = vadd.f32 %v11555_v1, %v6388_v10  ;;  %v6739_v15 = vadd.f32 %v11571_v58, %v6575_v22 }
 0x859   : > { %v11658_v46 = vpop.f32.mrf.mxu0  ;;  %v6573_v11 = vadd.f32 %v11557_v44, %v6389_v36  ;;  %v6738_v44 = vadd.f32 %v11573_v35, %v6574_v8  ;;  %v6899_v23 = vadd.f32 %v11577_v40, %v6735_v54  ;;  %v7061_v9 = vadd.f32 %v11589_v42, %v6897_v24  ;;  %v12250_v54 = vld [vmem:[#allocation27_spill] sm:$0xff] }
 0x85a   : > { %v11664_v18 = vpop.f32.mrf.mxu1  ;;  %v6898_v16 = vadd.f32 %v6847_v3, %v6734_v51  ;;  %v6736_v21 = vadd.f32 %v11567_v45, %v6572_v29  ;;  %v6576_v3 = vadd.f32 %v11563_v33, %v6392_v2  ;;  %v6903_v33 = vadd.f32 %v11583_v49, %v6739_v15  ;;  %v12244_v51 = vld [vmem:[#allocation68_spill] sm:$0xff]  ;;  %v12245_v26 = vld [vmem:[#allocation45_spill] sm:$0xff]  ;;  %v12248_v29 = vld [vmem:[#allocation90_spill] sm:$0xff] }
 0x85b   : > { %v11669_v13 = vpop.f32.mrf.mxu0  ;;  %v6737_v19 = vadd.f32 %v11569_v27, %v6573_v11  ;;  %v6902_v27 = vadd.f32 %v11585_v28, %v6738_v44  ;;  %v7063_v35 = vadd.f32 %v11591_v61, %v6899_v23  ;;  %v7225_v40 = vadd.f32 %v11603_v6, %v7061_v9  ;;  %v12249_v11 = vld [vmem:[#allocation85_spill] sm:$0xff]  ;;  %v12252_v44 = vld [vmem:[#allocation47_spill] sm:$0xff]  ;;  %v12253_v9 = vld [vmem:[#allocation76_spill] sm:$0xff] }
 0x85c   : > { %v11675_v34 = vpop.f32.mrf.mxu1  ;;  %v7062_v5 = vadd.f32 %v7011_v32, %v6898_v16  ;;  %v6900_v20 = vadd.f32 %v11579_v4, %v6736_v21  ;;  %v6740_v52 = vadd.f32 %v11575_v47, %v6576_v3  ;;  %v7067_v47 = vadd.f32 %v11597_v38, %v6903_v33  ;;  %v12251_v16 = vld [vmem:[#allocation61_spill] sm:$0xff]  ;;  %v12254_v3 = vld [vmem:[#allocation39_spill] sm:$0xff] }
 0x85d   : > { %v11679_v60 = vpop.f32.mrf.mxu0  ;;  %v6901_v48 = vadd.f32 %v11581_v62, %v6737_v19  ;;  %v7066_v62 = vadd.f32 %v11599_v37, %v6902_v27  ;;  %v7227_v28 = vadd.f32 %v11605_v57, %v7063_v35  ;;  %v7389_v61 = vadd.f32 %v11619_v50, %v7225_v40 }
 0x85e   : > { %v7671_v1 = vpop.f32.mrf.mxu1  ;;  %v7226_v42 = vadd.f32 %v11607_v39, %v7062_v5  ;;  %v7064_v58 = vadd.f32 %v11593_v25, %v6900_v20  ;;  %v6904_v39 = vadd.f32 %v11587_v17, %v6740_v52  ;;  %v7231_v17 = vadd.f32 %v12247_v41, %v7067_v47  ;;  %v12255_v27 = vld [vmem:[#allocation35_spill] sm:$0xff] }
 0x85f   : > { %v11689_v31 = vpop.f32.mrf.mxu0  ;;  %v7065_v4 = vadd.f32 %v11595_v30, %v6901_v48  ;;  %v12242_v30 = vld [vmem:[#allocation56_spill] sm:$0xff]  ;;  %v7391_v37 = vadd.f32 %v12243_v63, %v7227_v28  ;;  %v7553_v57 = vadd.f32 %v12244_v51, %v7389_v61 }
 0x860   : > { %v7829_v45 = vpop.f32.mrf.mxu1  ;;  %v7390_v6 = vadd.f32 %v11623_v59, %v7226_v42  ;;  %v7228_v49 = vadd.f32 %v11609_v0, %v7064_v58  ;;  %v7230_v43 = vadd.f32 %v12242_v30, %v7066_v62  ;;  %v12246_v59 = vld [vmem:[#allocation24_spill] sm:$0xff]  ;;  %v7395_v5 = vadd.f32 %v12253_v9, %v7231_v17 }
 0x861   : > { %v7872_v32 = vpop.f32.mrf.mxu0  ;;  %v7229_v25 = vadd.f32 %v12241_v53, %v7065_v4  ;;  %v7068_v56 = vadd.f32 %v12246_v59, %v6904_v39  ;;  %v7555_v2 = vadd.f32 %v12251_v16, %v7391_v37  ;;  %v7717_v22 = vadd.f32 %v11654_v7, %v7553_v57  ;;  %v12256_v7 = vld [vmem:[#allocation26_spill] sm:$0xff] }
 0x862   : > { %v7831_v10 = vpop.f32.mrf.mxu1  ;;  %v7554_v50 = vadd.f32 %v12245_v26, %v7390_v6  ;;  %v7392_v38 = vadd.f32 %v12248_v29, %v7228_v49  ;;  %v7394_v24 = vadd.f32 %v12250_v54, %v7230_v43  ;;  %v12258_v53 = vld [vmem:[#allocation30_spill] sm:$0xff] }
 0x863   : > { %v7874_v55 = vpop.f32.mrf.mxu0  ;;  %v7393_v0 = vadd.f32 %v12249_v11, %v7229_v25  ;;  %v7232_v23 = vadd.f32 %v12252_v44, %v7068_v56  ;;  %v7719_v40 = vadd.f32 %v11658_v46, %v7555_v2  ;;  %v7881_v42 = vadd.f32 %v7829_v45, %v7717_v22 }
 0x864   : > { %v7833_v36 = vpop.f32.mrf.mxu1  ;;  %v7718_v21 = vadd.f32 %v11664_v18, %v7554_v50  ;;  %v7556_v15 = vadd.f32 %v12254_v3, %v7392_v38  ;;  %v7558_v35 = vadd.f32 %v12255_v27, %v7394_v24  ;;  %v12257_v18 = vld [vmem:[#allocation41_spill] sm:$0xff] }
 0x865   : > { %v7876_v14 = vpop.f32.mrf.mxu0  ;;  %v7557_v20 = vadd.f32 %v11643_v12, %v7393_v0  ;;  %v7396_v58 = vadd.f32 %v12256_v7, %v7232_v23  ;;  %v7559_v4 = vadd.f32 %v12257_v18, %v7395_v5  ;;  %v7883_v39 = vadd.f32 %v7872_v32, %v7719_v40 }
 0x866   : > { %v7835_v8 = vpop.f32.mrf.mxu1  ;;  %v7882_v52 = vadd.f32 %v7831_v10, %v7718_v21  ;;  %v7720_v62 = vadd.f32 %v11669_v13, %v7556_v15  ;;  %v7722_v6 = vadd.f32 %v7671_v1, %v7558_v35 }
 0x867   : > { %v7878_v19 = vpop.f32.mrf.mxu0  ;;  %v7721_v28 = vadd.f32 %v11675_v34, %v7557_v20  ;;  %v7560_v25 = vadd.f32 %v12258_v53, %v7396_v58  ;;  %v7723_v46 = vadd.f32 %v11679_v60, %v7559_v4 }
 0x868   : > { %v7993_v48 = vpop.f32.mrf.mxu1  ;;  %v7884_v45 = vadd.f32 %v7874_v55, %v7720_v62  ;;  %v7886_v43 = vadd.f32 %v7835_v8, %v7722_v6 }
 0x869   : > { %v8036_v33 = vpop.f32.mrf.mxu0  ;;  %v8045_v12 = vadd.f32 %v7993_v48, %v7881_v42  ;;  %v7885_v30 = vadd.f32 %v7833_v36, %v7721_v28  ;;  %v7724_v13 = vadd.f32 %v11689_v31, %v7560_v25  ;;  %v7887_v34 = vadd.f32 %v7876_v14, %v7723_v46 }
 0x86a   : > { %v7995_v61 = vpop.f32.mrf.mxu1  ;;  %v8047_v63 = vadd.f32 %v8036_v33, %v7883_v39 }
 0x86b   : > { %v8046_v47 = vadd.f32 %v7995_v61, %v7882_v52  ;;  %v8038_v49 = vpop.f32.mrf.mxu0  ;;  %v7888_v56 = vadd.f32 %v7878_v19, %v7724_v13 }
 0x86c   : > { %v7997_v10 = vpop.f32.mrf.mxu1  ;;  %v8048_v1 = vadd.f32 %v8038_v49, %v7884_v45 }
 0x86d   : > { %v8053_v37 = vadd.f32 %v8046_v47, %v8045_v12  ;;  %v8040_v51 = vpop.f32.mrf.mxu0  ;;  %v8049_v26 = vadd.f32 %v7997_v10, %v7885_v30 }
 0x86e   : > { %v7999_v57 = vpop.f32.mrf.mxu1  ;;  %v8051_v17 = vadd.f32 %v8040_v51, %v7887_v34 }
 0x86f   : > { %v8054_v32 = vadd.f32 %v8053_v37, %v8047_v63  ;;  %v8050_v50 = vadd.f32 %v7999_v57, %v7886_v43  ;;  %v8042_v59 = vpop.f32.mrf.mxu0 }
 0x870   : > { %v8052_v55 = vadd.f32 %v8042_v59, %v7888_v56 }
 0x871   : > { %v8055_v41 = vadd.f32 %v8054_v32, %v8048_v1  ;;  %v8058_v60 = vadd.f32 %v8050_v50, %v8049_v26 }
 0x873   : > { %v8059_v29 = vadd.f32 %v8058_v60, %v8051_v17  ;;  %8056 = vadd.xlane.f32.xlu1 %v8055_v41 }
 0x875   : > { %v8060_v36 = vadd.f32 %v8059_v29, %v8052_v55  ;;  %v8664_v29 = vld [vmem:[%s11763_s6] sm:$0xff]  }
 0x877   : > { %8061 = vadd.xlane.f32.xlu0 %v8060_v36 }
 0x8fc   : > { %v8057_v38 = vpop.xlane.xlu1 %8056 }
 0x8fd   : > { %v8063_v11 = vmul.f32 0.001953125, %v8057_v38 }
 0x8ff   : > { %v8065_v0 = vsub.f32 %v8045_v12, %v8063_v11  ;;  %v8066_v31 = vsub.f32 %v8046_v47, %v8063_v11  ;;  %v8067_v14 = vsub.f32 %v8047_v63, %v8063_v11  ;;  %v8068_v54 = vsub.f32 %v8048_v1, %v8063_v11 }
 0x900   : > { %v8062_v8 = vpop.xlane.xlu0 %8061 }
 0x901   : > { %v8064_v24 = vmul.f32 0.001953125, %v8062_v8  ;;  %v8073_v16 = vmul.f32 %v8065_v0, %v8065_v0  ;;  %v8074_v2 = vmul.f32 %v8066_v31, %v8066_v31  ;;  %v8075_v22 = vmul.f32 %v8067_v14, %v8067_v14 }
 0x902   : > { %v8076_v9 = vmul.f32 %v8068_v54, %v8068_v54 }
 0x903   : > { %v8069_v21 = vsub.f32 %v8049_v26, %v8064_v24  ;;  %v8070_v19 = vsub.f32 %v8050_v50, %v8064_v24  ;;  %v8071_v44 = vsub.f32 %v8051_v17, %v8064_v24  ;;  %v8081_v23 = vadd.f32 %v8074_v2, %v8073_v16 }
 0x904   : > { %v8072_v3 = vsub.f32 %v8052_v55, %v8064_v24 }
 0x905   : > { %v8082_v5 = vadd.f32 %v8081_v23, %v8075_v22  ;;  %v8077_v15 = vmul.f32 %v8069_v21, %v8069_v21  ;;  %v8078_v20 = vmul.f32 %v8070_v19, %v8070_v19  ;;  %v8079_v27 = vmul.f32 %v8071_v44, %v8071_v44 }
 0x906   : > { %v8080_v40 = vmul.f32 %v8072_v3, %v8072_v3 }
 0x907   : > { %v8083_v48 = vadd.f32 %v8082_v5, %v8076_v9  ;;  %v8086_v35 = vadd.f32 %v8078_v20, %v8077_v15 }
 0x909   : > { %8084 = vadd.xlane.f32.xlu0 %v8083_v48  ;;  %v8087_v42 = vadd.f32 %v8086_v35, %v8079_v27 }
 0x90b   : > { %v8088_v52 = vadd.f32 %v8087_v42, %v8080_v40 }
 0x90d   : > { %8089 = vadd.xlane.f32.xlu0 %v8088_v52 }
 0x992   : > { %v8085_v33 = vpop.xlane.xlu0 %8084 }
 0x993   : > { %v8091_v7 = vmul.f32 0.001953125, %v8085_v33 }
 0x995   : > { %v8093_v58 = vadd.f32 1e-05, %v8091_v7 }
 0x996   : > { %v8090_v18 = vpop.xlane.xlu0 %8089 }
 0x997   : > { %8669 = vrsqrt.f32 %v8093_v58  ;;  %v8092_v4 = vmul.f32 0.001953125, %v8090_v18 }
 0x999   : > { %v8094_v62 = vadd.f32 1e-05, %v8092_v4 }
 0x99b   : > { %8671 = vrsqrt.f32 %v8094_v62 }
 0x9a4   : > { %v8670_v28 = vpop.eup %8669 }
 0x9a5   : > { %v8098_v61 = vmul.f32 %v8670_v28, %v8066_v31  ;;  %v8100_v6 = vmul.f32 %v8670_v28, %v8068_v54  ;;  %v8097_v39 = vmul.f32 %v8670_v28, %v8065_v0  ;;  %v8099_v12 = vmul.f32 %v8670_v28, %v8067_v14 }
 0x9a7   : > { %v8106_v53 = vmul.f32 0.01, %v8098_v61  ;;  %v8108_v46 = vmul.f32 0.01, %v8100_v6  ;;  %v8105_v10 = vmul.f32 0.01, %v8097_v39 }
 0x9a8   : > { %v8672_v47 = vpop.eup %8671  ;;  %v8107_v43 = vmul.f32 0.01, %v8099_v12 }
 0x9a9   : > { %v8102_v49 = vmul.f32 %v8672_v47, %v8070_v19  ;;  %v8104_v25 = vmul.f32 %v8672_v47, %v8072_v3  ;;  %v8101_v45 = vmul.f32 %v8672_v47, %v8069_v21  ;;  %v8103_v30 = vmul.f32 %v8672_v47, %v8071_v44 }
 0x9aa   : > { %v8114_v34 = vmax.f32 %v8098_v61, %v8106_v53  ;;  %v8116_v1 = vmax.f32 %v8100_v6, %v8108_v46  ;;  %v8113_v26 = vmax.f32 %v8097_v39, %v8105_v10  ;;  %v8115_v59 = vmax.f32 %v8099_v12, %v8107_v43 }
 0x9ab   : > { %v8110_v63 = vmul.f32 0.01, %v8102_v49  ;;  %v8112_v37 = vmul.f32 0.01, %v8104_v25  ;;  %v8109_v51 = vmul.f32 0.01, %v8101_v45 }
 0x9ac   : > { %v8111_v13 = vmul.f32 0.01, %v8103_v30 }
 0x9ad   : > { %v8118_v57 = vmax.f32 %v8102_v49, %v8110_v63  ;;  %v8120_v32 = vmax.f32 %v8104_v25, %v8112_v37  ;;  %v8117_v50 = vmax.f32 %v8101_v45, %v8109_v51 }
 0x9ae   : > { %v8119_v56 = vmax.f32 %v8103_v30, %v8111_v13 }
 0x9af   : > { %v8122_v41 = vpack.c.bf16 %v8118_v57, %v8114_v34  ;;  %v8124_v17 = vpack.c.bf16 %v8120_v32, %v8116_v1  ;;  %v8121_v60 = vpack.c.bf16 %v8117_v50, %v8113_v26  ;;  %v12259_v34 = vld [vmem:[#allocation29_spill] sm:$0xff]  ;;  %v12261_v26 = vld [vmem:[#allocation22_spill] sm:$0xff] }
 0x9b0   : > { %v8123_v55 = vpack.c.bf16 %v8119_v56, %v8115_v59  ;;  %v12260_v1 = vld [vmem:[#allocation33_spill] sm:$0xff] }
 0x9b1   : > { %8149 = vmatprep.subr.bf16.mxu1 %v8122_v41  ;;  %8192 = vmatprep.subr.bf16.mxu0 %v8124_v17  ;;  %v12262_v59 = vld [vmem:[#allocation53_spill] sm:$0xff] }
 0x9b2   : > { %8150 = vmatpush1.bf16.msra.mxu1 %v8121_v60  ;;  %8193 = vmatpush1.bf16.msra.mxu0 %v8123_v55 }
 0x9b5   : > { %8577 = vmatmul.mubr.msk.bf16.vlgmr.msra.gmra.mxu1 %vm3195_vm2, %v8664_v29  ;;  %8578 = vmatmul.mubr.msk.bf16.vlgmr.msra.gmra.mxu0 %vm3195_vm2, %v8664_v29 }
 0xa75   : > { %v8169_v36 = vpop.f32.mrf.mxu1  ;;  %v8212_v38 = vpop.f32.mrf.mxu0 }
 0xa77   : > { %v8171_v11 = vpop.f32.mrf.mxu1  ;;  %v8214_v0 = vpop.f32.mrf.mxu0 }
 0xa78   : > { %v8221_v31 = vadd.f32 %v8171_v11, %v8169_v36 }
 0xa79   : > { %v8173_v14 = vpop.f32.mrf.mxu1  ;;  %v8216_v24 = vpop.f32.mrf.mxu0 }
 0xa7a   : > { %v8222_v8 = vadd.f32 %v8221_v31, %v8212_v38 }
 0xa7b   : > { %v8175_v54 = vpop.f32.mrf.mxu1  ;;  %v8218_v21 = vpop.f32.mrf.mxu0 }
 0xa7c   : > { %v8226_v16 = vadd.f32 %v8175_v54, %v8173_v14  ;;  %v8223_v2 = vadd.f32 %v8222_v8, %v8214_v0 }
 0xa7e   : > { %v8227_v22 = vadd.f32 %v8226_v16, %v8216_v24  ;;  %8224 = vadd.xlane.f32.xlu1 %v8223_v2  ;;  %v12264_v2 = vld [vmem:[#allocation28_spill] sm:$0xff] }
 0xa80   : > { %v8228_v19 = vadd.f32 %v8227_v22, %v8218_v21 }
 0xa82   : > { %8229 = vadd.xlane.f32.xlu0 %v8228_v19 }
 0xb07   : > { %v8225_v44 = vpop.xlane.xlu1 %8224 }
 0xb08   : > { %v8231_v23 = vmul.f32 0.001953125, %v8225_v44  ;;  %v12266_v44 = vld [vmem:[#allocation21_spill] sm:$0xff] }
 0xb0a   : > { %v8233_v9 = vsub.f32 %v8169_v36, %v8231_v23  ;;  %v8234_v5 = vsub.f32 %v8171_v11, %v8231_v23  ;;  %v8235_v3 = vsub.f32 %v8212_v38, %v8231_v23  ;;  %v8236_v20 = vsub.f32 %v8214_v0, %v8231_v23 }
 0xb0b   : > { %v8230_v15 = vpop.xlane.xlu0 %8229 }
 0xb0c   : > { %v8232_v48 = vmul.f32 0.001953125, %v8230_v15  ;;  %v8241_v27 = vmul.f32 %v8233_v9, %v8233_v9  ;;  %v8242_v35 = vmul.f32 %v8234_v5, %v8234_v5  ;;  %v8243_v40 = vmul.f32 %v8235_v3, %v8235_v3 }
 0xb0d   : > { %v8244_v58 = vmul.f32 %v8236_v20, %v8236_v20 }
 0xb0e   : > { %v8237_v42 = vsub.f32 %v8173_v14, %v8232_v48  ;;  %v8238_v52 = vsub.f32 %v8175_v54, %v8232_v48  ;;  %v8239_v33 = vsub.f32 %v8216_v24, %v8232_v48  ;;  %v8249_v7 = vadd.f32 %v8242_v35, %v8241_v27  ;;  %v12263_v54 = vld [vmem:[#allocation25_spill] sm:$0xff] }
 0xb0f   : > { %v8240_v4 = vsub.f32 %v8218_v21, %v8232_v48  ;;  %v12265_v21 = vld [vmem:[#allocation37_spill] sm:$0xff] }
 0xb10   : > { %v8250_v18 = vadd.f32 %v8249_v7, %v8243_v40  ;;  %v8245_v62 = vmul.f32 %v8237_v42, %v8237_v42  ;;  %v8246_v28 = vmul.f32 %v8238_v52, %v8238_v52  ;;  %v8247_v6 = vmul.f32 %v8239_v33, %v8239_v33 }
 0xb11   : > { %v8248_v12 = vmul.f32 %v8240_v4, %v8240_v4 }
 0xb12   : > { %v8251_v61 = vadd.f32 %v8250_v18, %v8244_v58  ;;  %v8254_v39 = vadd.f32 %v8246_v28, %v8245_v62 }
 0xb14   : > { %8252 = vadd.xlane.f32.xlu1 %v8251_v61  ;;  %v8255_v47 = vadd.f32 %v8254_v39, %v8247_v6 }
 0xb16   : > { %v8256_v49 = vadd.f32 %v8255_v47, %v8248_v12 }
 0xb18   : > { %8257 = vadd.xlane.f32.xlu0 %v8256_v49 }
 0xb9d   : > { %v8253_v53 = vpop.xlane.xlu1 %8252 }
 0xb9e   : > { %v8259_v25 = vmul.f32 0.001953125, %v8253_v53 }
 0xba0   : > { %v8261_v46 = vadd.f32 1e-05, %v8259_v25 }
 0xba1   : > { %v8258_v45 = vpop.xlane.xlu0 %8257 }
 0xba2   : > { %8673 = vrsqrt.f32 %v8261_v46  ;;  %v8260_v10 = vmul.f32 0.001953125, %v8258_v45 }
 0xba4   : > { %v8262_v30 = vadd.f32 1e-05, %v8260_v10 }
 0xba6   : > { %8675 = vrsqrt.f32 %v8262_v30 }
 0xbaf   : > { %v8674_v43 = vpop.eup %8673 }
 0xbb0   : > { %v8265_v63 = vmul.f32 %v8674_v43, %v8233_v9  ;;  %v8266_v37 = vmul.f32 %v8674_v43, %v8234_v5  ;;  %v8267_v51 = vmul.f32 %v8674_v43, %v8235_v3  ;;  %v8268_v13 = vmul.f32 %v8674_v43, %v8236_v20 }
 0xbb2   : > { %v8273_v57 = vadd.f32 %v8265_v63, %v12259_v34  ;;  %v8274_v32 = vadd.f32 %v8266_v37, %v12260_v1  ;;  %v8275_v50 = vadd.f32 %v8267_v51, %v12261_v26  ;;  %v8276_v56 = vadd.f32 %v8268_v13, %v12262_v59 }
 0xbb3   : > { %v8676_v41 = vpop.eup %8675 }
 0xbb4   : > { %v8281_v17 = vmul.f32 0.01, %v8273_v57  ;;  %v8282_v60 = vmul.f32 0.01, %v8274_v32  ;;  %v8283_v55 = vmul.f32 0.01, %v8275_v50  ;;  %v8269_v29 = vmul.f32 %v8676_v41, %v8237_v42 }
 0xbb5   : > { %v8284_v36 = vmul.f32 0.01, %v8276_v56  ;;  %v8270_v38 = vmul.f32 %v8676_v41, %v8238_v52  ;;  %v8271_v11 = vmul.f32 %v8676_v41, %v8239_v33  ;;  %v8272_v0 = vmul.f32 %v8676_v41, %v8240_v4 }
 0xbb6   : > { %v8289_v31 = vmax.f32 %v8273_v57, %v8281_v17  ;;  %v8290_v14 = vmax.f32 %v8274_v32, %v8282_v60  ;;  %v8291_v8 = vmax.f32 %v8275_v50, %v8283_v55  ;;  %v8277_v24 = vadd.f32 %v8269_v29, %v12263_v54 }
 0xbb7   : > { %v8292_v16 = vmax.f32 %v8276_v56, %v8284_v36  ;;  %v8278_v22 = vadd.f32 %v8270_v38, %v12264_v2  ;;  %v8279_v19 = vadd.f32 %v8271_v11, %v12265_v21  ;;  %v8280_v23 = vadd.f32 %v8272_v0, %v12266_v44 }
 0xbb8   : > { %8297 = vst [vmem:[%s325_s20] sm:$0xff] %v8289_v31  ;;  %8298 = vst [vmem:[%s325_s20 + $0x8] sm:$0xff] %v8290_v14  ;;  %v8285_v9 = vmul.f32 0.01, %v8277_v24 }
 0xbb9   : > { %8299 = vst [vmem:[%s325_s20 + $0x10] sm:$0xff] %v8291_v8  ;;  %8300 = vst [vmem:[%s325_s20 + $0x18] sm:$0xff] %v8292_v16  ;;  %v8286_v5 = vmul.f32 0.01, %v8278_v22  ;;  %v8287_v3 = vmul.f32 0.01, %v8279_v19 }
 0xbba   : > { %v8288_v15 = vmul.f32 0.01, %v8280_v23  ;;  %v8293_v20 = vmax.f32 %v8277_v24, %v8285_v9 }
 0xbbb   : > { %v8294_v48 = vmax.f32 %v8278_v22, %v8286_v5  ;;  %v8295_v27 = vmax.f32 %v8279_v19, %v8287_v3 }
 0xbbc   : > { %v8296_v35 = vmax.f32 %v8280_v23, %v8288_v15  ;;  %8301 = vst [vmem:[%s325_s20 + $0x20] sm:$0xff] %v8293_v20 }
 0xbbd   : > { %8302 = vst [vmem:[%s325_s20 + $0x28] sm:$0xff] %v8294_v48  ;;  %8303 = vst [vmem:[%s325_s20 + $0x30] sm:$0xff] %v8295_v27 }
 0xbbe   : > { %8304 = vst [vmem:[%s325_s20 + $0x38] sm:$0xff] %v8296_v35 }
 0xbbf PF: > { %s18_s27 = sadd.s32 1, %s8683_s27  }
 0xbc0   : > { %p15_p4 = scmp.ge.s32.totalorder %s18_s27, 4  }
 0xbc2   :  { %17 = sbr.rel (!%p15_p4) target bundleno = 1 (0x1), region = 136 }

</bundles_post_ra>
